<compile_context>
chip_gen: v6e
topology: v6e:2x2x1
jax: 0.10.0
libtpu: 0.0.40
codegen_flags: <defaults>
</compile_context>

<pallas_src>
import math
import functools

import jax
import jax.numpy as jnp
from jax.experimental import pallas as pl
from jax.experimental.pallas import tpu as pltpu


# Row layout of the packed "small params" tensor (per layer, width max(D, FF)):
#   0: sa_bq   1: sa_bk   2: sa_bv   3: sa_bo
#   4: ca_bq   5: ca_bk   6: ca_bv   7: ca_bo
#   8: ffn_b1  9: ffn_b2
#   10..12: LayerNorm gamma (norm0, norm1, norm2)
#   13..15: LayerNorm beta  (norm0, norm1, norm2)
_N_SMALL_ROWS = 16

# Column layout of the packed D-rows weight tensor (per layer, width 8D + FF):
#   [0,D)=sa_wq [D,2D)=sa_wk [2D,3D)=sa_wv [3D,4D)=sa_wo
#   [4D,5D)=ca_wq [5D,6D)=ca_wk [6D,7D)=ca_wv [7D,8D)=ca_wo
#   [8D,8D+FF)=ffn_w1


# ------------------------------ fused kernel ------------------------------- #

def _decoder_stack_kernel(q_in_ref, qpos_ref, key_ref, val_ref,
                          w_d_ref, w_ffn2_ref, small_ref,
                          out_ref,
                          attn_scr,
                          *, num_heads, num_layers):
    """One grid step = one batch element; all decoder layers run in-body."""
    x = q_in_ref[0].astype(jnp.float32)     # (Nq, D) carried decoder state
    qpos = qpos_ref[0]                      # (Nq, D)
    key = key_ref[0]                        # (Nk, D)
    val = val_ref[0]                        # (Nk, D)

    D = x.shape[-1]
    FF = w_ffn2_ref.shape[1]
    hd = D // num_heads
    scale = 1.0 / math.sqrt(hd)

    def gemm(a_f32, w_bf16):
        # bf16 MXU inputs, f32 accumulation; elementwise math stays f32.
        return jnp.dot(a_f32.astype(jnp.bfloat16), w_bf16,
                       preferred_element_type=jnp.float32)

    def layernorm(y, g, b):
        mu = jnp.mean(y, axis=-1, keepdims=True)
        var = jnp.mean(jnp.square(y - mu), axis=-1, keepdims=True)
        return (y - mu) * jax.lax.rsqrt(var + 1e-5) * g + b

    def multihead_attn(q, k, v):
        # Heads live on static lane slices; each head's output is written into
        # the (Nq, D) VMEM scratch (no jnp.concatenate / cross-lane merge).
        for h in range(num_heads):
            lo = h * hd
            s = jax.lax.dot_general(
                q[:, lo:lo + hd], k[:, lo:lo + hd],
                (((1,), (1,)), ((), ())),
                preferred_element_type=jnp.float32)              # (Nq, Nk)
            m = jnp.max(s, axis=-1, keepdims=True)
            p = jnp.exp(s - m)
            inv = pl.reciprocal(jnp.sum(p, axis=-1, keepdims=True), approx=False)
            o = jnp.dot(p, v[:, lo:lo + hd],
                        preferred_element_type=jnp.float32)      # (Nq, hd)
            attn_scr[:, lo:lo + hd] = o * inv                    # normalize post-PV
        return attn_scr[...]                                     # (Nq, D)

    # Static Python loop over layers (num_layers is small); switch to
    # lax.fori_loop with dynamic ref indexing if the layer count grows.
    for l in range(num_layers):
        sp = small_ref  # alias for brevity

        def bias(row, width):
            return sp[l, row:row + 1, 0:width]                   # (1, width) f32

        def gamma_beta(i):
            return sp[l, 10 + i:11 + i, 0:D], sp[l, 13 + i:14 + i, 0:D]

        # ---- self-attention: q = k = x + query_pos, v = x ------------------ #
        xq = x + qpos
        qk = gemm(xq, w_d_ref[l, :, 0:2 * D])                    # fused q+k proj
        q_sa = (qk[:, 0:D] + bias(0, D)) * scale                 # scale after bias
        k_sa = qk[:, D:2 * D] + bias(1, D)
        v_sa = gemm(x, w_d_ref[l, :, 2 * D:3 * D]) + bias(2, D)
        sa = multihead_attn(q_sa, k_sa, v_sa)
        sa = gemm(sa, w_d_ref[l, :, 3 * D:4 * D]) + bias(3, D)
        g0, b0 = gamma_beta(0)
        x = layernorm(x + sa, g0, b0)

        # ---- cross-attention over image-feature key/value ------------------ #
        # TODO(synk): the wrapped model's cross-attn type is not specified by
        # TestWrapper; standard (PETR-style) MHA is used, so reference_points /
        # spatial_shapes / level_start_index (deformable sampling) are unused.
        q_ca = (gemm(x + qpos, w_d_ref[l, :, 4 * D:5 * D]) + bias(4, D)) * scale
        k_ca = gemm(key, w_d_ref[l, :, 5 * D:6 * D]) + bias(5, D)
        v_ca = gemm(val, w_d_ref[l, :, 6 * D:7 * D]) + bias(6, D)
        ca = multihead_attn(q_ca, k_ca, v_ca)
        ca = gemm(ca, w_d_ref[l, :, 7 * D:8 * D]) + bias(7, D)
        g1, b1 = gamma_beta(1)
        x = layernorm(x + ca, g1, b1)

        # ---- FFN ------------------------------------------------------------ #
        h = jnp.maximum(
            gemm(x, w_d_ref[l, :, 8 * D:8 * D + FF]) + bias(8, FF), 0.0)
        ff = gemm(h, w_ffn2_ref[l]) + bias(9, D)
        g2, b2 = gamma_beta(2)
        x = layernorm(x + ff, g2, b2)

    # Single output store per batch element.
    out_ref[0] = x.astype(out_ref.dtype)
    # TODO(synk): with D < 128 this store is lane-masked; a wrapper-side
    # lane-dense (B, Nq*D//128, 128) output layout would remove the masking,
    # but it is a single (Nq, D) store per batch element here.


def decoder_forward(query, query_pos, key, value, params, num_heads):
    """Run the whole decoder-layer stack in a single pallas_call, grid=(B,)."""
    B, Nq, D = query.shape
    Nk = key.shape[1]
    L, _, Wd = params['w_d'].shape
    FF = params['w_ffn2'].shape[1]
    SR, SW = params['small'].shape[1], params['small'].shape[2]

    def data_spec(n):
        return pl.BlockSpec((1, n, D), lambda b: (b, 0, 0))

    def wt_spec(shape):
        # Constant index_map -> the whole stacked weight is DMA'd once and
        # stays VMEM-resident across the batch grid (never re-streamed).
        return pl.BlockSpec(shape, lambda b: (0, 0, 0))

    kern = functools.partial(_decoder_stack_kernel,
                             num_heads=num_heads, num_layers=L)
    return pl.pallas_call(
        kern,
        out_shape=jax.ShapeDtypeStruct((B, Nq, D), query.dtype),
        grid=(B,),
        in_specs=[
            data_spec(Nq),            # query (initial decoder state)
            data_spec(Nq),            # query_pos
            data_spec(Nk),            # key
            data_spec(Nk),            # value
            wt_spec((L, D, Wd)),      # packed D-rows weights (bf16)
            wt_spec((L, FF, D)),      # ffn_w2 (bf16)
            wt_spec((L, SR, SW)),     # packed biases + LN gamma/beta (f32)
        ],
        out_specs=pl.BlockSpec((1, Nq, D), lambda b: (b, 0, 0)),
        scratch_shapes=[pltpu.VMEM((Nq, D), jnp.float32)],   # per-head attn merge
        compiler_params=pltpu.CompilerParams(
            dimension_semantics=("parallel",)),
    )(query, query_pos, key, value,
      params['w_d'], params['w_ffn2'], params['small'])


# ------------------------- TestWrapper.forward mirror ----------------------- #

@functools.partial(jax.jit, static_argnames=("num_heads",))
def test_wrapper_forward(batch, key, params, *, num_heads):
    query = batch['query']
    reference_points = batch['reference_points']
    query_pos = batch['query_pos']
    value = batch['value']
    # TODO(synk): reference_points[..., :2].unsqueeze(2) is only consumed by a
    # deformable cross-attention that the wrapped model does not expose here;
    # it is therefore not recomputed per layer (dead work in the original loop).
    output = decoder_forward(query, query_pos, key, value, params, num_heads)
    return output, reference_points


# -------------------------- deterministic parameters ------------------------ #

def init_stacked_params(rng, num_layers, D, FF, num_heads):
    del num_heads  # scale is applied in-kernel (weights are NOT pre-scaled)

    def dense(k, fan_in, fan_out):
        return 0.02 * jax.random.normal(k, (fan_in, fan_out), jnp.float32)

    Wmax = max(D, FF)
    w_d, w_ffn2, small = [], [], []
    for l in range(num_layers):
        kl = jax.random.fold_in(rng, l)
        ks = jax.random.split(kl, 10)
        blocks = [
            dense(ks[0], D, D),   # sa_wq
            dense(ks[1], D, D),   # sa_wk
            dense(ks[2], D, D),   # sa_wv
            dense(ks[3], D, D),   # sa_wo
            dense(ks[4], D, D),   # ca_wq
            dense(ks[5], D, D),   # ca_wk
            dense(ks[6], D, D),   # ca_wv
            dense(ks[7], D, D),   # ca_wo
            dense(ks[8], D, FF),  # ffn_w1
        ]
        w_d.append(jnp.concatenate(blocks, axis=1))              # (D, 8D+FF)
        w_ffn2.append(dense(ks[9], FF, D))                       # (FF, D)

        rows = jnp.zeros((_N_SMALL_ROWS, Wmax), jnp.float32)     # biases = 0
        rows = rows.at[10:13, 0:D].set(1.0)                      # LN gammas = 1
        small.append(rows)

    return dict(
        w_d=jnp.stack(w_d).astype(jnp.bfloat16),        # (L, D, 8D+FF) bf16
        w_ffn2=jnp.stack(w_ffn2).astype(jnp.bfloat16),  # (L, FF, D)    bf16
        small=jnp.stack(small),                         # (L, 16, max(D,FF)) f32
    )


# ----------------------------------- main ----------------------------------- #

if __name__ == "__main__":
    B, Nq, Nk, D, H, FF, NUM_LAYERS = 2, 16, 64, 32, 4, 64, 2

    root = jax.random.PRNGKey(0)
    ks = jax.random.split(root, 8)

    batch = {
        'query': jax.random.normal(ks[0], (B, Nq, D), jnp.float32),
        'reference_points': jax.random.uniform(ks[1], (B, Nq, 3), jnp.float32),
        'spatial_shapes': jnp.array([[8, 8]], jnp.int32),
        'value': jax.random.normal(ks[2], (B, Nk, D), jnp.float32),
        'level_start_index': jnp.array([0], jnp.int32),
        'query_pos': jax.random.normal(ks[3], (B, Nq, D), jnp.float32),
    }
    # non-tensor / non-batch entries live in metadata (as TestWrapper.__init__ does)
    metadata = {
        'key': jax.random.normal(ks[4], (B, Nk, D), jnp.float32),
        'reg_branches': None,
        'cls_branches': None,
        'img_metas': [{}],
    }

    params = init_stacked_params(ks[5], NUM_LAYERS, D, FF, H)

    output, reference_points = test_wrapper_forward(
        batch, metadata['key'], params, num_heads=H)
    jax.block_until_ready(output)
    jax.block_until_ready(reference_points)

    assert output.shape == (B, Nq, D)
    assert reference_points.shape == (B, Nq, 3)
    print("KERNEL_OK")
</pallas_src>

<mosaic_0001>
module attributes {stable_mosaic.version = 11 : i64} {
  func.func @_decoder_stack_kernel(%arg0: i32, %arg1: memref<1x16x32xf32, #tpu.memory_space<vmem>>, %arg2: memref<1x16x32xf32, #tpu.memory_space<vmem>>, %arg3: memref<1x64x32xf32, #tpu.memory_space<vmem>>, %arg4: memref<1x64x32xf32, #tpu.memory_space<vmem>>, %arg5: memref<2x32x320xbf16, #tpu.memory_space<vmem>>, %arg6: memref<2x64x32xbf16, #tpu.memory_space<vmem>>, %arg7: memref<2x16x64xf32, #tpu.memory_space<vmem>>, %arg8: memref<1x16x32xf32, #tpu.memory_space<vmem>>, %arg9: memref<16x32xf32, #tpu.memory_space<vmem>>) attributes {dimension_semantics = [#tpu.dimension_semantics<parallel>], iteration_bounds = array<i64: 2>, scalar_prefetch = 0 : i64, scratch_operands = 1 : i64, tpu.core_type = #tpu.core_type<tc>, window_params = [{transform_indices = @transform_0, window_bounds = array<i64: 1, 16, 32>}, {transform_indices = @transform_1, window_bounds = array<i64: 1, 16, 32>}, {transform_indices = @transform_2, window_bounds = array<i64: 1, 64, 32>}, {transform_indices = @transform_3, window_bounds = array<i64: 1, 64, 32>}, {pipeline_mode = #tpu.pipeline_mode<synchronous>, transform_indices = @transform_4, window_bounds = array<i64: 2, 32, 320>}, {pipeline_mode = #tpu.pipeline_mode<synchronous>, transform_indices = @transform_5, window_bounds = array<i64: 2, 64, 32>}, {pipeline_mode = #tpu.pipeline_mode<synchronous>, transform_indices = @transform_6, window_bounds = array<i64: 2, 16, 64>}, {transform_indices = @transform_7, window_bounds = array<i64: 1, 16, 32>}]} {
    %c0 = arith.constant 0 : index
    %c0_0 = arith.constant 0 : index
    %c0_1 = arith.constant 0 : index
    %0 = vector.load %arg1[%c0, %c0_0, %c0_1] : memref<1x16x32xf32, #tpu.memory_space<vmem>>, vector<1x16x32xf32>
    %1 = vector.shape_cast %0 : vector<1x16x32xf32> to vector<16x32xf32>
    %c0_2 = arith.constant 0 : index
    %c0_3 = arith.constant 0 : index
    %c0_4 = arith.constant 0 : index
    %2 = vector.load %arg2[%c0_2, %c0_3, %c0_4] : memref<1x16x32xf32, #tpu.memory_space<vmem>>, vector<1x16x32xf32>
    %3 = vector.shape_cast %2 : vector<1x16x32xf32> to vector<16x32xf32>
    %c0_5 = arith.constant 0 : index
    %c0_6 = arith.constant 0 : index
    %c0_7 = arith.constant 0 : index
    %4 = vector.load %arg3[%c0_5, %c0_6, %c0_7] : memref<1x64x32xf32, #tpu.memory_space<vmem>>, vector<1x64x32xf32>
    %5 = vector.shape_cast %4 : vector<1x64x32xf32> to vector<64x32xf32>
    %c0_8 = arith.constant 0 : index
    %c0_9 = arith.constant 0 : index
    %c0_10 = arith.constant 0 : index
    %6 = vector.load %arg4[%c0_8, %c0_9, %c0_10] : memref<1x64x32xf32, #tpu.memory_space<vmem>>, vector<1x64x32xf32>
    %7 = vector.shape_cast %6 : vector<1x64x32xf32> to vector<64x32xf32>
    %8 = arith.addf %1, %3 : vector<16x32xf32>
    %c0_11 = arith.constant 0 : index
    %c0_12 = arith.constant 0 : index
    %c0_13 = arith.constant 0 : index
    %9 = vector.load %arg5[%c0_11, %c0_12, %c0_13] : memref<2x32x320xbf16, #tpu.memory_space<vmem>>, vector<1x32x64xbf16>
    %10 = vector.shape_cast %9 : vector<1x32x64xbf16> to vector<32x64xbf16>
    %11 = arith.truncf %8 : vector<16x32xf32> to vector<16x32xbf16>
    %cst = arith.constant dense<0.000000e+00> : vector<16x64xf32>
    %12 = tpu.matmul %11, %10, %cst {dimension_numbers = #tpu.dot_dimension_numbers<[1], [0], [0], [1], [0, 0, 1, 1], [], []>} : vector<16x32xbf16>, vector<32x64xbf16>, vector<16x64xf32> -> vector<16x64xf32>
    %13 = vector.extract_strided_slice %12 {offsets = [0, 0], sizes = [16, 32], strides = [1, 1]} : vector<16x64xf32> to vector<16x32xf32>
    %c0_14 = arith.constant 0 : index
    %c0_15 = arith.constant 0 : index
    %c0_16 = arith.constant 0 : index
    %14 = vector.load %arg7[%c0_14, %c0_15, %c0_16] : memref<2x16x64xf32, #tpu.memory_space<vmem>>, vector<1x1x32xf32>
    %15 = vector.shape_cast %14 : vector<1x1x32xf32> to vector<1x32xf32>
    %16 = vector.broadcast %15 : vector<1x32xf32> to vector<16x32xf32>
    %17 = arith.addf %13, %16 : vector<16x32xf32>
    %cst_17 = arith.constant 0.353553385 : f32
    %18 = vector.broadcast %cst_17 : f32 to vector<16x32xf32>
    %19 = arith.mulf %17, %18 : vector<16x32xf32>
    %20 = vector.extract_strided_slice %12 {offsets = [0, 32], sizes = [16, 32], strides = [1, 1]} : vector<16x64xf32> to vector<16x32xf32>
    %c0_18 = arith.constant 0 : index
    %c1 = arith.constant 1 : index
    %c0_19 = arith.constant 0 : index
    %21 = vector.load %arg7[%c0_18, %c1, %c0_19] : memref<2x16x64xf32, #tpu.memory_space<vmem>>, vector<1x1x32xf32>
    %22 = vector.shape_cast %21 : vector<1x1x32xf32> to vector<1x32xf32>
    %23 = vector.broadcast %22 : vector<1x32xf32> to vector<16x32xf32>
    %24 = arith.addf %20, %23 : vector<16x32xf32>
    %c0_20 = arith.constant 0 : index
    %c0_21 = arith.constant 0 : index
    %c64 = arith.constant 64 : index
    %25 = vector.load %arg5[%c0_20, %c0_21, %c64] : memref<2x32x320xbf16, #tpu.memory_space<vmem>>, vector<1x32x32xbf16>
    %26 = vector.shape_cast %25 : vector<1x32x32xbf16> to vector<32x32xbf16>
    %27 = arith.truncf %1 : vector<16x32xf32> to vector<16x32xbf16>
    %cst_22 = arith.constant dense<0.000000e+00> : vector<16x32xf32>
    %28 = tpu.matmul %27, %26, %cst_22 {dimension_numbers = #tpu.dot_dimension_numbers<[1], [0], [0], [1], [0, 0, 1, 1], [], []>} : vector<16x32xbf16>, vector<32x32xbf16>, vector<16x32xf32> -> vector<16x32xf32>
    %c0_23 = arith.constant 0 : index
    %c2 = arith.constant 2 : index
    %c0_24 = arith.constant 0 : index
    %29 = vector.load %arg7[%c0_23, %c2, %c0_24] : memref<2x16x64xf32, #tpu.memory_space<vmem>>, vector<1x1x32xf32>
    %30 = vector.shape_cast %29 : vector<1x1x32xf32> to vector<1x32xf32>
    %31 = vector.broadcast %30 : vector<1x32xf32> to vector<16x32xf32>
    %32 = arith.addf %28, %31 : vector<16x32xf32>
    %33 = vector.extract_strided_slice %19 {offsets = [0, 0], sizes = [16, 8], strides = [1, 1]} : vector<16x32xf32> to vector<16x8xf32>
    %34 = vector.extract_strided_slice %24 {offsets = [0, 0], sizes = [16, 8], strides = [1, 1]} : vector<16x32xf32> to vector<16x8xf32>
    %cst_25 = arith.constant dense<0.000000e+00> : vector<16x16xf32>
    %35 = tpu.matmul %33, %34, %cst_25 {dimension_numbers = #tpu.dot_dimension_numbers<[1], [1], [0], [0], [0, 0, 1, 0], [], []>} : vector<16x8xf32>, vector<16x8xf32>, vector<16x16xf32> -> vector<16x16xf32>
    %cst_26 = arith.constant dense<0xFF800000> : vector<16xf32>
    %36 = vector.multi_reduction <maximumf>, %35, %cst_26 [1] : vector<16x16xf32> to vector<16xf32>
    %37 = vector.shape_cast %36 : vector<16xf32> to vector<16x1xf32>
    %38 = vector.broadcast %37 : vector<16x1xf32> to vector<16x16xf32>
    %39 = arith.subf %35, %38 : vector<16x16xf32>
    %40 = math.exp %39 : vector<16x16xf32>
    %cst_27 = arith.constant dense<0.000000e+00> : vector<16xf32>
    %41 = vector.multi_reduction <add>, %40, %cst_27 [1] : vector<16x16xf32> to vector<16xf32>
    %42 = vector.shape_cast %41 : vector<16xf32> to vector<16x1xf32>
    %43 = tpu.reciprocal %42 : vector<16x1xf32> -> vector<16x1xf32>
    %44 = vector.extract_strided_slice %32 {offsets = [0, 0], sizes = [16, 8], strides = [1, 1]} : vector<16x32xf32> to vector<16x8xf32>
    %cst_28 = arith.constant dense<0.000000e+00> : vector<16x8xf32>
    %45 = tpu.matmul %40, %44, %cst_28 {dimension_numbers = #tpu.dot_dimension_numbers<[1], [0], [0], [1], [0, 0, 1, 1], [], []>} : vector<16x16xf32>, vector<16x8xf32>, vector<16x8xf32> -> vector<16x8xf32>
    %46 = vector.broadcast %43 : vector<16x1xf32> to vector<16x8xf32>
    %47 = arith.mulf %45, %46 : vector<16x8xf32>
    %c0_29 = arith.constant 0 : index
    %c0_30 = arith.constant 0 : index
    %48 = vector.load %arg9[%c0_29, %c0_30] : memref<16x32xf32, #tpu.memory_space<vmem>>, vector<16x8xf32>
    tpu.vector_store %arg9[%c0_29, %c0_30], %47 {strides = array<i32>} : memref<16x32xf32, #tpu.memory_space<vmem>>, vector<16x8xf32>,
    %49 = vector.extract_strided_slice %19 {offsets = [0, 8], sizes = [16, 8], strides = [1, 1]} : vector<16x32xf32> to vector<16x8xf32>
    %50 = vector.extract_strided_slice %24 {offsets = [0, 8], sizes = [16, 8], strides = [1, 1]} : vector<16x32xf32> to vector<16x8xf32>
    %cst_31 = arith.constant dense<0.000000e+00> : vector<16x16xf32>
    %51 = tpu.matmul %49, %50, %cst_31 {dimension_numbers = #tpu.dot_dimension_numbers<[1], [1], [0], [0], [0, 0, 1, 0], [], []>} : vector<16x8xf32>, vector<16x8xf32>, vector<16x16xf32> -> vector<16x16xf32>
    %cst_32 = arith.constant dense<0xFF800000> : vector<16xf32>
    %52 = vector.multi_reduction <maximumf>, %51, %cst_32 [1] : vector<16x16xf32> to vector<16xf32>
    %53 = vector.shape_cast %52 : vector<16xf32> to vector<16x1xf32>
    %54 = vector.broadcast %53 : vector<16x1xf32> to vector<16x16xf32>
    %55 = arith.subf %51, %54 : vector<16x16xf32>
    %56 = math.exp %55 : vector<16x16xf32>
    %cst_33 = arith.constant dense<0.000000e+00> : vector<16xf32>
    %57 = vector.multi_reduction <add>, %56, %cst_33 [1] : vector<16x16xf32> to vector<16xf32>
    %58 = vector.shape_cast %57 : vector<16xf32> to vector<16x1xf32>
    %59 = tpu.reciprocal %58 : vector<16x1xf32> -> vector<16x1xf32>
    %60 = vector.extract_strided_slice %32 {offsets = [0, 8], sizes = [16, 8], strides = [1, 1]} : vector<16x32xf32> to vector<16x8xf32>
    %cst_34 = arith.constant dense<0.000000e+00> : vector<16x8xf32>
    %61 = tpu.matmul %56, %60, %cst_34 {dimension_numbers = #tpu.dot_dimension_numbers<[1], [0], [0], [1], [0, 0, 1, 1], [], []>} : vector<16x16xf32>, vector<16x8xf32>, vector<16x8xf32> -> vector<16x8xf32>
    %62 = vector.broadcast %59 : vector<16x1xf32> to vector<16x8xf32>
    %63 = arith.mulf %61, %62 : vector<16x8xf32>
    %c0_35 = arith.constant 0 : index
    %c8 = arith.constant 8 : index
    %64 = vector.load %arg9[%c0_35, %c8] : memref<16x32xf32, #tpu.memory_space<vmem>>, vector<16x8xf32>
    tpu.vector_store %arg9[%c0_35, %c8], %63 {strides = array<i32>} : memref<16x32xf32, #tpu.memory_space<vmem>>, vector<16x8xf32>,
    %65 = vector.extract_strided_slice %19 {offsets = [0, 16], sizes = [16, 8], strides = [1, 1]} : vector<16x32xf32> to vector<16x8xf32>
    %66 = vector.extract_strided_slice %24 {offsets = [0, 16], sizes = [16, 8], strides = [1, 1]} : vector<16x32xf32> to vector<16x8xf32>
    %cst_36 = arith.constant dense<0.000000e+00> : vector<16x16xf32>
    %67 = tpu.matmul %65, %66, %cst_36 {dimension_numbers = #tpu.dot_dimension_numbers<[1], [1], [0], [0], [0, 0, 1, 0], [], []>} : vector<16x8xf32>, vector<16x8xf32>, vector<16x16xf32> -> vector<16x16xf32>
    %cst_37 = arith.constant dense<0xFF800000> : vector<16xf32>
    %68 = vector.multi_reduction <maximumf>, %67, %cst_37 [1] : vector<16x16xf32> to vector<16xf32>
    %69 = vector.shape_cast %68 : vector<16xf32> to vector<16x1xf32>
    %70 = vector.broadcast %69 : vector<16x1xf32> to vector<16x16xf32>
    %71 = arith.subf %67, %70 : vector<16x16xf32>
    %72 = math.exp %71 : vector<16x16xf32>
    %cst_38 = arith.constant dense<0.000000e+00> : vector<16xf32>
    %73 = vector.multi_reduction <add>, %72, %cst_38 [1] : vector<16x16xf32> to vector<16xf32>
    %74 = vector.shape_cast %73 : vector<16xf32> to vector<16x1xf32>
    %75 = tpu.reciprocal %74 : vector<16x1xf32> -> vector<16x1xf32>
    %76 = vector.extract_strided_slice %32 {offsets = [0, 16], sizes = [16, 8], strides = [1, 1]} : vector<16x32xf32> to vector<16x8xf32>
    %cst_39 = arith.constant dense<0.000000e+00> : vector<16x8xf32>
    %77 = tpu.matmul %72, %76, %cst_39 {dimension_numbers = #tpu.dot_dimension_numbers<[1], [0], [0], [1], [0, 0, 1, 1], [], []>} : vector<16x16xf32>, vector<16x8xf32>, vector<16x8xf32> -> vector<16x8xf32>
    %78 = vector.broadcast %75 : vector<16x1xf32> to vector<16x8xf32>
    %79 = arith.mulf %77, %78 : vector<16x8xf32>
    %c0_40 = arith.constant 0 : index
    %c16 = arith.constant 16 : index
    %80 = vector.load %arg9[%c0_40, %c16] : memref<16x32xf32, #tpu.memory_space<vmem>>, vector<16x8xf32>
    tpu.vector_store %arg9[%c0_40, %c16], %79 {strides = array<i32>} : memref<16x32xf32, #tpu.memory_space<vmem>>, vector<16x8xf32>,
    %81 = vector.extract_strided_slice %19 {offsets = [0, 24], sizes = [16, 8], strides = [1, 1]} : vector<16x32xf32> to vector<16x8xf32>
    %82 = vector.extract_strided_slice %24 {offsets = [0, 24], sizes = [16, 8], strides = [1, 1]} : vector<16x32xf32> to vector<16x8xf32>
    %cst_41 = arith.constant dense<0.000000e+00> : vector<16x16xf32>
    %83 = tpu.matmul %81, %82, %cst_41 {dimension_numbers = #tpu.dot_dimension_numbers<[1], [1], [0], [0], [0, 0, 1, 0], [], []>} : vector<16x8xf32>, vector<16x8xf32>, vector<16x16xf32> -> vector<16x16xf32>
    %cst_42 = arith.constant dense<0xFF800000> : vector<16xf32>
    %84 = vector.multi_reduction <maximumf>, %83, %cst_42 [1] : vector<16x16xf32> to vector<16xf32>
    %85 = vector.shape_cast %84 : vector<16xf32> to vector<16x1xf32>
    %86 = vector.broadcast %85 : vector<16x1xf32> to vector<16x16xf32>
    %87 = arith.subf %83, %86 : vector<16x16xf32>
    %88 = math.exp %87 : vector<16x16xf32>
    %cst_43 = arith.constant dense<0.000000e+00> : vector<16xf32>
    %89 = vector.multi_reduction <add>, %88, %cst_43 [1] : vector<16x16xf32> to vector<16xf32>
    %90 = vector.shape_cast %89 : vector<16xf32> to vector<16x1xf32>
    %91 = tpu.reciprocal %90 : vector<16x1xf32> -> vector<16x1xf32>
    %92 = vector.extract_strided_slice %32 {offsets = [0, 24], sizes = [16, 8], strides = [1, 1]} : vector<16x32xf32> to vector<16x8xf32>
    %cst_44 = arith.constant dense<0.000000e+00> : vector<16x8xf32>
    %93 = tpu.matmul %88, %92, %cst_44 {dimension_numbers = #tpu.dot_dimension_numbers<[1], [0], [0], [1], [0, 0, 1, 1], [], []>} : vector<16x16xf32>, vector<16x8xf32>, vector<16x8xf32> -> vector<16x8xf32>
    %94 = vector.broadcast %91 : vector<16x1xf32> to vector<16x8xf32>
    %95 = arith.mulf %93, %94 : vector<16x8xf32>
    %c0_45 = arith.constant 0 : index
    %c24 = arith.constant 24 : index
    %96 = vector.load %arg9[%c0_45, %c24] : memref<16x32xf32, #tpu.memory_space<vmem>>, vector<16x8xf32>
    tpu.vector_store %arg9[%c0_45, %c24], %95 {strides = array<i32>} : memref<16x32xf32, #tpu.memory_space<vmem>>, vector<16x8xf32>,
    %c0_46 = arith.constant 0 : index
    %c0_47 = arith.constant 0 : index
    %97 = vector.load %arg9[%c0_46, %c0_47] : memref<16x32xf32, #tpu.memory_space<vmem>>, vector<16x32xf32>
    %c0_48 = arith.constant 0 : index
    %c0_49 = arith.constant 0 : index
    %c96 = arith.constant 96 : index
    %98 = vector.load %arg5[%c0_48, %c0_49, %c96] : memref<2x32x320xbf16, #tpu.memory_space<vmem>>, vector<1x32x32xbf16>
    %99 = vector.shape_cast %98 : vector<1x32x32xbf16> to vector<32x32xbf16>
    %100 = arith.truncf %97 : vector<16x32xf32> to vector<16x32xbf16>
    %cst_50 = arith.constant dense<0.000000e+00> : vector<16x32xf32>
    %101 = tpu.matmul %100, %99, %cst_50 {dimension_numbers = #tpu.dot_dimension_numbers<[1], [0], [0], [1], [0, 0, 1, 1], [], []>} : vector<16x32xbf16>, vector<32x32xbf16>, vector<16x32xf32> -> vector<16x32xf32>
    %c0_51 = arith.constant 0 : index
    %c3 = arith.constant 3 : index
    %c0_52 = arith.constant 0 : index
    %102 = vector.load %arg7[%c0_51, %c3, %c0_52] : memref<2x16x64xf32, #tpu.memory_space<vmem>>, vector<1x1x32xf32>
    %103 = vector.shape_cast %102 : vector<1x1x32xf32> to vector<1x32xf32>
    %104 = vector.broadcast %103 : vector<1x32xf32> to vector<16x32xf32>
    %105 = arith.addf %101, %104 : vector<16x32xf32>
    %c0_53 = arith.constant 0 : index
    %c10 = arith.constant 10 : index
    %c0_54 = arith.constant 0 : index
    %106 = vector.load %arg7[%c0_53, %c10, %c0_54] : memref<2x16x64xf32, #tpu.memory_space<vmem>>, vector<1x1x32xf32>
    %107 = vector.shape_cast %106 : vector<1x1x32xf32> to vector<1x32xf32>
    %c0_55 = arith.constant 0 : index
    %c13 = arith.constant 13 : index
    %c0_56 = arith.constant 0 : index
    %108 = vector.load %arg7[%c0_55, %c13, %c0_56] : memref<2x16x64xf32, #tpu.memory_space<vmem>>, vector<1x1x32xf32>
    %109 = vector.shape_cast %108 : vector<1x1x32xf32> to vector<1x32xf32>
    %110 = arith.addf %1, %105 : vector<16x32xf32>
    %cst_57 = arith.constant dense<0.000000e+00> : vector<16xf32>
    %111 = vector.multi_reduction <add>, %110, %cst_57 [1] : vector<16x32xf32> to vector<16xf32>
    %112 = vector.shape_cast %111 : vector<16xf32> to vector<16x1xf32>
    %cst_58 = arith.constant 3.200000e+01 : f32
    %113 = vector.broadcast %cst_58 : f32 to vector<16x1xf32>
    %114 = arith.divf %112, %113 : vector<16x1xf32>
    %115 = vector.broadcast %114 : vector<16x1xf32> to vector<16x32xf32>
    %116 = arith.subf %110, %115 : vector<16x32xf32>
    %117 = arith.mulf %116, %116 : vector<16x32xf32>
    %cst_59 = arith.constant dense<0.000000e+00> : vector<16xf32>
    %118 = vector.multi_reduction <add>, %117, %cst_59 [1] : vector<16x32xf32> to vector<16xf32>
    %119 = vector.shape_cast %118 : vector<16xf32> to vector<16x1xf32>
    %cst_60 = arith.constant 3.200000e+01 : f32
    %120 = vector.broadcast %cst_60 : f32 to vector<16x1xf32>
    %121 = arith.divf %119, %120 : vector<16x1xf32>
    %122 = vector.broadcast %114 : vector<16x1xf32> to vector<16x32xf32>
    %123 = arith.subf %110, %122 : vector<16x32xf32>
    %cst_61 = arith.constant 9.99999974E-6 : f32
    %124 = vector.broadcast %cst_61 : f32 to vector<16x1xf32>
    %125 = arith.addf %121, %124 : vector<16x1xf32>
    %126 = math.rsqrt %125 : vector<16x1xf32>
    %127 = vector.broadcast %126 : vector<16x1xf32> to vector<16x32xf32>
    %128 = arith.mulf %123, %127 : vector<16x32xf32>
    %129 = vector.broadcast %107 : vector<1x32xf32> to vector<16x32xf32>
    %130 = arith.mulf %128, %129 : vector<16x32xf32>
    %131 = vector.broadcast %109 : vector<1x32xf32> to vector<16x32xf32>
    %132 = arith.addf %130, %131 : vector<16x32xf32>
    %133 = arith.addf %132, %3 : vector<16x32xf32>
    %c0_62 = arith.constant 0 : index
    %c0_63 = arith.constant 0 : index
    %c128 = arith.constant 128 : index
    %134 = vector.load %arg5[%c0_62, %c0_63, %c128] : memref<2x32x320xbf16, #tpu.memory_space<vmem>>, vector<1x32x32xbf16>
    %135 = vector.shape_cast %134 : vector<1x32x32xbf16> to vector<32x32xbf16>
    %136 = arith.truncf %133 : vector<16x32xf32> to vector<16x32xbf16>
    %cst_64 = arith.constant dense<0.000000e+00> : vector<16x32xf32>
    %137 = tpu.matmul %136, %135, %cst_64 {dimension_numbers = #tpu.dot_dimension_numbers<[1], [0], [0], [1], [0, 0, 1, 1], [], []>} : vector<16x32xbf16>, vector<32x32xbf16>, vector<16x32xf32> -> vector<16x32xf32>
    %c0_65 = arith.constant 0 : index
    %c4 = arith.constant 4 : index
    %c0_66 = arith.constant 0 : index
    %138 = vector.load %arg7[%c0_65, %c4, %c0_66] : memref<2x16x64xf32, #tpu.memory_space<vmem>>, vector<1x1x32xf32>
    %139 = vector.shape_cast %138 : vector<1x1x32xf32> to vector<1x32xf32>
    %140 = vector.broadcast %139 : vector<1x32xf32> to vector<16x32xf32>
    %141 = arith.addf %137, %140 : vector<16x32xf32>
    %cst_67 = arith.constant 0.353553385 : f32
    %142 = vector.broadcast %cst_67 : f32 to vector<16x32xf32>
    %143 = arith.mulf %141, %142 : vector<16x32xf32>
    %c0_68 = arith.constant 0 : index
    %c0_69 = arith.constant 0 : index
    %c160 = arith.constant 160 : index
    %144 = vector.load %arg5[%c0_68, %c0_69, %c160] : memref<2x32x320xbf16, #tpu.memory_space<vmem>>, vector<1x32x32xbf16>
    %145 = vector.shape_cast %144 : vector<1x32x32xbf16> to vector<32x32xbf16>
    %146 = arith.truncf %5 : vector<64x32xf32> to vector<64x32xbf16>
    %cst_70 = arith.constant dense<0.000000e+00> : vector<64x32xf32>
    %147 = tpu.matmul %146, %145, %cst_70 {dimension_numbers = #tpu.dot_dimension_numbers<[1], [0], [0], [1], [0, 0, 1, 1], [], []>} : vector<64x32xbf16>, vector<32x32xbf16>, vector<64x32xf32> -> vector<64x32xf32>
    %c0_71 = arith.constant 0 : index
    %c5 = arith.constant 5 : index
    %c0_72 = arith.constant 0 : index
    %148 = vector.load %arg7[%c0_71, %c5, %c0_72] : memref<2x16x64xf32, #tpu.memory_space<vmem>>, vector<1x1x32xf32>
    %149 = vector.shape_cast %148 : vector<1x1x32xf32> to vector<1x32xf32>
    %150 = vector.broadcast %149 : vector<1x32xf32> to vector<64x32xf32>
    %151 = arith.addf %147, %150 : vector<64x32xf32>
    %c0_73 = arith.constant 0 : index
    %c0_74 = arith.constant 0 : index
    %c192 = arith.constant 192 : index
    %152 = vector.load %arg5[%c0_73, %c0_74, %c192] : memref<2x32x320xbf16, #tpu.memory_space<vmem>>, vector<1x32x32xbf16>
    %153 = vector.shape_cast %152 : vector<1x32x32xbf16> to vector<32x32xbf16>
    %154 = arith.truncf %7 : vector<64x32xf32> to vector<64x32xbf16>
    %cst_75 = arith.constant dense<0.000000e+00> : vector<64x32xf32>
    %155 = tpu.matmul %154, %153, %cst_75 {dimension_numbers = #tpu.dot_dimension_numbers<[1], [0], [0], [1], [0, 0, 1, 1], [], []>} : vector<64x32xbf16>, vector<32x32xbf16>, vector<64x32xf32> -> vector<64x32xf32>
    %c0_76 = arith.constant 0 : index
    %c6 = arith.constant 6 : index
    %c0_77 = arith.constant 0 : index
    %156 = vector.load %arg7[%c0_76, %c6, %c0_77] : memref<2x16x64xf32, #tpu.memory_space<vmem>>, vector<1x1x32xf32>
    %157 = vector.shape_cast %156 : vector<1x1x32xf32> to vector<1x32xf32>
    %158 = vector.broadcast %157 : vector<1x32xf32> to vector<64x32xf32>
    %159 = arith.addf %155, %158 : vector<64x32xf32>
    %160 = vector.extract_strided_slice %143 {offsets = [0, 0], sizes = [16, 8], strides = [1, 1]} : vector<16x32xf32> to vector<16x8xf32>
    %161 = vector.extract_strided_slice %151 {offsets = [0, 0], sizes = [64, 8], strides = [1, 1]} : vector<64x32xf32> to vector<64x8xf32>
    %cst_78 = arith.constant dense<0.000000e+00> : vector<16x64xf32>
    %162 = tpu.matmul %160, %161, %cst_78 {dimension_numbers = #tpu.dot_dimension_numbers<[1], [1], [0], [0], [0, 0, 1, 0], [], []>} : vector<16x8xf32>, vector<64x8xf32>, vector<16x64xf32> -> vector<16x64xf32>
    %cst_79 = arith.constant dense<0xFF800000> : vector<16xf32>
    %163 = vector.multi_reduction <maximumf>, %162, %cst_79 [1] : vector<16x64xf32> to vector<16xf32>
    %164 = vector.shape_cast %163 : vector<16xf32> to vector<16x1xf32>
    %165 = vector.broadcast %164 : vector<16x1xf32> to vector<16x64xf32>
    %166 = arith.subf %162, %165 : vector<16x64xf32>
    %167 = math.exp %166 : vector<16x64xf32>
    %cst_80 = arith.constant dense<0.000000e+00> : vector<16xf32>
    %168 = vector.multi_reduction <add>, %167, %cst_80 [1] : vector<16x64xf32> to vector<16xf32>
    %169 = vector.shape_cast %168 : vector<16xf32> to vector<16x1xf32>
    %170 = tpu.reciprocal %169 : vector<16x1xf32> -> vector<16x1xf32>
    %171 = vector.extract_strided_slice %159 {offsets = [0, 0], sizes = [64, 8], strides = [1, 1]} : vector<64x32xf32> to vector<64x8xf32>
    %cst_81 = arith.constant dense<0.000000e+00> : vector<16x8xf32>
    %172 = tpu.matmul %167, %171, %cst_81 {dimension_numbers = #tpu.dot_dimension_numbers<[1], [0], [0], [1], [0, 0, 1, 1], [], []>} : vector<16x64xf32>, vector<64x8xf32>, vector<16x8xf32> -> vector<16x8xf32>
    %173 = vector.broadcast %170 : vector<16x1xf32> to vector<16x8xf32>
    %174 = arith.mulf %172, %173 : vector<16x8xf32>
    %c0_82 = arith.constant 0 : index
    %c0_83 = arith.constant 0 : index
    %175 = vector.load %arg9[%c0_82, %c0_83] : memref<16x32xf32, #tpu.memory_space<vmem>>, vector<16x8xf32>
    tpu.vector_store %arg9[%c0_82, %c0_83], %174 {strides = array<i32>} : memref<16x32xf32, #tpu.memory_space<vmem>>, vector<16x8xf32>,
    %176 = vector.extract_strided_slice %143 {offsets = [0, 8], sizes = [16, 8], strides = [1, 1]} : vector<16x32xf32> to vector<16x8xf32>
    %177 = vector.extract_strided_slice %151 {offsets = [0, 8], sizes = [64, 8], strides = [1, 1]} : vector<64x32xf32> to vector<64x8xf32>
    %cst_84 = arith.constant dense<0.000000e+00> : vector<16x64xf32>
    %178 = tpu.matmul %176, %177, %cst_84 {dimension_numbers = #tpu.dot_dimension_numbers<[1], [1], [0], [0], [0, 0, 1, 0], [], []>} : vector<16x8xf32>, vector<64x8xf32>, vector<16x64xf32> -> vector<16x64xf32>
    %cst_85 = arith.constant dense<0xFF800000> : vector<16xf32>
    %179 = vector.multi_reduction <maximumf>, %178, %cst_85 [1] : vector<16x64xf32> to vector<16xf32>
    %180 = vector.shape_cast %179 : vector<16xf32> to vector<16x1xf32>
    %181 = vector.broadcast %180 : vector<16x1xf32> to vector<16x64xf32>
    %182 = arith.subf %178, %181 : vector<16x64xf32>
    %183 = math.exp %182 : vector<16x64xf32>
    %cst_86 = arith.constant dense<0.000000e+00> : vector<16xf32>
    %184 = vector.multi_reduction <add>, %183, %cst_86 [1] : vector<16x64xf32> to vector<16xf32>
    %185 = vector.shape_cast %184 : vector<16xf32> to vector<16x1xf32>
    %186 = tpu.reciprocal %185 : vector<16x1xf32> -> vector<16x1xf32>
    %187 = vector.extract_strided_slice %159 {offsets = [0, 8], sizes = [64, 8], strides = [1, 1]} : vector<64x32xf32> to vector<64x8xf32>
    %cst_87 = arith.constant dense<0.000000e+00> : vector<16x8xf32>
    %188 = tpu.matmul %183, %187, %cst_87 {dimension_numbers = #tpu.dot_dimension_numbers<[1], [0], [0], [1], [0, 0, 1, 1], [], []>} : vector<16x64xf32>, vector<64x8xf32>, vector<16x8xf32> -> vector<16x8xf32>
    %189 = vector.broadcast %186 : vector<16x1xf32> to vector<16x8xf32>
    %190 = arith.mulf %188, %189 : vector<16x8xf32>
    %c0_88 = arith.constant 0 : index
    %c8_89 = arith.constant 8 : index
    %191 = vector.load %arg9[%c0_88, %c8_89] : memref<16x32xf32, #tpu.memory_space<vmem>>, vector<16x8xf32>
    tpu.vector_store %arg9[%c0_88, %c8_89], %190 {strides = array<i32>} : memref<16x32xf32, #tpu.memory_space<vmem>>, vector<16x8xf32>,
    %192 = vector.extract_strided_slice %143 {offsets = [0, 16], sizes = [16, 8], strides = [1, 1]} : vector<16x32xf32> to vector<16x8xf32>
    %193 = vector.extract_strided_slice %151 {offsets = [0, 16], sizes = [64, 8], strides = [1, 1]} : vector<64x32xf32> to vector<64x8xf32>
    %cst_90 = arith.constant dense<0.000000e+00> : vector<16x64xf32>
    %194 = tpu.matmul %192, %193, %cst_90 {dimension_numbers = #tpu.dot_dimension_numbers<[1], [1], [0], [0], [0, 0, 1, 0], [], []>} : vector<16x8xf32>, vector<64x8xf32>, vector<16x64xf32> -> vector<16x64xf32>
    %cst_91 = arith.constant dense<0xFF800000> : vector<16xf32>
    %195 = vector.multi_reduction <maximumf>, %194, %cst_91 [1] : vector<16x64xf32> to vector<16xf32>
    %196 = vector.shape_cast %195 : vector<16xf32> to vector<16x1xf32>
    %197 = vector.broadcast %196 : vector<16x1xf32> to vector<16x64xf32>
    %198 = arith.subf %194, %197 : vector<16x64xf32>
    %199 = math.exp %198 : vector<16x64xf32>
    %cst_92 = arith.constant dense<0.000000e+00> : vector<16xf32>
    %200 = vector.multi_reduction <add>, %199, %cst_92 [1] : vector<16x64xf32> to vector<16xf32>
    %201 = vector.shape_cast %200 : vector<16xf32> to vector<16x1xf32>
    %202 = tpu.reciprocal %201 : vector<16x1xf32> -> vector<16x1xf32>
    %203 = vector.extract_strided_slice %159 {offsets = [0, 16], sizes = [64, 8], strides = [1, 1]} : vector<64x32xf32> to vector<64x8xf32>
    %cst_93 = arith.constant dense<0.000000e+00> : vector<16x8xf32>
    %204 = tpu.matmul %199, %203, %cst_93 {dimension_numbers = #tpu.dot_dimension_numbers<[1], [0], [0], [1], [0, 0, 1, 1], [], []>} : vector<16x64xf32>, vector<64x8xf32>, vector<16x8xf32> -> vector<16x8xf32>
    %205 = vector.broadcast %202 : vector<16x1xf32> to vector<16x8xf32>
    %206 = arith.mulf %204, %205 : vector<16x8xf32>
    %c0_94 = arith.constant 0 : index
    %c16_95 = arith.constant 16 : index
    %207 = vector.load %arg9[%c0_94, %c16_95] : memref<16x32xf32, #tpu.memory_space<vmem>>, vector<16x8xf32>
    tpu.vector_store %arg9[%c0_94, %c16_95], %206 {strides = array<i32>} : memref<16x32xf32, #tpu.memory_space<vmem>>, vector<16x8xf32>,
    %208 = vector.extract_strided_slice %143 {offsets = [0, 24], sizes = [16, 8], strides = [1, 1]} : vector<16x32xf32> to vector<16x8xf32>
    %209 = vector.extract_strided_slice %151 {offsets = [0, 24], sizes = [64, 8], strides = [1, 1]} : vector<64x32xf32> to vector<64x8xf32>
    %cst_96 = arith.constant dense<0.000000e+00> : vector<16x64xf32>
    %210 = tpu.matmul %208, %209, %cst_96 {dimension_numbers = #tpu.dot_dimension_numbers<[1], [1], [0], [0], [0, 0, 1, 0], [], []>} : vector<16x8xf32>, vector<64x8xf32>, vector<16x64xf32> -> vector<16x64xf32>
    %cst_97 = arith.constant dense<0xFF800000> : vector<16xf32>
    %211 = vector.multi_reduction <maximumf>, %210, %cst_97 [1] : vector<16x64xf32> to vector<16xf32>
    %212 = vector.shape_cast %211 : vector<16xf32> to vector<16x1xf32>
    %213 = vector.broadcast %212 : vector<16x1xf32> to vector<16x64xf32>
    %214 = arith.subf %210, %213 : vector<16x64xf32>
    %215 = math.exp %214 : vector<16x64xf32>
    %cst_98 = arith.constant dense<0.000000e+00> : vector<16xf32>
    %216 = vector.multi_reduction <add>, %215, %cst_98 [1] : vector<16x64xf32> to vector<16xf32>
    %217 = vector.shape_cast %216 : vector<16xf32> to vector<16x1xf32>
    %218 = tpu.reciprocal %217 : vector<16x1xf32> -> vector<16x1xf32>
    %219 = vector.extract_strided_slice %159 {offsets = [0, 24], sizes = [64, 8], strides = [1, 1]} : vector<64x32xf32> to vector<64x8xf32>
    %cst_99 = arith.constant dense<0.000000e+00> : vector<16x8xf32>
    %220 = tpu.matmul %215, %219, %cst_99 {dimension_numbers = #tpu.dot_dimension_numbers<[1], [0], [0], [1], [0, 0, 1, 1], [], []>} : vector<16x64xf32>, vector<64x8xf32>, vector<16x8xf32> -> vector<16x8xf32>
    %221 = vector.broadcast %218 : vector<16x1xf32> to vector<16x8xf32>
    %222 = arith.mulf %220, %221 : vector<16x8xf32>
    %c0_100 = arith.constant 0 : index
    %c24_101 = arith.constant 24 : index
    %223 = vector.load %arg9[%c0_100, %c24_101] : memref<16x32xf32, #tpu.memory_space<vmem>>, vector<16x8xf32>
    tpu.vector_store %arg9[%c0_100, %c24_101], %222 {strides = array<i32>} : memref<16x32xf32, #tpu.memory_space<vmem>>, vector<16x8xf32>,
    %c0_102 = arith.constant 0 : index
    %c0_103 = arith.constant 0 : index
    %224 = vector.load %arg9[%c0_102, %c0_103] : memref<16x32xf32, #tpu.memory_space<vmem>>, vector<16x32xf32>
    %c0_104 = arith.constant 0 : index
    %c0_105 = arith.constant 0 : index
    %c224 = arith.constant 224 : index
    %225 = vector.load %arg5[%c0_104, %c0_105, %c224] : memref<2x32x320xbf16, #tpu.memory_space<vmem>>, vector<1x32x32xbf16>
    %226 = vector.shape_cast %225 : vector<1x32x32xbf16> to vector<32x32xbf16>
    %227 = arith.truncf %224 : vector<16x32xf32> to vector<16x32xbf16>
    %cst_106 = arith.constant dense<0.000000e+00> : vector<16x32xf32>
    %228 = tpu.matmul %227, %226, %cst_106 {dimension_numbers = #tpu.dot_dimension_numbers<[1], [0], [0], [1], [0, 0, 1, 1], [], []>} : vector<16x32xbf16>, vector<32x32xbf16>, vector<16x32xf32> -> vector<16x32xf32>
    %c0_107 = arith.constant 0 : index
    %c7 = arith.constant 7 : index
    %c0_108 = arith.constant 0 : index
    %229 = vector.load %arg7[%c0_107, %c7, %c0_108] : memref<2x16x64xf32, #tpu.memory_space<vmem>>, vector<1x1x32xf32>
    %230 = vector.shape_cast %229 : vector<1x1x32xf32> to vector<1x32xf32>
    %231 = vector.broadcast %230 : vector<1x32xf32> to vector<16x32xf32>
    %232 = arith.addf %228, %231 : vector<16x32xf32>
    %c0_109 = arith.constant 0 : index
    %c11 = arith.constant 11 : index
    %c0_110 = arith.constant 0 : index
    %233 = vector.load %arg7[%c0_109, %c11, %c0_110] : memref<2x16x64xf32, #tpu.memory_space<vmem>>, vector<1x1x32xf32>
    %234 = vector.shape_cast %233 : vector<1x1x32xf32> to vector<1x32xf32>
    %c0_111 = arith.constant 0 : index
    %c14 = arith.constant 14 : index
    %c0_112 = arith.constant 0 : index
    %235 = vector.load %arg7[%c0_111, %c14, %c0_112] : memref<2x16x64xf32, #tpu.memory_space<vmem>>, vector<1x1x32xf32>
    %236 = vector.shape_cast %235 : vector<1x1x32xf32> to vector<1x32xf32>
    %237 = arith.addf %132, %232 : vector<16x32xf32>
    %cst_113 = arith.constant dense<0.000000e+00> : vector<16xf32>
    %238 = vector.multi_reduction <add>, %237, %cst_113 [1] : vector<16x32xf32> to vector<16xf32>
    %239 = vector.shape_cast %238 : vector<16xf32> to vector<16x1xf32>
    %cst_114 = arith.constant 3.200000e+01 : f32
    %240 = vector.broadcast %cst_114 : f32 to vector<16x1xf32>
    %241 = arith.divf %239, %240 : vector<16x1xf32>
    %242 = vector.broadcast %241 : vector<16x1xf32> to vector<16x32xf32>
    %243 = arith.subf %237, %242 : vector<16x32xf32>
    %244 = arith.mulf %243, %243 : vector<16x32xf32>
    %cst_115 = arith.constant dense<0.000000e+00> : vector<16xf32>
    %245 = vector.multi_reduction <add>, %244, %cst_115 [1] : vector<16x32xf32> to vector<16xf32>
    %246 = vector.shape_cast %245 : vector<16xf32> to vector<16x1xf32>
    %cst_116 = arith.constant 3.200000e+01 : f32
    %247 = vector.broadcast %cst_116 : f32 to vector<16x1xf32>
    %248 = arith.divf %246, %247 : vector<16x1xf32>
    %249 = vector.broadcast %241 : vector<16x1xf32> to vector<16x32xf32>
    %250 = arith.subf %237, %249 : vector<16x32xf32>
    %cst_117 = arith.constant 9.99999974E-6 : f32
    %251 = vector.broadcast %cst_117 : f32 to vector<16x1xf32>
    %252 = arith.addf %248, %251 : vector<16x1xf32>
    %253 = math.rsqrt %252 : vector<16x1xf32>
    %254 = vector.broadcast %253 : vector<16x1xf32> to vector<16x32xf32>
    %255 = arith.mulf %250, %254 : vector<16x32xf32>
    %256 = vector.broadcast %234 : vector<1x32xf32> to vector<16x32xf32>
    %257 = arith.mulf %255, %256 : vector<16x32xf32>
    %258 = vector.broadcast %236 : vector<1x32xf32> to vector<16x32xf32>
    %259 = arith.addf %257, %258 : vector<16x32xf32>
    %c0_118 = arith.constant 0 : index
    %c0_119 = arith.constant 0 : index
    %c256 = arith.constant 256 : index
    %260 = vector.load %arg5[%c0_118, %c0_119, %c256] : memref<2x32x320xbf16, #tpu.memory_space<vmem>>, vector<1x32x64xbf16>
    %261 = vector.shape_cast %260 : vector<1x32x64xbf16> to vector<32x64xbf16>
    %262 = arith.truncf %259 : vector<16x32xf32> to vector<16x32xbf16>
    %cst_120 = arith.constant dense<0.000000e+00> : vector<16x64xf32>
    %263 = tpu.matmul %262, %261, %cst_120 {dimension_numbers = #tpu.dot_dimension_numbers<[1], [0], [0], [1], [0, 0, 1, 1], [], []>} : vector<16x32xbf16>, vector<32x64xbf16>, vector<16x64xf32> -> vector<16x64xf32>
    %c0_121 = arith.constant 0 : index
    %c8_122 = arith.constant 8 : index
    %c0_123 = arith.constant 0 : index
    %264 = vector.load %arg7[%c0_121, %c8_122, %c0_123] : memref<2x16x64xf32, #tpu.memory_space<vmem>>, vector<1x1x64xf32>
    %265 = vector.shape_cast %264 : vector<1x1x64xf32> to vector<1x64xf32>
    %266 = vector.broadcast %265 : vector<1x64xf32> to vector<16x64xf32>
    %267 = arith.addf %263, %266 : vector<16x64xf32>
    %cst_124 = arith.constant 0.000000e+00 : f32
    %268 = vector.broadcast %cst_124 : f32 to vector<16x64xf32>
    %269 = arith.maximumf %267, %268 : vector<16x64xf32>
    %c0_125 = arith.constant 0 : index
    %c0_126 = arith.constant 0 : index
    %c0_127 = arith.constant 0 : index
    %270 = vector.load %arg6[%c0_125, %c0_126, %c0_127] : memref<2x64x32xbf16, #tpu.memory_space<vmem>>, vector<1x64x32xbf16>
    %271 = vector.shape_cast %270 : vector<1x64x32xbf16> to vector<64x32xbf16>
    %272 = arith.truncf %269 : vector<16x64xf32> to vector<16x64xbf16>
    %cst_128 = arith.constant dense<0.000000e+00> : vector<16x32xf32>
    %273 = tpu.matmul %272, %271, %cst_128 {dimension_numbers = #tpu.dot_dimension_numbers<[1], [0], [0], [1], [0, 0, 1, 1], [], []>} : vector<16x64xbf16>, vector<64x32xbf16>, vector<16x32xf32> -> vector<16x32xf32>
    %c0_129 = arith.constant 0 : index
    %c9 = arith.constant 9 : index
    %c0_130 = arith.constant 0 : index
    %274 = vector.load %arg7[%c0_129, %c9, %c0_130] : memref<2x16x64xf32, #tpu.memory_space<vmem>>, vector<1x1x32xf32>
    %275 = vector.shape_cast %274 : vector<1x1x32xf32> to vector<1x32xf32>
    %276 = vector.broadcast %275 : vector<1x32xf32> to vector<16x32xf32>
    %277 = arith.addf %273, %276 : vector<16x32xf32>
    %c0_131 = arith.constant 0 : index
    %c12 = arith.constant 12 : index
    %c0_132 = arith.constant 0 : index
    %278 = vector.load %arg7[%c0_131, %c12, %c0_132] : memref<2x16x64xf32, #tpu.memory_space<vmem>>, vector<1x1x32xf32>
    %279 = vector.shape_cast %278 : vector<1x1x32xf32> to vector<1x32xf32>
    %c0_133 = arith.constant 0 : index
    %c15 = arith.constant 15 : index
    %c0_134 = arith.constant 0 : index
    %280 = vector.load %arg7[%c0_133, %c15, %c0_134] : memref<2x16x64xf32, #tpu.memory_space<vmem>>, vector<1x1x32xf32>
    %281 = vector.shape_cast %280 : vector<1x1x32xf32> to vector<1x32xf32>
    %282 = arith.addf %259, %277 : vector<16x32xf32>
    %cst_135 = arith.constant dense<0.000000e+00> : vector<16xf32>
    %283 = vector.multi_reduction <add>, %282, %cst_135 [1] : vector<16x32xf32> to vector<16xf32>
    %284 = vector.shape_cast %283 : vector<16xf32> to vector<16x1xf32>
    %cst_136 = arith.constant 3.200000e+01 : f32
    %285 = vector.broadcast %cst_136 : f32 to vector<16x1xf32>
    %286 = arith.divf %284, %285 : vector<16x1xf32>
    %287 = vector.broadcast %286 : vector<16x1xf32> to vector<16x32xf32>
    %288 = arith.subf %282, %287 : vector<16x32xf32>
    %289 = arith.mulf %288, %288 : vector<16x32xf32>
    %cst_137 = arith.constant dense<0.000000e+00> : vector<16xf32>
    %290 = vector.multi_reduction <add>, %289, %cst_137 [1] : vector<16x32xf32> to vector<16xf32>
    %291 = vector.shape_cast %290 : vector<16xf32> to vector<16x1xf32>
    %cst_138 = arith.constant 3.200000e+01 : f32
    %292 = vector.broadcast %cst_138 : f32 to vector<16x1xf32>
    %293 = arith.divf %291, %292 : vector<16x1xf32>
    %294 = vector.broadcast %286 : vector<16x1xf32> to vector<16x32xf32>
    %295 = arith.subf %282, %294 : vector<16x32xf32>
    %cst_139 = arith.constant 9.99999974E-6 : f32
    %296 = vector.broadcast %cst_139 : f32 to vector<16x1xf32>
    %297 = arith.addf %293, %296 : vector<16x1xf32>
    %298 = math.rsqrt %297 : vector<16x1xf32>
    %299 = vector.broadcast %298 : vector<16x1xf32> to vector<16x32xf32>
    %300 = arith.mulf %295, %299 : vector<16x32xf32>
    %301 = vector.broadcast %279 : vector<1x32xf32> to vector<16x32xf32>
    %302 = arith.mulf %300, %301 : vector<16x32xf32>
    %303 = vector.broadcast %281 : vector<1x32xf32> to vector<16x32xf32>
    %304 = arith.addf %302, %303 : vector<16x32xf32>
    %305 = arith.addf %304, %3 : vector<16x32xf32>
    %c1_140 = arith.constant 1 : index
    %c0_141 = arith.constant 0 : index
    %c0_142 = arith.constant 0 : index
    %306 = vector.load %arg5[%c1_140, %c0_141, %c0_142] : memref<2x32x320xbf16, #tpu.memory_space<vmem>>, vector<1x32x64xbf16>
    %307 = vector.shape_cast %306 : vector<1x32x64xbf16> to vector<32x64xbf16>
    %308 = arith.truncf %305 : vector<16x32xf32> to vector<16x32xbf16>
    %cst_143 = arith.constant dense<0.000000e+00> : vector<16x64xf32>
    %309 = tpu.matmul %308, %307, %cst_143 {dimension_numbers = #tpu.dot_dimension_numbers<[1], [0], [0], [1], [0, 0, 1, 1], [], []>} : vector<16x32xbf16>, vector<32x64xbf16>, vector<16x64xf32> -> vector<16x64xf32>
    %310 = vector.extract_strided_slice %309 {offsets = [0, 0], sizes = [16, 32], strides = [1, 1]} : vector<16x64xf32> to vector<16x32xf32>
    %c1_144 = arith.constant 1 : index
    %c0_145 = arith.constant 0 : index
    %c0_146 = arith.constant 0 : index
    %311 = vector.load %arg7[%c1_144, %c0_145, %c0_146] : memref<2x16x64xf32, #tpu.memory_space<vmem>>, vector<1x1x32xf32>
    %312 = vector.shape_cast %311 : vector<1x1x32xf32> to vector<1x32xf32>
    %313 = vector.broadcast %312 : vector<1x32xf32> to vector<16x32xf32>
    %314 = arith.addf %310, %313 : vector<16x32xf32>
    %cst_147 = arith.constant 0.353553385 : f32
    %315 = vector.broadcast %cst_147 : f32 to vector<16x32xf32>
    %316 = arith.mulf %314, %315 : vector<16x32xf32>
    %317 = vector.extract_strided_slice %309 {offsets = [0, 32], sizes = [16, 32], strides = [1, 1]} : vector<16x64xf32> to vector<16x32xf32>
    %c1_148 = arith.constant 1 : index
    %c1_149 = arith.constant 1 : index
    %c0_150 = arith.constant 0 : index
    %318 = vector.load %arg7[%c1_148, %c1_149, %c0_150] : memref<2x16x64xf32, #tpu.memory_space<vmem>>, vector<1x1x32xf32>
    %319 = vector.shape_cast %318 : vector<1x1x32xf32> to vector<1x32xf32>
    %320 = vector.broadcast %319 : vector<1x32xf32> to vector<16x32xf32>
    %321 = arith.addf %317, %320 : vector<16x32xf32>
    %c1_151 = arith.constant 1 : index
    %c0_152 = arith.constant 0 : index
    %c64_153 = arith.constant 64 : index
    %322 = vector.load %arg5[%c1_151, %c0_152, %c64_153] : memref<2x32x320xbf16, #tpu.memory_space<vmem>>, vector<1x32x32xbf16>
    %323 = vector.shape_cast %322 : vector<1x32x32xbf16> to vector<32x32xbf16>
    %324 = arith.truncf %304 : vector<16x32xf32> to vector<16x32xbf16>
    %cst_154 = arith.constant dense<0.000000e+00> : vector<16x32xf32>
    %325 = tpu.matmul %324, %323, %cst_154 {dimension_numbers = #tpu.dot_dimension_numbers<[1], [0], [0], [1], [0, 0, 1, 1], [], []>} : vector<16x32xbf16>, vector<32x32xbf16>, vector<16x32xf32> -> vector<16x32xf32>
    %c1_155 = arith.constant 1 : index
    %c2_156 = arith.constant 2 : index
    %c0_157 = arith.constant 0 : index
    %326 = vector.load %arg7[%c1_155, %c2_156, %c0_157] : memref<2x16x64xf32, #tpu.memory_space<vmem>>, vector<1x1x32xf32>
    %327 = vector.shape_cast %326 : vector<1x1x32xf32> to vector<1x32xf32>
    %328 = vector.broadcast %327 : vector<1x32xf32> to vector<16x32xf32>
    %329 = arith.addf %325, %328 : vector<16x32xf32>
    %330 = vector.extract_strided_slice %316 {offsets = [0, 0], sizes = [16, 8], strides = [1, 1]} : vector<16x32xf32> to vector<16x8xf32>
    %331 = vector.extract_strided_slice %321 {offsets = [0, 0], sizes = [16, 8], strides = [1, 1]} : vector<16x32xf32> to vector<16x8xf32>
    %cst_158 = arith.constant dense<0.000000e+00> : vector<16x16xf32>
    %332 = tpu.matmul %330, %331, %cst_158 {dimension_numbers = #tpu.dot_dimension_numbers<[1], [1], [0], [0], [0, 0, 1, 0], [], []>} : vector<16x8xf32>, vector<16x8xf32>, vector<16x16xf32> -> vector<16x16xf32>
    %cst_159 = arith.constant dense<0xFF800000> : vector<16xf32>
    %333 = vector.multi_reduction <maximumf>, %332, %cst_159 [1] : vector<16x16xf32> to vector<16xf32>
    %334 = vector.shape_cast %333 : vector<16xf32> to vector<16x1xf32>
    %335 = vector.broadcast %334 : vector<16x1xf32> to vector<16x16xf32>
    %336 = arith.subf %332, %335 : vector<16x16xf32>
    %337 = math.exp %336 : vector<16x16xf32>
    %cst_160 = arith.constant dense<0.000000e+00> : vector<16xf32>
    %338 = vector.multi_reduction <add>, %337, %cst_160 [1] : vector<16x16xf32> to vector<16xf32>
    %339 = vector.shape_cast %338 : vector<16xf32> to vector<16x1xf32>
    %340 = tpu.reciprocal %339 : vector<16x1xf32> -> vector<16x1xf32>
    %341 = vector.extract_strided_slice %329 {offsets = [0, 0], sizes = [16, 8], strides = [1, 1]} : vector<16x32xf32> to vector<16x8xf32>
    %cst_161 = arith.constant dense<0.000000e+00> : vector<16x8xf32>
    %342 = tpu.matmul %337, %341, %cst_161 {dimension_numbers = #tpu.dot_dimension_numbers<[1], [0], [0], [1], [0, 0, 1, 1], [], []>} : vector<16x16xf32>, vector<16x8xf32>, vector<16x8xf32> -> vector<16x8xf32>
    %343 = vector.broadcast %340 : vector<16x1xf32> to vector<16x8xf32>
    %344 = arith.mulf %342, %343 : vector<16x8xf32>
    %c0_162 = arith.constant 0 : index
    %c0_163 = arith.constant 0 : index
    %345 = vector.load %arg9[%c0_162, %c0_163] : memref<16x32xf32, #tpu.memory_space<vmem>>, vector<16x8xf32>
    tpu.vector_store %arg9[%c0_162, %c0_163], %344 {strides = array<i32>} : memref<16x32xf32, #tpu.memory_space<vmem>>, vector<16x8xf32>,
    %346 = vector.extract_strided_slice %316 {offsets = [0, 8], sizes = [16, 8], strides = [1, 1]} : vector<16x32xf32> to vector<16x8xf32>
    %347 = vector.extract_strided_slice %321 {offsets = [0, 8], sizes = [16, 8], strides = [1, 1]} : vector<16x32xf32> to vector<16x8xf32>
    %cst_164 = arith.constant dense<0.000000e+00> : vector<16x16xf32>
    %348 = tpu.matmul %346, %347, %cst_164 {dimension_numbers = #tpu.dot_dimension_numbers<[1], [1], [0], [0], [0, 0, 1, 0], [], []>} : vector<16x8xf32>, vector<16x8xf32>, vector<16x16xf32> -> vector<16x16xf32>
    %cst_165 = arith.constant dense<0xFF800000> : vector<16xf32>
    %349 = vector.multi_reduction <maximumf>, %348, %cst_165 [1] : vector<16x16xf32> to vector<16xf32>
    %350 = vector.shape_cast %349 : vector<16xf32> to vector<16x1xf32>
    %351 = vector.broadcast %350 : vector<16x1xf32> to vector<16x16xf32>
    %352 = arith.subf %348, %351 : vector<16x16xf32>
    %353 = math.exp %352 : vector<16x16xf32>
    %cst_166 = arith.constant dense<0.000000e+00> : vector<16xf32>
    %354 = vector.multi_reduction <add>, %353, %cst_166 [1] : vector<16x16xf32> to vector<16xf32>
    %355 = vector.shape_cast %354 : vector<16xf32> to vector<16x1xf32>
    %356 = tpu.reciprocal %355 : vector<16x1xf32> -> vector<16x1xf32>
    %357 = vector.extract_strided_slice %329 {offsets = [0, 8], sizes = [16, 8], strides = [1, 1]} : vector<16x32xf32> to vector<16x8xf32>
    %cst_167 = arith.constant dense<0.000000e+00> : vector<16x8xf32>
    %358 = tpu.matmul %353, %357, %cst_167 {dimension_numbers = #tpu.dot_dimension_numbers<[1], [0], [0], [1], [0, 0, 1, 1], [], []>} : vector<16x16xf32>, vector<16x8xf32>, vector<16x8xf32> -> vector<16x8xf32>
    %359 = vector.broadcast %356 : vector<16x1xf32> to vector<16x8xf32>
    %360 = arith.mulf %358, %359 : vector<16x8xf32>
    %c0_168 = arith.constant 0 : index
    %c8_169 = arith.constant 8 : index
    %361 = vector.load %arg9[%c0_168, %c8_169] : memref<16x32xf32, #tpu.memory_space<vmem>>, vector<16x8xf32>
    tpu.vector_store %arg9[%c0_168, %c8_169], %360 {strides = array<i32>} : memref<16x32xf32, #tpu.memory_space<vmem>>, vector<16x8xf32>,
    %362 = vector.extract_strided_slice %316 {offsets = [0, 16], sizes = [16, 8], strides = [1, 1]} : vector<16x32xf32> to vector<16x8xf32>
    %363 = vector.extract_strided_slice %321 {offsets = [0, 16], sizes = [16, 8], strides = [1, 1]} : vector<16x32xf32> to vector<16x8xf32>
    %cst_170 = arith.constant dense<0.000000e+00> : vector<16x16xf32>
    %364 = tpu.matmul %362, %363, %cst_170 {dimension_numbers = #tpu.dot_dimension_numbers<[1], [1], [0], [0], [0, 0, 1, 0], [], []>} : vector<16x8xf32>, vector<16x8xf32>, vector<16x16xf32> -> vector<16x16xf32>
    %cst_171 = arith.constant dense<0xFF800000> : vector<16xf32>
    %365 = vector.multi_reduction <maximumf>, %364, %cst_171 [1] : vector<16x16xf32> to vector<16xf32>
    %366 = vector.shape_cast %365 : vector<16xf32> to vector<16x1xf32>
    %367 = vector.broadcast %366 : vector<16x1xf32> to vector<16x16xf32>
    %368 = arith.subf %364, %367 : vector<16x16xf32>
    %369 = math.exp %368 : vector<16x16xf32>
    %cst_172 = arith.constant dense<0.000000e+00> : vector<16xf32>
    %370 = vector.multi_reduction <add>, %369, %cst_172 [1] : vector<16x16xf32> to vector<16xf32>
    %371 = vector.shape_cast %370 : vector<16xf32> to vector<16x1xf32>
    %372 = tpu.reciprocal %371 : vector<16x1xf32> -> vector<16x1xf32>
    %373 = vector.extract_strided_slice %329 {offsets = [0, 16], sizes = [16, 8], strides = [1, 1]} : vector<16x32xf32> to vector<16x8xf32>
    %cst_173 = arith.constant dense<0.000000e+00> : vector<16x8xf32>
    %374 = tpu.matmul %369, %373, %cst_173 {dimension_numbers = #tpu.dot_dimension_numbers<[1], [0], [0], [1], [0, 0, 1, 1], [], []>} : vector<16x16xf32>, vector<16x8xf32>, vector<16x8xf32> -> vector<16x8xf32>
    %375 = vector.broadcast %372 : vector<16x1xf32> to vector<16x8xf32>
    %376 = arith.mulf %374, %375 : vector<16x8xf32>
    %c0_174 = arith.constant 0 : index
    %c16_175 = arith.constant 16 : index
    %377 = vector.load %arg9[%c0_174, %c16_175] : memref<16x32xf32, #tpu.memory_space<vmem>>, vector<16x8xf32>
    tpu.vector_store %arg9[%c0_174, %c16_175], %376 {strides = array<i32>} : memref<16x32xf32, #tpu.memory_space<vmem>>, vector<16x8xf32>,
    %378 = vector.extract_strided_slice %316 {offsets = [0, 24], sizes = [16, 8], strides = [1, 1]} : vector<16x32xf32> to vector<16x8xf32>
    %379 = vector.extract_strided_slice %321 {offsets = [0, 24], sizes = [16, 8], strides = [1, 1]} : vector<16x32xf32> to vector<16x8xf32>
    %cst_176 = arith.constant dense<0.000000e+00> : vector<16x16xf32>
    %380 = tpu.matmul %378, %379, %cst_176 {dimension_numbers = #tpu.dot_dimension_numbers<[1], [1], [0], [0], [0, 0, 1, 0], [], []>} : vector<16x8xf32>, vector<16x8xf32>, vector<16x16xf32> -> vector<16x16xf32>
    %cst_177 = arith.constant dense<0xFF800000> : vector<16xf32>
    %381 = vector.multi_reduction <maximumf>, %380, %cst_177 [1] : vector<16x16xf32> to vector<16xf32>
    %382 = vector.shape_cast %381 : vector<16xf32> to vector<16x1xf32>
    %383 = vector.broadcast %382 : vector<16x1xf32> to vector<16x16xf32>
    %384 = arith.subf %380, %383 : vector<16x16xf32>
    %385 = math.exp %384 : vector<16x16xf32>
    %cst_178 = arith.constant dense<0.000000e+00> : vector<16xf32>
    %386 = vector.multi_reduction <add>, %385, %cst_178 [1] : vector<16x16xf32> to vector<16xf32>
    %387 = vector.shape_cast %386 : vector<16xf32> to vector<16x1xf32>
    %388 = tpu.reciprocal %387 : vector<16x1xf32> -> vector<16x1xf32>
    %389 = vector.extract_strided_slice %329 {offsets = [0, 24], sizes = [16, 8], strides = [1, 1]} : vector<16x32xf32> to vector<16x8xf32>
    %cst_179 = arith.constant dense<0.000000e+00> : vector<16x8xf32>
    %390 = tpu.matmul %385, %389, %cst_179 {dimension_numbers = #tpu.dot_dimension_numbers<[1], [0], [0], [1], [0, 0, 1, 1], [], []>} : vector<16x16xf32>, vector<16x8xf32>, vector<16x8xf32> -> vector<16x8xf32>
    %391 = vector.broadcast %388 : vector<16x1xf32> to vector<16x8xf32>
    %392 = arith.mulf %390, %391 : vector<16x8xf32>
    %c0_180 = arith.constant 0 : index
    %c24_181 = arith.constant 24 : index
    %393 = vector.load %arg9[%c0_180, %c24_181] : memref<16x32xf32, #tpu.memory_space<vmem>>, vector<16x8xf32>
    tpu.vector_store %arg9[%c0_180, %c24_181], %392 {strides = array<i32>} : memref<16x32xf32, #tpu.memory_space<vmem>>, vector<16x8xf32>,
    %c0_182 = arith.constant 0 : index
    %c0_183 = arith.constant 0 : index
    %394 = vector.load %arg9[%c0_182, %c0_183] : memref<16x32xf32, #tpu.memory_space<vmem>>, vector<16x32xf32>
    %c1_184 = arith.constant 1 : index
    %c0_185 = arith.constant 0 : index
    %c96_186 = arith.constant 96 : index
    %395 = vector.load %arg5[%c1_184, %c0_185, %c96_186] : memref<2x32x320xbf16, #tpu.memory_space<vmem>>, vector<1x32x32xbf16>
    %396 = vector.shape_cast %395 : vector<1x32x32xbf16> to vector<32x32xbf16>
    %397 = arith.truncf %394 : vector<16x32xf32> to vector<16x32xbf16>
    %cst_187 = arith.constant dense<0.000000e+00> : vector<16x32xf32>
    %398 = tpu.matmul %397, %396, %cst_187 {dimension_numbers = #tpu.dot_dimension_numbers<[1], [0], [0], [1], [0, 0, 1, 1], [], []>} : vector<16x32xbf16>, vector<32x32xbf16>, vector<16x32xf32> -> vector<16x32xf32>
    %c1_188 = arith.constant 1 : index
    %c3_189 = arith.constant 3 : index
    %c0_190 = arith.constant 0 : index
    %399 = vector.load %arg7[%c1_188, %c3_189, %c0_190] : memref<2x16x64xf32, #tpu.memory_space<vmem>>, vector<1x1x32xf32>
    %400 = vector.shape_cast %399 : vector<1x1x32xf32> to vector<1x32xf32>
    %401 = vector.broadcast %400 : vector<1x32xf32> to vector<16x32xf32>
    %402 = arith.addf %398, %401 : vector<16x32xf32>
    %c1_191 = arith.constant 1 : index
    %c10_192 = arith.constant 10 : index
    %c0_193 = arith.constant 0 : index
    %403 = vector.load %arg7[%c1_191, %c10_192, %c0_193] : memref<2x16x64xf32, #tpu.memory_space<vmem>>, vector<1x1x32xf32>
    %404 = vector.shape_cast %403 : vector<1x1x32xf32> to vector<1x32xf32>
    %c1_194 = arith.constant 1 : index
    %c13_195 = arith.constant 13 : index
    %c0_196 = arith.constant 0 : index
    %405 = vector.load %arg7[%c1_194, %c13_195, %c0_196] : memref<2x16x64xf32, #tpu.memory_space<vmem>>, vector<1x1x32xf32>
    %406 = vector.shape_cast %405 : vector<1x1x32xf32> to vector<1x32xf32>
    %407 = arith.addf %304, %402 : vector<16x32xf32>
    %cst_197 = arith.constant dense<0.000000e+00> : vector<16xf32>
    %408 = vector.multi_reduction <add>, %407, %cst_197 [1] : vector<16x32xf32> to vector<16xf32>
    %409 = vector.shape_cast %408 : vector<16xf32> to vector<16x1xf32>
    %cst_198 = arith.constant 3.200000e+01 : f32
    %410 = vector.broadcast %cst_198 : f32 to vector<16x1xf32>
    %411 = arith.divf %409, %410 : vector<16x1xf32>
    %412 = vector.broadcast %411 : vector<16x1xf32> to vector<16x32xf32>
    %413 = arith.subf %407, %412 : vector<16x32xf32>
    %414 = arith.mulf %413, %413 : vector<16x32xf32>
    %cst_199 = arith.constant dense<0.000000e+00> : vector<16xf32>
    %415 = vector.multi_reduction <add>, %414, %cst_199 [1] : vector<16x32xf32> to vector<16xf32>
    %416 = vector.shape_cast %415 : vector<16xf32> to vector<16x1xf32>
    %cst_200 = arith.constant 3.200000e+01 : f32
    %417 = vector.broadcast %cst_200 : f32 to vector<16x1xf32>
    %418 = arith.divf %416, %417 : vector<16x1xf32>
    %419 = vector.broadcast %411 : vector<16x1xf32> to vector<16x32xf32>
    %420 = arith.subf %407, %419 : vector<16x32xf32>
    %cst_201 = arith.constant 9.99999974E-6 : f32
    %421 = vector.broadcast %cst_201 : f32 to vector<16x1xf32>
    %422 = arith.addf %418, %421 : vector<16x1xf32>
    %423 = math.rsqrt %422 : vector<16x1xf32>
    %424 = vector.broadcast %423 : vector<16x1xf32> to vector<16x32xf32>
    %425 = arith.mulf %420, %424 : vector<16x32xf32>
    %426 = vector.broadcast %404 : vector<1x32xf32> to vector<16x32xf32>
    %427 = arith.mulf %425, %426 : vector<16x32xf32>
    %428 = vector.broadcast %406 : vector<1x32xf32> to vector<16x32xf32>
    %429 = arith.addf %427, %428 : vector<16x32xf32>
    %430 = arith.addf %429, %3 : vector<16x32xf32>
    %c1_202 = arith.constant 1 : index
    %c0_203 = arith.constant 0 : index
    %c128_204 = arith.constant 128 : index
    %431 = vector.load %arg5[%c1_202, %c0_203, %c128_204] : memref<2x32x320xbf16, #tpu.memory_space<vmem>>, vector<1x32x32xbf16>
    %432 = vector.shape_cast %431 : vector<1x32x32xbf16> to vector<32x32xbf16>
    %433 = arith.truncf %430 : vector<16x32xf32> to vector<16x32xbf16>
    %cst_205 = arith.constant dense<0.000000e+00> : vector<16x32xf32>
    %434 = tpu.matmul %433, %432, %cst_205 {dimension_numbers = #tpu.dot_dimension_numbers<[1], [0], [0], [1], [0, 0, 1, 1], [], []>} : vector<16x32xbf16>, vector<32x32xbf16>, vector<16x32xf32> -> vector<16x32xf32>
    %c1_206 = arith.constant 1 : index
    %c4_207 = arith.constant 4 : index
    %c0_208 = arith.constant 0 : index
    %435 = vector.load %arg7[%c1_206, %c4_207, %c0_208] : memref<2x16x64xf32, #tpu.memory_space<vmem>>, vector<1x1x32xf32>
    %436 = vector.shape_cast %435 : vector<1x1x32xf32> to vector<1x32xf32>
    %437 = vector.broadcast %436 : vector<1x32xf32> to vector<16x32xf32>
    %438 = arith.addf %434, %437 : vector<16x32xf32>
    %cst_209 = arith.constant 0.353553385 : f32
    %439 = vector.broadcast %cst_209 : f32 to vector<16x32xf32>
    %440 = arith.mulf %438, %439 : vector<16x32xf32>
    %c1_210 = arith.constant 1 : index
    %c0_211 = arith.constant 0 : index
    %c160_212 = arith.constant 160 : index
    %441 = vector.load %arg5[%c1_210, %c0_211, %c160_212] : memref<2x32x320xbf16, #tpu.memory_space<vmem>>, vector<1x32x32xbf16>
    %442 = vector.shape_cast %441 : vector<1x32x32xbf16> to vector<32x32xbf16>
    %443 = arith.truncf %5 : vector<64x32xf32> to vector<64x32xbf16>
    %cst_213 = arith.constant dense<0.000000e+00> : vector<64x32xf32>
    %444 = tpu.matmul %443, %442, %cst_213 {dimension_numbers = #tpu.dot_dimension_numbers<[1], [0], [0], [1], [0, 0, 1, 1], [], []>} : vector<64x32xbf16>, vector<32x32xbf16>, vector<64x32xf32> -> vector<64x32xf32>
    %c1_214 = arith.constant 1 : index
    %c5_215 = arith.constant 5 : index
    %c0_216 = arith.constant 0 : index
    %445 = vector.load %arg7[%c1_214, %c5_215, %c0_216] : memref<2x16x64xf32, #tpu.memory_space<vmem>>, vector<1x1x32xf32>
    %446 = vector.shape_cast %445 : vector<1x1x32xf32> to vector<1x32xf32>
    %447 = vector.broadcast %446 : vector<1x32xf32> to vector<64x32xf32>
    %448 = arith.addf %444, %447 : vector<64x32xf32>
    %c1_217 = arith.constant 1 : index
    %c0_218 = arith.constant 0 : index
    %c192_219 = arith.constant 192 : index
    %449 = vector.load %arg5[%c1_217, %c0_218, %c192_219] : memref<2x32x320xbf16, #tpu.memory_space<vmem>>, vector<1x32x32xbf16>
    %450 = vector.shape_cast %449 : vector<1x32x32xbf16> to vector<32x32xbf16>
    %451 = arith.truncf %7 : vector<64x32xf32> to vector<64x32xbf16>
    %cst_220 = arith.constant dense<0.000000e+00> : vector<64x32xf32>
    %452 = tpu.matmul %451, %450, %cst_220 {dimension_numbers = #tpu.dot_dimension_numbers<[1], [0], [0], [1], [0, 0, 1, 1], [], []>} : vector<64x32xbf16>, vector<32x32xbf16>, vector<64x32xf32> -> vector<64x32xf32>
    %c1_221 = arith.constant 1 : index
    %c6_222 = arith.constant 6 : index
    %c0_223 = arith.constant 0 : index
    %453 = vector.load %arg7[%c1_221, %c6_222, %c0_223] : memref<2x16x64xf32, #tpu.memory_space<vmem>>, vector<1x1x32xf32>
    %454 = vector.shape_cast %453 : vector<1x1x32xf32> to vector<1x32xf32>
    %455 = vector.broadcast %454 : vector<1x32xf32> to vector<64x32xf32>
    %456 = arith.addf %452, %455 : vector<64x32xf32>
    %457 = vector.extract_strided_slice %440 {offsets = [0, 0], sizes = [16, 8], strides = [1, 1]} : vector<16x32xf32> to vector<16x8xf32>
    %458 = vector.extract_strided_slice %448 {offsets = [0, 0], sizes = [64, 8], strides = [1, 1]} : vector<64x32xf32> to vector<64x8xf32>
    %cst_224 = arith.constant dense<0.000000e+00> : vector<16x64xf32>
    %459 = tpu.matmul %457, %458, %cst_224 {dimension_numbers = #tpu.dot_dimension_numbers<[1], [1], [0], [0], [0, 0, 1, 0], [], []>} : vector<16x8xf32>, vector<64x8xf32>, vector<16x64xf32> -> vector<16x64xf32>
    %cst_225 = arith.constant dense<0xFF800000> : vector<16xf32>
    %460 = vector.multi_reduction <maximumf>, %459, %cst_225 [1] : vector<16x64xf32> to vector<16xf32>
    %461 = vector.shape_cast %460 : vector<16xf32> to vector<16x1xf32>
    %462 = vector.broadcast %461 : vector<16x1xf32> to vector<16x64xf32>
    %463 = arith.subf %459, %462 : vector<16x64xf32>
    %464 = math.exp %463 : vector<16x64xf32>
    %cst_226 = arith.constant dense<0.000000e+00> : vector<16xf32>
    %465 = vector.multi_reduction <add>, %464, %cst_226 [1] : vector<16x64xf32> to vector<16xf32>
    %466 = vector.shape_cast %465 : vector<16xf32> to vector<16x1xf32>
    %467 = tpu.reciprocal %466 : vector<16x1xf32> -> vector<16x1xf32>
    %468 = vector.extract_strided_slice %456 {offsets = [0, 0], sizes = [64, 8], strides = [1, 1]} : vector<64x32xf32> to vector<64x8xf32>
    %cst_227 = arith.constant dense<0.000000e+00> : vector<16x8xf32>
    %469 = tpu.matmul %464, %468, %cst_227 {dimension_numbers = #tpu.dot_dimension_numbers<[1], [0], [0], [1], [0, 0, 1, 1], [], []>} : vector<16x64xf32>, vector<64x8xf32>, vector<16x8xf32> -> vector<16x8xf32>
    %470 = vector.broadcast %467 : vector<16x1xf32> to vector<16x8xf32>
    %471 = arith.mulf %469, %470 : vector<16x8xf32>
    %c0_228 = arith.constant 0 : index
    %c0_229 = arith.constant 0 : index
    %472 = vector.load %arg9[%c0_228, %c0_229] : memref<16x32xf32, #tpu.memory_space<vmem>>, vector<16x8xf32>
    tpu.vector_store %arg9[%c0_228, %c0_229], %471 {strides = array<i32>} : memref<16x32xf32, #tpu.memory_space<vmem>>, vector<16x8xf32>,
    %473 = vector.extract_strided_slice %440 {offsets = [0, 8], sizes = [16, 8], strides = [1, 1]} : vector<16x32xf32> to vector<16x8xf32>
    %474 = vector.extract_strided_slice %448 {offsets = [0, 8], sizes = [64, 8], strides = [1, 1]} : vector<64x32xf32> to vector<64x8xf32>
    %cst_230 = arith.constant dense<0.000000e+00> : vector<16x64xf32>
    %475 = tpu.matmul %473, %474, %cst_230 {dimension_numbers = #tpu.dot_dimension_numbers<[1], [1], [0], [0], [0, 0, 1, 0], [], []>} : vector<16x8xf32>, vector<64x8xf32>, vector<16x64xf32> -> vector<16x64xf32>
    %cst_231 = arith.constant dense<0xFF800000> : vector<16xf32>
    %476 = vector.multi_reduction <maximumf>, %475, %cst_231 [1] : vector<16x64xf32> to vector<16xf32>
    %477 = vector.shape_cast %476 : vector<16xf32> to vector<16x1xf32>
    %478 = vector.broadcast %477 : vector<16x1xf32> to vector<16x64xf32>
    %479 = arith.subf %475, %478 : vector<16x64xf32>
    %480 = math.exp %479 : vector<16x64xf32>
    %cst_232 = arith.constant dense<0.000000e+00> : vector<16xf32>
    %481 = vector.multi_reduction <add>, %480, %cst_232 [1] : vector<16x64xf32> to vector<16xf32>
    %482 = vector.shape_cast %481 : vector<16xf32> to vector<16x1xf32>
    %483 = tpu.reciprocal %482 : vector<16x1xf32> -> vector<16x1xf32>
    %484 = vector.extract_strided_slice %456 {offsets = [0, 8], sizes = [64, 8], strides = [1, 1]} : vector<64x32xf32> to vector<64x8xf32>
    %cst_233 = arith.constant dense<0.000000e+00> : vector<16x8xf32>
    %485 = tpu.matmul %480, %484, %cst_233 {dimension_numbers = #tpu.dot_dimension_numbers<[1], [0], [0], [1], [0, 0, 1, 1], [], []>} : vector<16x64xf32>, vector<64x8xf32>, vector<16x8xf32> -> vector<16x8xf32>
    %486 = vector.broadcast %483 : vector<16x1xf32> to vector<16x8xf32>
    %487 = arith.mulf %485, %486 : vector<16x8xf32>
    %c0_234 = arith.constant 0 : index
    %c8_235 = arith.constant 8 : index
    %488 = vector.load %arg9[%c0_234, %c8_235] : memref<16x32xf32, #tpu.memory_space<vmem>>, vector<16x8xf32>
    tpu.vector_store %arg9[%c0_234, %c8_235], %487 {strides = array<i32>} : memref<16x32xf32, #tpu.memory_space<vmem>>, vector<16x8xf32>,
    %489 = vector.extract_strided_slice %440 {offsets = [0, 16], sizes = [16, 8], strides = [1, 1]} : vector<16x32xf32> to vector<16x8xf32>
    %490 = vector.extract_strided_slice %448 {offsets = [0, 16], sizes = [64, 8], strides = [1, 1]} : vector<64x32xf32> to vector<64x8xf32>
    %cst_236 = arith.constant dense<0.000000e+00> : vector<16x64xf32>
    %491 = tpu.matmul %489, %490, %cst_236 {dimension_numbers = #tpu.dot_dimension_numbers<[1], [1], [0], [0], [0, 0, 1, 0], [], []>} : vector<16x8xf32>, vector<64x8xf32>, vector<16x64xf32> -> vector<16x64xf32>
    %cst_237 = arith.constant dense<0xFF800000> : vector<16xf32>
    %492 = vector.multi_reduction <maximumf>, %491, %cst_237 [1] : vector<16x64xf32> to vector<16xf32>
    %493 = vector.shape_cast %492 : vector<16xf32> to vector<16x1xf32>
    %494 = vector.broadcast %493 : vector<16x1xf32> to vector<16x64xf32>
    %495 = arith.subf %491, %494 : vector<16x64xf32>
    %496 = math.exp %495 : vector<16x64xf32>
    %cst_238 = arith.constant dense<0.000000e+00> : vector<16xf32>
    %497 = vector.multi_reduction <add>, %496, %cst_238 [1] : vector<16x64xf32> to vector<16xf32>
    %498 = vector.shape_cast %497 : vector<16xf32> to vector<16x1xf32>
    %499 = tpu.reciprocal %498 : vector<16x1xf32> -> vector<16x1xf32>
    %500 = vector.extract_strided_slice %456 {offsets = [0, 16], sizes = [64, 8], strides = [1, 1]} : vector<64x32xf32> to vector<64x8xf32>
    %cst_239 = arith.constant dense<0.000000e+00> : vector<16x8xf32>
    %501 = tpu.matmul %496, %500, %cst_239 {dimension_numbers = #tpu.dot_dimension_numbers<[1], [0], [0], [1], [0, 0, 1, 1], [], []>} : vector<16x64xf32>, vector<64x8xf32>, vector<16x8xf32> -> vector<16x8xf32>
    %502 = vector.broadcast %499 : vector<16x1xf32> to vector<16x8xf32>
    %503 = arith.mulf %501, %502 : vector<16x8xf32>
    %c0_240 = arith.constant 0 : index
    %c16_241 = arith.constant 16 : index
    %504 = vector.load %arg9[%c0_240, %c16_241] : memref<16x32xf32, #tpu.memory_space<vmem>>, vector<16x8xf32>
    tpu.vector_store %arg9[%c0_240, %c16_241], %503 {strides = array<i32>} : memref<16x32xf32, #tpu.memory_space<vmem>>, vector<16x8xf32>,
    %505 = vector.extract_strided_slice %440 {offsets = [0, 24], sizes = [16, 8], strides = [1, 1]} : vector<16x32xf32> to vector<16x8xf32>
    %506 = vector.extract_strided_slice %448 {offsets = [0, 24], sizes = [64, 8], strides = [1, 1]} : vector<64x32xf32> to vector<64x8xf32>
    %cst_242 = arith.constant dense<0.000000e+00> : vector<16x64xf32>
    %507 = tpu.matmul %505, %506, %cst_242 {dimension_numbers = #tpu.dot_dimension_numbers<[1], [1], [0], [0], [0, 0, 1, 0], [], []>} : vector<16x8xf32>, vector<64x8xf32>, vector<16x64xf32> -> vector<16x64xf32>
    %cst_243 = arith.constant dense<0xFF800000> : vector<16xf32>
    %508 = vector.multi_reduction <maximumf>, %507, %cst_243 [1] : vector<16x64xf32> to vector<16xf32>
    %509 = vector.shape_cast %508 : vector<16xf32> to vector<16x1xf32>
    %510 = vector.broadcast %509 : vector<16x1xf32> to vector<16x64xf32>
    %511 = arith.subf %507, %510 : vector<16x64xf32>
    %512 = math.exp %511 : vector<16x64xf32>
    %cst_244 = arith.constant dense<0.000000e+00> : vector<16xf32>
    %513 = vector.multi_reduction <add>, %512, %cst_244 [1] : vector<16x64xf32> to vector<16xf32>
    %514 = vector.shape_cast %513 : vector<16xf32> to vector<16x1xf32>
    %515 = tpu.reciprocal %514 : vector<16x1xf32> -> vector<16x1xf32>
    %516 = vector.extract_strided_slice %456 {offsets = [0, 24], sizes = [64, 8], strides = [1, 1]} : vector<64x32xf32> to vector<64x8xf32>
    %cst_245 = arith.constant dense<0.000000e+00> : vector<16x8xf32>
    %517 = tpu.matmul %512, %516, %cst_245 {dimension_numbers = #tpu.dot_dimension_numbers<[1], [0], [0], [1], [0, 0, 1, 1], [], []>} : vector<16x64xf32>, vector<64x8xf32>, vector<16x8xf32> -> vector<16x8xf32>
    %518 = vector.broadcast %515 : vector<16x1xf32> to vector<16x8xf32>
    %519 = arith.mulf %517, %518 : vector<16x8xf32>
    %c0_246 = arith.constant 0 : index
    %c24_247 = arith.constant 24 : index
    %520 = vector.load %arg9[%c0_246, %c24_247] : memref<16x32xf32, #tpu.memory_space<vmem>>, vector<16x8xf32>
    tpu.vector_store %arg9[%c0_246, %c24_247], %519 {strides = array<i32>} : memref<16x32xf32, #tpu.memory_space<vmem>>, vector<16x8xf32>,
    %c0_248 = arith.constant 0 : index
    %c0_249 = arith.constant 0 : index
    %521 = vector.load %arg9[%c0_248, %c0_249] : memref<16x32xf32, #tpu.memory_space<vmem>>, vector<16x32xf32>
    %c1_250 = arith.constant 1 : index
    %c0_251 = arith.constant 0 : index
    %c224_252 = arith.constant 224 : index
    %522 = vector.load %arg5[%c1_250, %c0_251, %c224_252] : memref<2x32x320xbf16, #tpu.memory_space<vmem>>, vector<1x32x32xbf16>
    %523 = vector.shape_cast %522 : vector<1x32x32xbf16> to vector<32x32xbf16>
    %524 = arith.truncf %521 : vector<16x32xf32> to vector<16x32xbf16>
    %cst_253 = arith.constant dense<0.000000e+00> : vector<16x32xf32>
    %525 = tpu.matmul %524, %523, %cst_253 {dimension_numbers = #tpu.dot_dimension_numbers<[1], [0], [0], [1], [0, 0, 1, 1], [], []>} : vector<16x32xbf16>, vector<32x32xbf16>, vector<16x32xf32> -> vector<16x32xf32>
    %c1_254 = arith.constant 1 : index
    %c7_255 = arith.constant 7 : index
    %c0_256 = arith.constant 0 : index
    %526 = vector.load %arg7[%c1_254, %c7_255, %c0_256] : memref<2x16x64xf32, #tpu.memory_space<vmem>>, vector<1x1x32xf32>
    %527 = vector.shape_cast %526 : vector<1x1x32xf32> to vector<1x32xf32>
    %528 = vector.broadcast %527 : vector<1x32xf32> to vector<16x32xf32>
    %529 = arith.addf %525, %528 : vector<16x32xf32>
    %c1_257 = arith.constant 1 : index
    %c11_258 = arith.constant 11 : index
    %c0_259 = arith.constant 0 : index
    %530 = vector.load %arg7[%c1_257, %c11_258, %c0_259] : memref<2x16x64xf32, #tpu.memory_space<vmem>>, vector<1x1x32xf32>
    %531 = vector.shape_cast %530 : vector<1x1x32xf32> to vector<1x32xf32>
    %c1_260 = arith.constant 1 : index
    %c14_261 = arith.constant 14 : index
    %c0_262 = arith.constant 0 : index
    %532 = vector.load %arg7[%c1_260, %c14_261, %c0_262] : memref<2x16x64xf32, #tpu.memory_space<vmem>>, vector<1x1x32xf32>
    %533 = vector.shape_cast %532 : vector<1x1x32xf32> to vector<1x32xf32>
    %534 = arith.addf %429, %529 : vector<16x32xf32>
    %cst_263 = arith.constant dense<0.000000e+00> : vector<16xf32>
    %535 = vector.multi_reduction <add>, %534, %cst_263 [1] : vector<16x32xf32> to vector<16xf32>
    %536 = vector.shape_cast %535 : vector<16xf32> to vector<16x1xf32>
    %cst_264 = arith.constant 3.200000e+01 : f32
    %537 = vector.broadcast %cst_264 : f32 to vector<16x1xf32>
    %538 = arith.divf %536, %537 : vector<16x1xf32>
    %539 = vector.broadcast %538 : vector<16x1xf32> to vector<16x32xf32>
    %540 = arith.subf %534, %539 : vector<16x32xf32>
    %541 = arith.mulf %540, %540 : vector<16x32xf32>
    %cst_265 = arith.constant dense<0.000000e+00> : vector<16xf32>
    %542 = vector.multi_reduction <add>, %541, %cst_265 [1] : vector<16x32xf32> to vector<16xf32>
    %543 = vector.shape_cast %542 : vector<16xf32> to vector<16x1xf32>
    %cst_266 = arith.constant 3.200000e+01 : f32
    %544 = vector.broadcast %cst_266 : f32 to vector<16x1xf32>
    %545 = arith.divf %543, %544 : vector<16x1xf32>
    %546 = vector.broadcast %538 : vector<16x1xf32> to vector<16x32xf32>
    %547 = arith.subf %534, %546 : vector<16x32xf32>
    %cst_267 = arith.constant 9.99999974E-6 : f32
    %548 = vector.broadcast %cst_267 : f32 to vector<16x1xf32>
    %549 = arith.addf %545, %548 : vector<16x1xf32>
    %550 = math.rsqrt %549 : vector<16x1xf32>
    %551 = vector.broadcast %550 : vector<16x1xf32> to vector<16x32xf32>
    %552 = arith.mulf %547, %551 : vector<16x32xf32>
    %553 = vector.broadcast %531 : vector<1x32xf32> to vector<16x32xf32>
    %554 = arith.mulf %552, %553 : vector<16x32xf32>
    %555 = vector.broadcast %533 : vector<1x32xf32> to vector<16x32xf32>
    %556 = arith.addf %554, %555 : vector<16x32xf32>
    %c1_268 = arith.constant 1 : index
    %c0_269 = arith.constant 0 : index
    %c256_270 = arith.constant 256 : index
    %557 = vector.load %arg5[%c1_268, %c0_269, %c256_270] : memref<2x32x320xbf16, #tpu.memory_space<vmem>>, vector<1x32x64xbf16>
    %558 = vector.shape_cast %557 : vector<1x32x64xbf16> to vector<32x64xbf16>
    %559 = arith.truncf %556 : vector<16x32xf32> to vector<16x32xbf16>
    %cst_271 = arith.constant dense<0.000000e+00> : vector<16x64xf32>
    %560 = tpu.matmul %559, %558, %cst_271 {dimension_numbers = #tpu.dot_dimension_numbers<[1], [0], [0], [1], [0, 0, 1, 1], [], []>} : vector<16x32xbf16>, vector<32x64xbf16>, vector<16x64xf32> -> vector<16x64xf32>
    %c1_272 = arith.constant 1 : index
    %c8_273 = arith.constant 8 : index
    %c0_274 = arith.constant 0 : index
    %561 = vector.load %arg7[%c1_272, %c8_273, %c0_274] : memref<2x16x64xf32, #tpu.memory_space<vmem>>, vector<1x1x64xf32>
    %562 = vector.shape_cast %561 : vector<1x1x64xf32> to vector<1x64xf32>
    %563 = vector.broadcast %562 : vector<1x64xf32> to vector<16x64xf32>
    %564 = arith.addf %560, %563 : vector<16x64xf32>
    %cst_275 = arith.constant 0.000000e+00 : f32
    %565 = vector.broadcast %cst_275 : f32 to vector<16x64xf32>
    %566 = arith.maximumf %564, %565 : vector<16x64xf32>
    %c1_276 = arith.constant 1 : index
    %c0_277 = arith.constant 0 : index
    %c0_278 = arith.constant 0 : index
    %567 = vector.load %arg6[%c1_276, %c0_277, %c0_278] : memref<2x64x32xbf16, #tpu.memory_space<vmem>>, vector<1x64x32xbf16>
    %568 = vector.shape_cast %567 : vector<1x64x32xbf16> to vector<64x32xbf16>
    %569 = arith.truncf %566 : vector<16x64xf32> to vector<16x64xbf16>
    %cst_279 = arith.constant dense<0.000000e+00> : vector<16x32xf32>
    %570 = tpu.matmul %569, %568, %cst_279 {dimension_numbers = #tpu.dot_dimension_numbers<[1], [0], [0], [1], [0, 0, 1, 1], [], []>} : vector<16x64xbf16>, vector<64x32xbf16>, vector<16x32xf32> -> vector<16x32xf32>
    %c1_280 = arith.constant 1 : index
    %c9_281 = arith.constant 9 : index
    %c0_282 = arith.constant 0 : index
    %571 = vector.load %arg7[%c1_280, %c9_281, %c0_282] : memref<2x16x64xf32, #tpu.memory_space<vmem>>, vector<1x1x32xf32>
    %572 = vector.shape_cast %571 : vector<1x1x32xf32> to vector<1x32xf32>
    %573 = vector.broadcast %572 : vector<1x32xf32> to vector<16x32xf32>
    %574 = arith.addf %570, %573 : vector<16x32xf32>
    %c1_283 = arith.constant 1 : index
    %c12_284 = arith.constant 12 : index
    %c0_285 = arith.constant 0 : index
    %575 = vector.load %arg7[%c1_283, %c12_284, %c0_285] : memref<2x16x64xf32, #tpu.memory_space<vmem>>, vector<1x1x32xf32>
    %576 = vector.shape_cast %575 : vector<1x1x32xf32> to vector<1x32xf32>
    %c1_286 = arith.constant 1 : index
    %c15_287 = arith.constant 15 : index
    %c0_288 = arith.constant 0 : index
    %577 = vector.load %arg7[%c1_286, %c15_287, %c0_288] : memref<2x16x64xf32, #tpu.memory_space<vmem>>, vector<1x1x32xf32>
    %578 = vector.shape_cast %577 : vector<1x1x32xf32> to vector<1x32xf32>
    %579 = arith.addf %556, %574 : vector<16x32xf32>
    %cst_289 = arith.constant dense<0.000000e+00> : vector<16xf32>
    %580 = vector.multi_reduction <add>, %579, %cst_289 [1] : vector<16x32xf32> to vector<16xf32>
    %581 = vector.shape_cast %580 : vector<16xf32> to vector<16x1xf32>
    %cst_290 = arith.constant 3.200000e+01 : f32
    %582 = vector.broadcast %cst_290 : f32 to vector<16x1xf32>
    %583 = arith.divf %581, %582 : vector<16x1xf32>
    %584 = vector.broadcast %583 : vector<16x1xf32> to vector<16x32xf32>
    %585 = arith.subf %579, %584 : vector<16x32xf32>
    %586 = arith.mulf %585, %585 : vector<16x32xf32>
    %cst_291 = arith.constant dense<0.000000e+00> : vector<16xf32>
    %587 = vector.multi_reduction <add>, %586, %cst_291 [1] : vector<16x32xf32> to vector<16xf32>
    %588 = vector.shape_cast %587 : vector<16xf32> to vector<16x1xf32>
    %cst_292 = arith.constant 3.200000e+01 : f32
    %589 = vector.broadcast %cst_292 : f32 to vector<16x1xf32>
    %590 = arith.divf %588, %589 : vector<16x1xf32>
    %591 = vector.broadcast %583 : vector<16x1xf32> to vector<16x32xf32>
    %592 = arith.subf %579, %591 : vector<16x32xf32>
    %cst_293 = arith.constant 9.99999974E-6 : f32
    %593 = vector.broadcast %cst_293 : f32 to vector<16x1xf32>
    %594 = arith.addf %590, %593 : vector<16x1xf32>
    %595 = math.rsqrt %594 : vector<16x1xf32>
    %596 = vector.broadcast %595 : vector<16x1xf32> to vector<16x32xf32>
    %597 = arith.mulf %592, %596 : vector<16x32xf32>
    %598 = vector.broadcast %576 : vector<1x32xf32> to vector<16x32xf32>
    %599 = arith.mulf %597, %598 : vector<16x32xf32>
    %600 = vector.broadcast %578 : vector<1x32xf32> to vector<16x32xf32>
    %601 = arith.addf %599, %600 : vector<16x32xf32>
    %c0_294 = arith.constant 0 : index
    %c0_295 = arith.constant 0 : index
    %c0_296 = arith.constant 0 : index
    %602 = vector.load %arg8[%c0_294, %c0_295, %c0_296] : memref<1x16x32xf32, #tpu.memory_space<vmem>>, vector<1x16x32xf32>
    %603 = vector.shape_cast %602 : vector<1x16x32xf32> to vector<16x32xf32>
    %604 = vector.shape_cast %601 : vector<16x32xf32> to vector<1x16x32xf32>
    tpu.vector_store %arg8[%c0_294, %c0_295, %c0_296], %604 {strides = array<i32>} : memref<1x16x32xf32, #tpu.memory_space<vmem>>, vector<1x16x32xf32>,
    return
  }
  func.func @transform_0(%arg0: i32) -> (i32, i32, i32) {
    %c0_i32 = arith.constant 0 : i32
    %c0_i32_0 = arith.constant 0 : i32
    %c0_i32_1 = arith.constant 0 : i32
    return %arg0, %c0_i32, %c0_i32_0 : i32, i32, i32
  }
  func.func @transform_1(%arg0: i32) -> (i32, i32, i32) {
    %c0_i32 = arith.constant 0 : i32
    %c0_i32_0 = arith.constant 0 : i32
    %c0_i32_1 = arith.constant 0 : i32
    return %arg0, %c0_i32, %c0_i32_0 : i32, i32, i32
  }
  func.func @transform_2(%arg0: i32) -> (i32, i32, i32) {
    %c0_i32 = arith.constant 0 : i32
    %c0_i32_0 = arith.constant 0 : i32
    %c0_i32_1 = arith.constant 0 : i32
    return %arg0, %c0_i32, %c0_i32_0 : i32, i32, i32
  }
  func.func @transform_3(%arg0: i32) -> (i32, i32, i32) {
    %c0_i32 = arith.constant 0 : i32
    %c0_i32_0 = arith.constant 0 : i32
    %c0_i32_1 = arith.constant 0 : i32
    return %arg0, %c0_i32, %c0_i32_0 : i32, i32, i32
  }
  func.func @transform_4(%arg0: i32) -> (i32, i32, i32) {
    %c0_i32 = arith.constant 0 : i32
    %c0_i32_0 = arith.constant 0 : i32
    %c0_i32_1 = arith.constant 0 : i32
    %c0_i32_2 = arith.constant 0 : i32
    return %c0_i32, %c0_i32_0, %c0_i32_1 : i32, i32, i32
  }
  func.func @transform_5(%arg0: i32) -> (i32, i32, i32) {
    %c0_i32 = arith.constant 0 : i32
    %c0_i32_0 = arith.constant 0 : i32
    %c0_i32_1 = arith.constant 0 : i32
    %c0_i32_2 = arith.constant 0 : i32
    return %c0_i32, %c0_i32_0, %c0_i32_1 : i32, i32, i32
  }
  func.func @transform_6(%arg0: i32) -> (i32, i32, i32) {
    %c0_i32 = arith.constant 0 : i32
    %c0_i32_0 = arith.constant 0 : i32
    %c0_i32_1 = arith.constant 0 : i32
    %c0_i32_2 = arith.constant 0 : i32
    return %c0_i32, %c0_i32_0, %c0_i32_1 : i32, i32, i32
  }
  func.func @transform_7(%arg0: i32) -> (i32, i32, i32) {
    %c0_i32 = arith.constant 0 : i32
    %c0_i32_0 = arith.constant 0 : i32
    %c0_i32_1 = arith.constant 0 : i32
    return %arg0, %c0_i32, %c0_i32_0 : i32, i32, i32
  }
}

</mosaic_0001>

<bundles_post_ra>
// kernel: test_wrapper_forward.1
= control target key start
LH: loop header
LB: loop body
LE: loop exit
PB: predicated region body
PF: predicated region fallthrough
CT: control target
= control target key end

     0   :  { %12 = vsyncpa [#allocation4], 0  ;;  %s8688_s0 = inlined_call_operand.vmem [shape: f32[2,16,32], index: 0, kind: input, shape index: {}]   ;;  %s8689_s1 = inlined_call_operand.vmem [shape: f32[2,16,32], index: 1, kind: input, shape index: {}]   ;;  %s8690_s2 = inlined_call_operand.vmem [shape: f32[2,64,32], index: 2, kind: input, shape index: {}]   ;;  %s8691_s3 = inlined_call_operand.vmem [shape: f32[2,64,32], index: 3, kind: input, shape index: {}]   ;;  %s8692_s4 = inlined_call_operand.vmem [shape: bf16[2,32,320], index: 4, kind: input, shape index: {}]   ;;  %s8693_s5 = inlined_call_operand.vmem [shape: bf16[2,64,32], index: 5, kind: input, shape index: {}]   ;;  %s8694_s6 = inlined_call_operand.vmem [shape: f32[2,16,64], index: 6, kind: input, shape index: {}]   ;;  %s8695_s7 = inlined_call_operand.hbm [shape: f32[2,16,32], index: 7, kind: output, shape index: {}]  }
   0x1   :  { %14 = vsyncpa [#allocation4 + $0x1], 0  ;;  %s7214_s24 = smov 0   ;;  %s7216_s25 = smov 0  }
   0x2   :  { %s7218_s26 = smov 0   ;;  %s7220_s27 = smov 0  }
   0x3 LB: > { %s7235_s28 = sadd.s32 4294967295, %s7156_s27   ;;  %s5681_s29 = sadd.s32 4294967294, %s7156_s27   ;;  %s7156_s27 = sphi %s7220_s27, %s8734_s27   ;;  %s7152_s26 = sphi %s7218_s26, %s8733_s26   ;;  %s7148_s25 = sphi %s7216_s25, %s8732_s25   ;;  %s7144_s24 = sphi %s7214_s24, %s8731_s24  }
   0x4   : > { %s7239_s30 = sadd.s32 1, %s7156_s27   ;;  %s194_s8 = sadd.s32 1, %s7152_s26 }
   0x5   : > { %s191_s9 = ssub.s32 %s7156_s27, %s7239_s30  ;;  %p204_p0 = scmp.ne.s32.totalorder %s7152_s26, %s7148_s25 }
   0x6   : > { %p192_p1 = scmp.eq.s32.totalorder %s191_s9, 0  ;;  %p205_p2 = scmp.eq.s32.totalorder %s7235_s28, 1 }
   0x7   : > { %p210_p3 = scmp.ne.s32.totalorder %s7148_s25, %s7144_s24  ;;  %p211_p4 = scmp.eq.s32.totalorder %s5681_s29, 1 }
   0x8   : > { %s7250_s10 = scalar_select %p192_p1, %s7152_s26, %s194_s8  }
   0x9   : > { %p7252_p5 = por %p205_p2, %p204_p0  ;;  %p7256_p6 = por %p211_p4, %p210_p3 }
   0xa   : > { %p5684_p7 = scmp.ge.s32.totalorder %s7156_s27, 1  ;;  %p270_p8 = scmp.lt.s32.totalorder %s7156_s27, 3 }
   0xc   : > { %p271_p9 = pnand %p5684_p7, %p270_p8 }
   0xd   : > { %p317_p10 = scmp.lt.s32.totalorder (!%p271_p9), %s7235_s28, 1  ;;  %s8704_s20 = smov (!%p271_p9), 32  }
   0xe   : > { %274 = sbr.rel (%p271_p9) target bundleno = 11085 (0x2b4d), region = 48  ;;  %s7161_s16 = smov (!%p271_p9), 96  }
   0xf   : > { %s8700_s17 = smov (!%p271_p9), 88   ;;  %s8716_s18 = smov (!%p271_p9), 120  }
  0x10   : > { %s8712_s8 = smov (!%p271_p9), 112   ;;  %s8696_s9 = smov (!%p271_p9), 72  }
  0x11   : > { %s8710_s14 = smov (!%p271_p9), 104   ;;  %s8708_s15 = smov (!%p271_p9), 8  }
  0x12   : > { %s8702_s22 = smov (!%p271_p9), 16   ;;  %s8706_s23 = smov (!%p271_p9), 24  }
  0x13   : > { %v7158_v0 = vmov 0.0   ;;  %v6914_v1 = vld [vmem:[%s8692_s4 + $0x18] ss:$12 sps:$4 sm:$0xff]   ;;  %vm7159_vm0 = vmmov 0   ;;  %v6915_v2 = vld [vmem:[%s8692_s4] ss:$12 sps:$4 sm:$0xff]  }
  0x14   : > { %6276 = vmatprep.subr.bf16.mxu1 %v7158_v0  ;;  %6280 = vmatprep.mubr.msk.bf16.mxu1 %vm7159_vm0, %v7158_v0  ;;  %v5698_v3 = vld [vmem:[%s8694_s6 + $0x1] ss:$0 sm:$0xff]  ;;  %s7277_s19 = scalar_select %p317_p10, %s7235_s28, 1  ;;  %vm377_vm1 = vcmask 261120   ;;  %v5697_v12 = vld [vmem:[%s8694_s6] ss:$0 sm:$0xff] }
  0x15   : > { %6277 = vmatpush3.bf16.msra.mxu1 %v6914_v1  ;;  %437 = vrot.lane.b32.xlu0 %v5698_v3, %s8704_s20  ;;  %vm504_vm2 = vcmask 64512   ;;  %vm590_vm3 = vcmask 130048   ;;  %v5699_v42 = vld [vmem:[%s8694_s6 + $0x2] ss:$0 sm:$0xff]  ;;  %vm906_vm4 = vcmask 130112   ;;  %vm1117_vm5 = vcmask 195712  }
  0x16   : > { %6278 = vmatprep.subr.bf16.mxu1 %v7158_v0  ;;  %s5977_s21 = sshll.u32 %s7277_s19, 4  ;;  %vm1328_vm6 = vcmask 261312   ;;  %vm1805_vm7 = vcmask 523264  }
  0x17   : > { %s321_s29 = scalar_lea.vmem %s8688_s0, %s5977_s21  ;;  %s7287_s13 = scalar_lea.vmem %s8689_s1, %s5977_s21 }
  0x18   : > { %v7289_v4 = vld [vmem:[%s321_s29] sm:$0xff]  ;;  %v7291_v5 = vld [vmem:[%s321_s29 + $0x8] sm:$0xff]  ;;  %s8714_s21 = smov 64   ;;  %s8698_s29 = smov 80  }
  0x19   : > { %6279 = vmatpush3.bf16.msra.mxu1 %v6915_v2  ;;  %v7294_v6 = vld [vmem:[%s7287_s13] sm:$0xff]  ;;  %v7298_v7 = vld [vmem:[%s7287_s13 + $0x8] sm:$0xff]  ;;  %v442_v31 = vpack.c.bf16 %v7291_v5, %v7289_v4 }
  0x1a   : > { %6284 = vmatprep.subr.bf16.mxu1 %v7158_v0  ;;  %v358_v8 = vadd.f32 %v7294_v6, %v7289_v4  ;;  %v359_v9 = vadd.f32 %v7298_v7, %v7291_v5 }
  0x1c   : > { %v364_v10 = vpack.c.bf16 %v359_v9, %v358_v8 }
  0x1e   : > { %6281 = vmatmul.mubr.msk.bf16.vlgmr.msra.gmra.mxu1 %vm377_vm1, %v364_v10 }
  0x1f   : > { %6288 = vmatprep.mubr.msk.bf16.mxu1 %vm7159_vm0, %v7158_v0 }
  0x87   : > { %v438_v11 = vpop.permute.xlu0 %437 }
  0xde   : > { %v415_v13 = vpop.f32.mrf.mxu1 }
  0xdf   : > { %v427_v14 = vadd.f32 %v5697_v12, %v415_v13  ;;  %v7310_v15 = vadd.f32 %v438_v11, %v415_v13 }
  0xe0   : > { %v6282_v16 = vpop.f32.mrf.mxu1 }
  0xe1   : > { %v7312_v17 = vmul.f32 0.35355338, %v427_v14  ;;  %500 = vrot.lane.b32.xlu1 %v7310_v15, %s7161_s16 }
  0xe2   : > { %v418_v18 = vpop.f32.mrf.mxu1 }
  0xe3   : > { %v7316_v19 = vadd.f32 %v438_v11, %v418_v18  ;;  %6296 = vmatprep.mubr.msk.f32.mxu0 %vm504_vm2, %v7312_v17  ;;  %v428_v21 = vadd.f32 %v5697_v12, %v418_v18 }
  0xe4   : > { %v6283_v20 = vpop.f32.mrf.mxu1 }
  0xe5   : > { %702 = vrot.lane.b32.xlu1 %v7316_v19, %s8700_s17  ;;  %502 = vrot.lane.b32.xlu0 %v7316_v19, %s7161_s16  ;;  %v7328_v22 = vmul.f32 0.35355338, %v428_v21 }
  0xe9   : > { %696 = vrot.lane.b32.xlu1 %v7312_v17, %s8716_s18  ;;  %700 = vrot.lane.b32.xlu0 %v7310_v15, %s8700_s17  ;;  %s5979_s17 = sshll.u32 %s7277_s19, 6  ;;  %s8725_s19 = smov 112  }
  0xed   : > { %698 = vrot.lane.b32.xlu0 %v7328_v22, %s8716_s18  ;;  %450 = vrot.lane.b32.xlu1 %v6914_v1, %s8714_s21 }
  0xf1   : > { %448 = vrot.lane.b32.xlu0 %v6915_v2, %s8714_s21 }
 0x153   : > { %v501_v23 = vpop.permute.xlu1 %500 }
 0x157   : > { %v703_v24 = vpop.permute.xlu1 %702  ;;  %v503_v25 = vpop.permute.xlu0 %502 }
 0x158   : > { %6292 = vmatprep.subr.msk.mxu0 %vm504_vm2, %v503_v25 }
 0x159   : > { %6293 = vmatpush3.xpose.msk.msra.mxu0 %vm504_vm2, %v503_v25 }
 0x15a   : > { %6294 = vmatprep.subr.msk.mxu0 %vm504_vm2, %v501_v23 }
 0x15b   : > { %v697_v26 = vpop.permute.xlu1 %696  ;;  %v701_v27 = vpop.permute.xlu0 %700 }
 0x15d   : > { %6295 = vmatpush3.xpose.msk.msra.mxu0 %vm504_vm2, %v501_v23 }
 0x15e   : > { %6306 = vmatprep.subr.msk.mxu0 %vm504_vm2, %v703_v24 }
 0x15f   : > { %v699_v28 = vpop.permute.xlu0 %698  ;;  %v451_v29 = vpop.permute.xlu1 %450 }
 0x160   : > { %6297 = vmatmul.mubr.msk.f32.vlgmr.msra.gmra.mxu0 %vm504_vm2, %v7328_v22  ;;  %6285 = vmatpush3.bf16.msra.mxu1 %v451_v29 }
 0x161   : > { %6307 = vmatpush3.xpose.msk.msra.mxu0 %vm504_vm2, %v703_v24  ;;  %6310 = vmatprep.mubr.msk.f32.mxu0 %vm504_vm2, %v697_v26 }
 0x162   : > { %6308 = vmatprep.subr.msk.mxu0 %vm504_vm2, %v701_v27  ;;  %6286 = vmatprep.subr.bf16.mxu1 %v7158_v0 }
 0x163   : > { %v449_v30 = vpop.permute.xlu0 %448 }
 0x164   : > { %6287 = vmatpush3.bf16.msra.mxu1 %v449_v30 }
 0x165   : > { %6309 = vmatpush3.xpose.msk.msra.mxu0 %vm504_vm2, %v701_v27 }
 0x167   : > { %6289 = vmatmul.mubr.msk.bf16.vlgmr.msra.gmra.mxu1 %vm377_vm1, %v442_v31 }
 0x168   : > { %6311 = vmatmul.mubr.msk.f32.vlgmr.msra.gmra.mxu0 %vm504_vm2, %v699_v28 }
 0x220   : > { %v6298_v32 = vpop.f32.mrf.mxu0 }
 0x221   : > { %v594_v33 = vsel %vm590_vm3, %v6298_v32, -inf }
 0x222   : > { %595 = vmax.xlane.f32.xlu0 %v594_v33  ;;  %v581_v34 = vpop.f32.mrf.mxu0 }
 0x223   : > { %v591_v35 = vsel %vm590_vm3, %v581_v34, -inf }
 0x224   : > { %592 = vmax.xlane.f32.xlu1 %v591_v35 }
 0x227   : > { %v491_v36 = vpop.f32.mrf.mxu1 }
 0x228   : > { %v6312_v37 = vpop.f32.mrf.mxu0  ;;  %v7359_v46 = vadd.f32 %v5699_v42, %v491_v36 }
 0x229   : > { %v790_v38 = vsel %vm590_vm3, %v6312_v37, -inf  ;;  %v6290_v39 = vpop.f32.mrf.mxu1 }
 0x22a   : > { %v778_v40 = vpop.f32.mrf.mxu0  ;;  %791 = vmax.xlane.f32.xlu1 %v790_v38 }
 0x22b   : > { %v787_v41 = vsel %vm590_vm3, %v778_v40, -inf  ;;  %v494_v43 = vpop.f32.mrf.mxu1 }
 0x22c   : > { %788 = vmax.xlane.f32.xlu0 %v787_v41  ;;  %v7357_v44 = vadd.f32 %v5699_v42, %v494_v43 }
 0x22d   : > { %v6291_v45 = vpop.f32.mrf.mxu1 }
 0x22e   : > { %6299 = vmatprep.subr.mxu1 %v7357_v44 }
 0x22f   : > { %6300 = vmatpush3.msra.mxu1 %v7357_v44 }
 0x230   : > { %6301 = vmatprep.subr.mxu1 %v7359_v46 }
 0x231   : > { %6302 = vmatpush3.msra.mxu1 %v7359_v46 }
 0x23b   : > { %809 = vrot.lane.b32.xlu1 %v7359_v46, %s8716_s18 }
 0x23f   : > { %915 = vrot.lane.b32.xlu1 %v7316_v19, %s8698_s29 }
 0x242   : > { %811 = vrot.lane.b32.xlu0 %v7357_v44, %s8716_s18 }
 0x243   : > { %909 = vrot.lane.b32.xlu1 %v7312_v17, %s8712_s8 }
 0x246   : > { %913 = vrot.lane.b32.xlu0 %v7310_v15, %s8698_s29  ;;  %s7507_s29 = scalar_lea.vmem %s8690_s2, %s5979_s17 }
 0x247   : > { %1020 = vrot.lane.b32.xlu1 %v7359_v46, %s8712_s8 }
 0x24a   : > { %911 = vrot.lane.b32.xlu0 %v7328_v22, %s8712_s8 }
 0x2ab   : > { %v596_v47 = vpop.xlane.xlu0 %595 }
 0x2ac   : > { %v598_v48 = vsub.f32 %v6298_v32, %v596_v47 }
 0x2ad   : > { %v593_v49 = vpop.xlane.xlu1 %592 }
 0x2ae   : > { %v597_v50 = vsub.f32 %v581_v34, %v593_v49  ;;  %v601_v51 = vmul.f32 1.442695, %v598_v48 }
 0x2b0   : > { %v599_v52 = vmul.f32 1.442695, %v597_v50 }
 0x2b2   : > { %6942 = vpow2.f32 %v599_v52 }
 0x2b3   : > { %6944 = vpow2.f32 %v601_v51  ;;  %v792_v53 = vpop.xlane.xlu1 %791 }
 0x2b4   : > { %v794_v54 = vsub.f32 %v6312_v37, %v792_v53 }
 0x2b5   : > { %v789_v55 = vpop.xlane.xlu0 %788 }
 0x2b6   : > { %v793_v56 = vsub.f32 %v778_v40, %v789_v55  ;;  %v797_v57 = vmul.f32 1.442695, %v794_v54 }
 0x2b7   : > { %v810_v60 = vpop.permute.xlu1 %809 }
 0x2b8   : > { %v795_v58 = vmul.f32 1.442695, %v793_v56 }
 0x2b9   : > { %v812_v59 = vpop.permute.xlu0 %811 }
 0x2ba   : > { %6946 = vpow2.f32 %v795_v58  ;;  %6313 = vmatprep.subr.mxu1 %v812_v59 }
 0x2bb   : > { %6948 = vpow2.f32 %v797_v57  ;;  %v916_v63 = vpop.permute.xlu1 %915 }
 0x2bd   : > { %v914_v8 = vpop.permute.xlu0 %913 }
 0x2bf   : > { %v7379_v61 = vpop.eup %6942  ;;  %v910_v3 = vpop.permute.xlu1 %909 }
 0x2c0   : > { %v7381_v62 = vpop.eup %6944  ;;  %6303 = vmatprep.mubr.msk.f32.mxu1 %vm590_vm3, %v7379_v61  ;;  %v603_v55 = vsel %vm590_vm3, %v7379_v61, 0.0 }
 0x2c1   : > { %6304 = vmatmul.mubr.msk.f32.vlgmr.msra.gmra.mxu1 %vm590_vm3, %v7381_v62  ;;  %v912_v9 = vpop.permute.xlu0 %911  ;;  %v606_v54 = vsel %vm590_vm3, %v7381_v62, 0.0 }
 0x2c2   : > { %6314 = vmatpush3.msra.mxu1 %v812_v59 }
 0x2c3   : > { %6315 = vmatprep.subr.mxu1 %v810_v60  ;;  %v1021_v21 = vpop.permute.xlu1 %1020 }
 0x2c4   : > { %6316 = vmatpush3.msra.mxu1 %v810_v60 }
 0x2c5   : > { %6320 = vmatprep.subr.msk.mxu1 %vm504_vm2, %v916_v63 }
 0x2c7   : > { %v7388_v1 = vpop.eup %6946 }
 0x2c8   : > { %v7390_v2 = vpop.eup %6948  ;;  %6317 = vmatprep.mubr.msk.f32.mxu1 %vm590_vm3, %v7388_v1  ;;  %v799_v39 = vsel %vm590_vm3, %v7388_v1, 0.0 }
 0x2c9   : > { %6318 = vmatmul.mubr.msk.f32.vlgmr.msra.gmra.mxu1 %vm590_vm3, %v7390_v2  ;;  %v802_v38 = vsel %vm590_vm3, %v7390_v2, 0.0 }
 0x2ca   : > { %6321 = vmatpush3.xpose.msk.msra.mxu1 %vm504_vm2, %v916_v63  ;;  %6324 = vmatprep.mubr.msk.f32.mxu1 %vm504_vm2, %v910_v3 }
 0x2cb   : > { %6322 = vmatprep.subr.msk.mxu1 %vm504_vm2, %v914_v8 }
 0x2ce   : > { %6323 = vmatpush3.xpose.msk.msra.mxu1 %vm504_vm2, %v914_v8 }
 0x2d1   : > { %6325 = vmatmul.mubr.msk.f32.vlgmr.msra.gmra.mxu1 %vm504_vm2, %v912_v9 }
 0x381   : > { %v7401_v10 = vpop.f32.mrf.mxu1 }
 0x383   : > { %v7403_v11 = vpop.f32.mrf.mxu1 }
 0x389   : > { %v7405_v12 = vpop.f32.mrf.mxu1 }
 0x38b   : > { %v7407_v13 = vpop.f32.mrf.mxu1 }
 0x391   : > { %v6326_v14 = vpop.f32.mrf.mxu1 }
 0x392   : > { %v1003_v16 = vsel %vm590_vm3, %v6326_v14, -inf }
 0x393   : > { %1004 = vmax.xlane.f32.xlu0 %v1003_v16  ;;  %v991_v18 = vpop.f32.mrf.mxu1 }
 0x394   : > { %v1000_v20 = vsel %vm590_vm3, %v991_v18, -inf }
 0x395   : > { %1001 = vmax.xlane.f32.xlu1 %v1000_v20 }
 0x3a6   : > { %1126 = vrot.lane.b32.xlu1 %v7316_v19, %s8696_s9 }
 0x3a9   : > { %1022 = vrot.lane.b32.xlu0 %v7357_v44, %s8712_s8 }
 0x3aa   : > { %1120 = vrot.lane.b32.xlu1 %v7312_v17, %s8710_s14 }
 0x3ad   : > { %1124 = vrot.lane.b32.xlu0 %v7310_v15, %s8696_s9  ;;  %s8722_s9 = smov 32  }
 0x3b1   : > { %1122 = vrot.lane.b32.xlu0 %v7328_v22, %s8710_s14 }
 0x41c   : > { %v1005_v23 = vpop.xlane.xlu0 %1004 }
 0x41d   : > { %v1007_v24 = vsub.f32 %v6326_v14, %v1005_v23 }
 0x41e   : > { %v1002_v25 = vpop.xlane.xlu1 %1001 }
 0x41f   : > { %v1006_v26 = vsub.f32 %v991_v18, %v1002_v25  ;;  %v1010_v27 = vmul.f32 1.442695, %v1007_v24 }
 0x420   : > { %v1023_v19 = vpop.permute.xlu0 %1022 }
 0x421   : > { %v1008_v28 = vmul.f32 1.442695, %v1006_v26  ;;  %6327 = vmatprep.subr.mxu0 %v1023_v19 }
 0x422   : > { %6328 = vmatpush3.msra.mxu0 %v1023_v19  ;;  %v1127_v17 = vpop.permute.xlu1 %1126 }
 0x423   : > { %6950 = vpow2.f32 %v1008_v28  ;;  %6329 = vmatprep.subr.mxu0 %v1021_v21 }
 0x424   : > { %6952 = vpow2.f32 %v1010_v27  ;;  %6330 = vmatpush3.msra.mxu0 %v1021_v21  ;;  %v1125_v30 = vpop.permute.xlu0 %1124 }
 0x425   : > { %6334 = vmatprep.subr.msk.mxu0 %vm504_vm2, %v1127_v17 }
 0x426   : > { %v1121_v22 = vpop.permute.xlu1 %1120 }
 0x428   : > { %v1123_v31 = vpop.permute.xlu0 %1122 }
 0x430   : > { %v6951_v15 = vpop.eup %6950 }
 0x431   : > { %v6953_v29 = vpop.eup %6952  ;;  %6331 = vmatprep.mubr.msk.f32.mxu0 %vm590_vm3, %v6951_v15  ;;  %v1012_v40 = vsel %vm590_vm3, %v6951_v15, 0.0  ;;  %v6917_v15 = vld [vmem:[%s8692_s4] ss:$12 sps:$4 sm:$0xff]  }
 0x432   : > { %6332 = vmatmul.mubr.msk.f32.vlgmr.msra.gmra.mxu0 %vm590_vm3, %v6953_v29  ;;  %v1015_v41 = vsel %vm590_vm3, %v6953_v29, 0.0  ;;  %v6916_v29 = vld [vmem:[%s8692_s4 + $0x18] ss:$12 sps:$4 sm:$0xff]  }
 0x433   : > { %6335 = vmatpush3.xpose.msk.msra.mxu0 %vm504_vm2, %v1127_v17  ;;  %6338 = vmatprep.mubr.msk.f32.mxu0 %vm504_vm2, %v1121_v22 }
 0x434   : > { %6336 = vmatprep.subr.msk.mxu0 %vm504_vm2, %v1125_v30 }
 0x437   : > { %6337 = vmatpush3.xpose.msk.msra.mxu0 %vm504_vm2, %v1125_v30 }
 0x438   : > { %6356 = vmatprep.subr.bf16.mxu0 %v7158_v0 }
 0x43a   : > { %6339 = vmatmul.mubr.msk.f32.vlgmr.msra.gmra.mxu0 %vm504_vm2, %v1123_v31 }
 0x43b   : > { %6360 = vmatprep.mubr.msk.bf16.mxu0 %vm7159_vm0, %v7158_v0 }
 0x4f2   : > { %v7432_v32 = vpop.f32.mrf.mxu0 }
 0x4f4   : > { %v1098_v33 = vpop.f32.mrf.mxu0 }
 0x4fa   : > { %v6340_v34 = vpop.f32.mrf.mxu0 }
 0x4fb   : > { %v1214_v35 = vsel %vm590_vm3, %v6340_v34, -inf }
 0x4fc   : > { %1215 = vmax.xlane.f32.xlu0 %v1214_v35  ;;  %v1202_v36 = vpop.f32.mrf.mxu0 }
 0x4fd   : > { %v1211_v37 = vsel %vm590_vm3, %v1202_v36, -inf }
 0x4fe   : > { %1212 = vmax.xlane.f32.xlu1 %v1211_v37  ;;  %v6919_v37 = vld [vmem:[%s8692_s4 + $0x4] ss:$12 sps:$4 sm:$0xff]  }
 0x50f   : > { %1231 = vrot.lane.b32.xlu1 %v7359_v46, %s8710_s14 }
 0x512   : > { %1233 = vrot.lane.b32.xlu0 %v7357_v44, %s8710_s14 }
 0x531   : > { %803 = vadd.xlane.f32.xlu0 %v802_v38  ;;  %v5725_v38 = vld [vmem:[%s8694_s6 + $0x3] ss:$0 sm:$0xff] }
 0x533   : > { %800 = vadd.xlane.f32.xlu1 %v799_v39 }
 0x535   : > { %1013 = vadd.xlane.f32.xlu0 %v1012_v40 }
 0x537   : > { %1016 = vadd.xlane.f32.xlu1 %v1015_v41 }
 0x585   : > { %v1216_v42 = vpop.xlane.xlu0 %1215 }
 0x586   : > { %v1218_v43 = vsub.f32 %v6340_v34, %v1216_v42 }
 0x587   : > { %v1213_v45 = vpop.xlane.xlu1 %1212 }
 0x588   : > { %v1221_v46 = vmul.f32 1.442695, %v1218_v43  ;;  %v1217_v47 = vsub.f32 %v1202_v36, %v1213_v45  ;;  %v6918_v36 = vld [vmem:[%s8692_s4 + $0x1c] ss:$12 sps:$4 sm:$0xff]  }
 0x589   : > { %v1234_v44 = vpop.permute.xlu0 %1233  ;;  %6357 = vmatpush3.bf16.msra.mxu0 %v6918_v36 }
 0x58a   : > { %6954 = vpow2.f32 %v1221_v46  ;;  %v1219_v48 = vmul.f32 1.442695, %v1217_v47  ;;  %6341 = vmatprep.subr.mxu1 %v1234_v44  ;;  %6358 = vmatprep.subr.bf16.mxu0 %v7158_v0 }
 0x58b   : > { %6342 = vmatpush3.msra.mxu1 %v1234_v44  ;;  %v1232_v49 = vpop.permute.xlu1 %1231 }
 0x58c   : > { %6956 = vpow2.f32 %v1219_v48  ;;  %6343 = vmatprep.subr.mxu1 %v1232_v49 }
 0x58d   : > { %6344 = vmatpush3.msra.mxu1 %v1232_v49  ;;  %6359 = vmatpush3.bf16.msra.mxu0 %v6919_v37  ;;  %v343_v49 = vld [vmem:[%s7507_s29 + $0x8] sm:$0xff] }
 0x58e   : > { %6348 = vmatprep.subr.bf16.mxu1 %v7158_v0 }
 0x597   : > { %v6955_v50 = vpop.eup %6954 }
 0x598   : > { %v1226_v51 = vsel %vm590_vm3, %v6955_v50, 0.0 }
 0x599   : > { %v6957_v52 = vpop.eup %6956  ;;  %1227 = vadd.xlane.f32.xlu1 %v1226_v51 }
 0x59a   : > { %6345 = vmatprep.mubr.msk.f32.mxu1 %vm590_vm3, %v6957_v52  ;;  %v1223_v53 = vsel %vm590_vm3, %v6957_v52, 0.0 }
 0x59b   : > { %1224 = vadd.xlane.f32.xlu0 %v1223_v53  ;;  %6346 = vmatmul.mubr.msk.f32.vlgmr.msra.gmra.mxu1 %vm590_vm3, %v6955_v50 }
 0x59c   : > { %6352 = vmatprep.mubr.msk.bf16.mxu1 %vm7159_vm0, %v7158_v0 }
 0x59d   : > { %607 = vadd.xlane.f32.xlu1 %v606_v54 }
 0x59f   : > { %604 = vadd.xlane.f32.xlu0 %v603_v55 }
 0x5ba   : > { %v804_v56 = vpop.xlane.xlu0 %803 }
 0x5bb   : > { %6958 = vrcp.f32 %v804_v56 }
 0x5bc   : > { %v801_v57 = vpop.xlane.xlu1 %800 }
 0x5bd   : > { %6960 = vrcp.f32 %v801_v57 }
 0x5be   : > { %v1014_v58 = vpop.xlane.xlu0 %1013 }
 0x5bf   : > { %6962 = vrcp.f32 %v1014_v58 }
 0x5c0   : > { %v1017_v59 = vpop.xlane.xlu1 %1016 }
 0x5c1   : > { %6964 = vrcp.f32 %v1017_v59 }
 0x5c8   : > { %v6959_v60 = vpop.eup %6958 }
 0x5c9   : > { %v897_v63 = vmul.f32 %v6959_v60, %v7405_v12 }
 0x5ca   : > { %v6961_v62 = vpop.eup %6960 }
 0x5cb   : > { %902 = vrot.lane.b32.xlu1 %v897_v63, %s8708_s15  ;;  %v896_v1 = vmul.f32 %v6961_v62, %v7407_v13  ;;  %v344_v63 = vld [vmem:[%s7507_s29 + $0x10] sm:$0xff]  ;;  %v345_v62 = vld [vmem:[%s7507_s29 + $0x18] sm:$0xff] }
 0x5cc   : > { %v6963_v2 = vpop.eup %6962 }
 0x5cd   : > { %900 = vrot.lane.b32.xlu0 %v896_v1, %s8708_s15  ;;  %v1107_v61 = vmul.f32 %v6963_v2, %v1098_v33  ;;  %v346_v2 = vld [vmem:[%s7507_s29 + $0x20] sm:$0xff] }
 0x5ce   : > { %v6965_v3 = vpop.eup %6964 }
 0x5cf   : > { %1111 = vrot.lane.b32.xlu1 %v1107_v61, %s8702_s22  ;;  %v1108_v8 = vmul.f32 %v6965_v3, %v7432_v32  ;;  %v347_v61 = vld [vmem:[%s7507_s29 + $0x28] sm:$0xff]  ;;  %v7522_v3 = vpack.c.bf16 %v345_v62, %v344_v63 }
 0x5d1   : > { %1113 = vrot.lane.b32.xlu0 %v1108_v8, %s8702_s22  ;;  %v7524_v8 = vpack.c.bf16 %v347_v61, %v346_v2  ;;  %s8720_s22 = smov 16  }
 0x622   : > { %v1228_v9 = vpop.xlane.xlu1 %1227 }
 0x624   : > { %v1225_v12 = vpop.xlane.xlu0 %1224 }
 0x626   : > { %v608_v14 = vpop.xlane.xlu1 %607 }
 0x627   : > { %6966 = vrcp.f32 %v608_v14 }
 0x628   : > { %v605_v16 = vpop.xlane.xlu0 %604 }
 0x629   : > { %6968 = vrcp.f32 %v605_v16 }
 0x62a   : > { %6970 = vrcp.f32 %v1228_v9  ;;  %v348_v9 = vld [vmem:[%s7507_s29 + $0x30] sm:$0xff] }
 0x62b   : > { %6972 = vrcp.f32 %v1225_v12  ;;  %v349_v12 = vld [vmem:[%s7507_s29 + $0x38] sm:$0xff] }
 0x62c   : > { %v7532_v14 = vpack.c.bf16 %v349_v12, %v348_v9 }
 0x634   : > { %v6967_v18 = vpop.eup %6966 }
 0x635   : > { %v693_v13 = vmul.f32 %v6967_v18, %v7401_v10 }
 0x636   : > { %v6969_v20 = vpop.eup %6968 }
 0x637   : > { %695 = vst.msk [vmem:[#allocation2 + $0x8] sm:$0xff] %vm504_vm2, %v693_v13  ;;  %v692_v21 = vmul.f32 %v6969_v20, %v7403_v11  ;;  %v6971_v10 = vpop.eup %6970 }
 0x638   : > { %v6973_v19 = vpop.eup %6972 }
 0x639   : > { %694 = vst.msk [vmem:[#allocation2] sm:$0xff] %vm504_vm2, %v692_v21 }
 0x63d   : > { %v903_v23 = vpop.permute.xlu1 %902 }
 0x63e   : > { %908 = vst.msk [vmem:[#allocation2 + $0x8] sm:$0xff] %vm906_vm4, %v903_v23 }
 0x63f   : > { %v901_v24 = vpop.permute.xlu0 %900 }
 0x640   : > { %907 = vst.msk [vmem:[#allocation2] sm:$0xff] %vm906_vm4, %v901_v24 }
 0x641   : > { %v1112_v25 = vpop.permute.xlu1 %1111 }
 0x642   : > { %1118 = vst.msk [vmem:[#allocation2] sm:$0xff] %vm1117_vm5, %v1112_v25  ;;  %v5729_v25 = vld [vmem:[%s8694_s6 + $0xa] ss:$0 sm:$0xff] }
 0x643   : > { %v1114_v26 = vpop.permute.xlu0 %1113 }
 0x644   : > { %1119 = vst.msk [vmem:[#allocation2 + $0x8] sm:$0xff] %vm1117_vm5, %v1114_v26 }
 0x65b   : > { %v6347_v11 = vpop.f32.mrf.mxu1 }
 0x65c   : > { %v1319_v27 = vmul.f32 %v6971_v10, %v6347_v11 }
 0x65d   : > { %v1309_v28 = vpop.f32.mrf.mxu1 }
 0x65e   : > { %v1318_v17 = vmul.f32 %v6973_v19, %v1309_v28  ;;  %1324 = vrot.lane.b32.xlu0 %v1319_v27, %s8706_s23  ;;  %v5730_v27 = vld [vmem:[%s8694_s6 + $0xd] ss:$0 sm:$0xff] }
 0x660   : > { %1322 = vrot.lane.b32.xlu1 %v1318_v17, %s8706_s23  ;;  %s336_s23 = scalar_lea.vmem %s8691_s3, %s5979_s17  ;;  %s8728_s17 = smov 104  }
 0x662   : > { %1353 = vrot.lane.b32.xlu0 %v6917_v15, %s8704_s20 }
 0x664   : > { %1355 = vrot.lane.b32.xlu1 %v6916_v29, %s8704_s20  ;;  %s8721_s20 = smov 24  }
 0x6d0   : > { %v1325_v22 = vpop.permute.xlu0 %1324 }
 0x6d1   : > { %1330 = vst.msk [vmem:[#allocation2 + $0x8] sm:$0xff] %vm1328_vm6, %v1325_v22 }
 0x6d2   : > { %v1323_v30 = vpop.permute.xlu1 %1322 }
 0x6d3   : > { %1329 = vst.msk [vmem:[#allocation2] sm:$0xff] %vm1328_vm6, %v1323_v30 }
 0x6d4   : > { %v1354_v32 = vpop.permute.xlu0 %1353 }
 0x6d6   : > { %v1356_v31 = vpop.permute.xlu1 %1355 }
 0x6d7   : > { %6349 = vmatpush3.bf16.msra.mxu1 %v1356_v31 }
 0x6d8   : > { %6350 = vmatprep.subr.bf16.mxu1 %v7158_v0  ;;  %v1332_v34 = vld [vmem:[#allocation2 + $0x8] sm:$0xff] }
 0x6da   : > { %v1331_v33 = vld [vmem:[#allocation2] sm:$0xff] }
 0x6db   : > { %6351 = vmatpush3.bf16.msra.mxu1 %v1354_v32  ;;  %v1337_v35 = vpack.c.bf16 %v1332_v34, %v1331_v33 }
 0x6de   : > { %6353 = vmatmul.mubr.msk.bf16.vlgmr.msra.gmra.mxu1 %vm377_vm1, %v1337_v35 }
 0x79e   : > { %v1396_v39 = vpop.f32.mrf.mxu1 }
 0x79f   : > { %v1397_v40 = vadd.f32 %v5725_v38, %v1396_v39 }
 0x7a0   : > { %v6354_v41 = vpop.f32.mrf.mxu1 }
 0x7a1   : > { %v1405_v42 = vadd.f32 %v1397_v40, %v7289_v4  ;;  %v342_v4 = vld [vmem:[%s7507_s29] sm:$0xff]  ;;  %s8729_s29 = smov 8  }
 0x7a2   : > { %v1399_v43 = vpop.f32.mrf.mxu1  ;;  %v7511_v50 = vpack.c.bf16 %v343_v49, %v342_v4  ;;  %v351_v4 = vld [vmem:[%s336_s23 + $0x8] sm:$0xff] }
 0x7a3   : > { %v1400_v45 = vadd.f32 %v5725_v38, %v1399_v43  ;;  %v1407_v46 = vsel %vm377_vm1, %v1405_v42, 0.0 }
 0x7a4   : > { %1408 = vadd.xlane.f32.xlu1 %v1407_v46  ;;  %v6355_v47 = vpop.f32.mrf.mxu1  ;;  %6368 = vmatprep.mubr.msk.bf16.mxu1 %vm377_vm1, %v7511_v50 }
 0x7a5   : > { %v1406_v44 = vadd.f32 %v1400_v45, %v7291_v5 }
 0x7a7   : > { %v1410_v48 = vsel %vm377_vm1, %v1406_v44, 0.0 }
 0x7a8   : > { %1411 = vadd.xlane.f32.xlu0 %v1410_v48  ;;  %v350_v48 = vld [vmem:[%s336_s23] sm:$0xff] }
 0x7a9   : > { %v7607_v49 = vpack.c.bf16 %v351_v4, %v350_v48 }
 0x7b5   : > { %1525 = vrot.lane.b32.xlu1 %v6919_v37, %s7161_s16 }
 0x7be   : > { %1527 = vrot.lane.b32.xlu0 %v6918_v36, %s7161_s16 }
 0x82d   : > { %v1409_v5 = vpop.xlane.xlu1 %1408 }
 0x82e   : > { %v1414_v51 = vmul.f32 0.03125, %v1409_v5  ;;  %v352_v5 = vld [vmem:[%s336_s23 + $0x10] sm:$0xff] }
 0x830   : > { %v1416_v52 = vsub.f32 %v1405_v42, %v1414_v51  ;;  %v353_v51 = vld [vmem:[%s336_s23 + $0x18] sm:$0xff] }
 0x831   : > { %v1412_v53 = vpop.xlane.xlu0 %1411  ;;  %v1526_v59 = vpop.permute.xlu1 %1525 }
 0x832   : > { %v1415_v54 = vmul.f32 0.03125, %v1412_v53  ;;  %v1418_v55 = vmul.f32 %v1416_v52, %v1416_v52  ;;  %v355_v53 = vld [vmem:[%s336_s23 + $0x28] sm:$0xff] }
 0x834   : > { %v1417_v56 = vsub.f32 %v1406_v44, %v1415_v54  ;;  %v1420_v57 = vsel %vm377_vm1, %v1418_v55, 0.0  ;;  %v7613_v54 = vpack.c.bf16 %v353_v51, %v352_v5 }
 0x835   : > { %1421 = vadd.xlane.f32.xlu1 %v1420_v57  ;;  %v1528_v58 = vpop.permute.xlu0 %1527  ;;  %v357_v57 = vld [vmem:[%s336_s23 + $0x38] sm:$0xff] }
 0x836   : > { %v1419_v60 = vmul.f32 %v1417_v56, %v1417_v56  ;;  %6364 = vmatprep.subr.bf16.mxu1 %v1528_v58 }
 0x837   : > { %6365 = vmatpush3.bf16.msra.mxu1 %v1528_v58 }
 0x838   : > { %v1423_v1 = vsel %vm377_vm1, %v1419_v60, 0.0  ;;  %6366 = vmatprep.subr.bf16.mxu1 %v1526_v59 }
 0x839   : > { %1424 = vadd.xlane.f32.xlu0 %v1423_v1 }
 0x83b   : > { %6367 = vmatpush3.bf16.msra.mxu1 %v1526_v59  ;;  %v5731_v59 = vld [vmem:[%s8694_s6 + $0x4] ss:$0 sm:$0xff] }
 0x83e   : > { %6369 = vmatmul.mubr.msk.bf16.vlgmr.msra.gmra.mxu1 %vm377_vm1, %v7522_v3 }
 0x83f   : > { %6372 = vmatprep.mubr.msk.bf16.mxu1 %vm377_vm1, %v7524_v8 }
 0x846   : > { %6373 = vmatmul.mubr.msk.bf16.gmra.mxu1 %vm377_vm1, %v7532_v14  ;;  %1617 = vrot.lane.b32.xlu1 %v6919_v37, %s8714_s21 }
 0x84f   : > { %1619 = vrot.lane.b32.xlu0 %v6918_v36, %s8714_s21  ;;  %v5735_v36 = vld [vmem:[%s8694_s6 + $0x5] ss:$0 sm:$0xff]  ;;  %s8726_s21 = smov 80  }
 0x8be   : > { %v1422_v16 = vpop.xlane.xlu1 %1421 }
 0x8bf   : > { %v1426_v18 = vmul.f32 0.03125, %v1422_v16 }
 0x8c1   : > { %v1428_v13 = vadd.f32 1e-05, %v1426_v18 }
 0x8c2   : > { %v1425_v20 = vpop.xlane.xlu0 %1424  ;;  %v1618_v44 = vpop.permute.xlu1 %1617 }
 0x8c3   : > { %6974 = vrsqrt.f32 %v1428_v13  ;;  %v1427_v21 = vmul.f32 0.03125, %v1425_v20 }
 0x8c5   : > { %v1429_v23 = vadd.f32 1e-05, %v1427_v21 }
 0x8c6   : > { %v1620_v47 = vpop.permute.xlu0 %1619 }
 0x8c7   : > { %6976 = vrsqrt.f32 %v1429_v23  ;;  %6376 = vmatprep.subr.bf16.mxu0 %v1620_v47  ;;  %v5740_v23 = vld [vmem:[%s8694_s6 + $0x6] ss:$0 sm:$0xff] }
 0x8d0   : > { %v6975_v24 = vpop.eup %6974 }
 0x8d1   : > { %v1432_v26 = vmul.f32 %v6975_v24, %v1416_v52  ;;  %v354_v52 = vld [vmem:[%s336_s23 + $0x20] sm:$0xff] }
 0x8d2   : > { %v7615_v55 = vpack.c.bf16 %v355_v53, %v354_v52 }
 0x8d3   : > { %v1438_v10 = vmul.f32 %v5729_v25, %v1432_v26 }
 0x8d4   : > { %v6977_v11 = vpop.eup %6976 }
 0x8d5   : > { %v1433_v19 = vmul.f32 %v6977_v11, %v1417_v56  ;;  %v7544_v17 = vadd.f32 %v5730_v27, %v1438_v10  ;;  %v356_v56 = vld [vmem:[%s336_s23 + $0x30] sm:$0xff] }
 0x8d6   : > { %v7621_v58 = vpack.c.bf16 %v357_v57, %v356_v56 }
 0x8d7   : > { %v1439_v28 = vmul.f32 %v5729_v25, %v1433_v19  ;;  %v1446_v29 = vadd.f32 %v7544_v17, %v7294_v6 }
 0x8d9   : > { %v7546_v15 = vadd.f32 %v5730_v27, %v1439_v28 }
 0x8db   : > { %v1447_v22 = vadd.f32 %v7546_v15, %v7298_v7 }
 0x8dd   : > { %v1452_v30 = vpack.c.bf16 %v1447_v22, %v1446_v29 }
 0x8df   : > { %6361 = vmatmul.mubr.msk.bf16.vlgmr.msra.gmra.mxu0 %vm377_vm1, %v1452_v30 }
 0x8e0   : > { %6377 = vmatpush3.bf16.msra.mxu0 %v1620_v47  ;;  %6380 = vmatprep.mubr.msk.bf16.mxu0 %vm377_vm1, %v7607_v49 }
 0x8e1   : > { %6378 = vmatprep.subr.bf16.mxu0 %v1618_v44 }
 0x8e4   : > { %6379 = vmatpush3.bf16.msra.mxu0 %v1618_v44 }
 0x8e7   : > { %6381 = vmatmul.mubr.msk.bf16.vlgmr.msra.gmra.mxu0 %vm377_vm1, %v7613_v54 }
 0x8e8   : > { %6384 = vmatprep.mubr.msk.bf16.mxu0 %vm377_vm1, %v7615_v55 }
 0x8ef   : > { %6385 = vmatmul.mubr.msk.bf16.gmra.mxu0 %vm377_vm1, %v7621_v58 }
 0x8fe   : > { %v6370_v31 = vpop.f32.mrf.mxu1 }
 0x8ff   : > { %v7582_v43 = vadd.f32 %v6370_v31, %v5735_v36 }
 0x900   : > { %v1577_v32 = vpop.f32.mrf.mxu1 }
 0x901   : > { %v7594_v46 = vadd.f32 %v5735_v36, %v1577_v32 }
 0x902   : > { %v6371_v33 = vpop.f32.mrf.mxu1 }
 0x903   : > { %v7576_v42 = vadd.f32 %v6371_v33, %v5735_v36 }
 0x904   : > { %v1580_v34 = vpop.f32.mrf.mxu1 }
 0x905   : > { %v7588_v45 = vadd.f32 %v5735_v36, %v1580_v34 }
 0x906   : > { %v6374_v35 = vpop.f32.mrf.mxu1 }
 0x907   : > { %v7556_v39 = vadd.f32 %v6374_v35, %v5735_v36 }
 0x908   : > { %v1593_v37 = vpop.f32.mrf.mxu1 }
 0x909   : > { %v7570_v41 = vadd.f32 %v5735_v36, %v1593_v37 }
 0x90a   : > { %v6375_v38 = vpop.f32.mrf.mxu1 }
 0x90b   : > { %v7558_v6 = vadd.f32 %v6375_v38, %v5735_v36 }
 0x90c   : > { %v1596_v40 = vpop.f32.mrf.mxu1 }
 0x90d   : > { %6388 = vmatprep.subr.msk.mxu1 %vm504_vm2, %v7558_v6  ;;  %v7566_v7 = vadd.f32 %v5735_v36, %v1596_v40 }
 0x90e   : > { %6389 = vmatpush3.xpose.msk.msra.mxu1 %vm504_vm2, %v7558_v6 }
 0x90f   : > { %6390 = vmatprep.subr.msk.mxu1 %vm504_vm2, %v7556_v39 }
 0x912   : > { %6391 = vmatpush3.xpose.msk.msra.mxu1 %vm504_vm2, %v7556_v39 }
 0x913   : > { %6392 = vmatprep.subr.msk.mxu1 %vm504_vm2, %v7566_v7 }
 0x916   : > { %6393 = vmatpush3.xpose.msk.msra.mxu1 %vm504_vm2, %v7566_v7 }
 0x917   : > { %6394 = vmatprep.subr.msk.mxu1 %vm504_vm2, %v7570_v41 }
 0x91a   : > { %6395 = vmatpush3.xpose.msk.msra.mxu1 %vm504_vm2, %v7570_v41 }
 0x91b   : > { %6396 = vmatprep.subr.msk.mxu1 %vm504_vm2, %v7576_v42 }
 0x91e   : > { %6397 = vmatpush3.xpose.msk.msra.mxu1 %vm504_vm2, %v7576_v42 }
 0x91f   : > { %6398 = vmatprep.subr.msk.mxu1 %vm504_vm2, %v7582_v43 }
 0x922   : > { %6399 = vmatpush3.xpose.msk.msra.mxu1 %vm504_vm2, %v7582_v43 }
 0x923   : > { %6400 = vmatprep.subr.msk.mxu1 %vm504_vm2, %v7588_v45 }
 0x926   : > { %6401 = vmatpush3.xpose.msk.msra.mxu1 %vm504_vm2, %v7588_v45 }
 0x927   : > { %6402 = vmatprep.subr.msk.mxu1 %vm504_vm2, %v7594_v46 }
 0x92a   : > { %6403 = vmatpush3.xpose.msk.msra.mxu1 %vm504_vm2, %v7594_v46 }
 0x99f   : > { %v1507_v60 = vpop.f32.mrf.mxu0 }
 0x9a0   : > { %v1508_v63 = vadd.f32 %v5731_v59, %v1507_v60 }
 0x9a1   : > { %v6362_v62 = vpop.f32.mrf.mxu0 }
 0x9a2   : > { %v7628_v1 = vmul.f32 0.35355338, %v1508_v63 }
 0x9a3   : > { %v1510_v2 = vpop.f32.mrf.mxu0 }
 0x9a4   : > { %v1511_v61 = vadd.f32 %v5731_v59, %v1510_v2  ;;  %6404 = vmatprep.mubr.msk.f32.mxu1 %vm504_vm2, %v7628_v1 }
 0x9a5   : > { %v6363_v9 = vpop.f32.mrf.mxu0 }
 0x9a6   : > { %v7632_v12 = vmul.f32 0.35355338, %v1511_v61 }
 0x9a7   : > { %v6382_v16 = vpop.f32.mrf.mxu0 }
 0x9a8   : > { %6405 = vmatmul.mubr.msk.f32.vlgmr.msra.gmra.mxu1 %vm504_vm2, %v7632_v12  ;;  %v7655_v29 = vadd.f32 %v6382_v16, %v5740_v23 }
 0x9a9   : > { %v1669_v18 = vpop.f32.mrf.mxu0 }
 0x9aa   : > { %v7663_v30 = vadd.f32 %v5740_v23, %v1669_v18 }
 0x9ab   : > { %v6383_v13 = vpop.f32.mrf.mxu0 }
 0x9ac   : > { %v7651_v28 = vadd.f32 %v6383_v13, %v5740_v23 }
 0x9ad   : > { %v1672_v20 = vpop.f32.mrf.mxu0 }
 0x9ae   : > { %v7659_v22 = vadd.f32 %v5740_v23, %v1672_v20 }
 0x9af   : > { %v6386_v21 = vpop.f32.mrf.mxu0 }
 0x9b0   : > { %v7639_v26 = vadd.f32 %v6386_v21, %v5740_v23 }
 0x9b1   : > { %v1685_v24 = vpop.f32.mrf.mxu0 }
 0x9b2   : > { %v7647_v19 = vadd.f32 %v5740_v23, %v1685_v24 }
 0x9b3   : > { %v6387_v25 = vpop.f32.mrf.mxu0 }
 0x9b4   : > { %v7641_v10 = vadd.f32 %v6387_v25, %v5740_v23 }
 0x9b5   : > { %v1688_v11 = vpop.f32.mrf.mxu0 }
 0x9b6   : > { %6407 = vmatprep.subr.mxu0 %v7641_v10  ;;  %v7644_v27 = vadd.f32 %v5740_v23, %v1688_v11 }
 0x9b7   : > { %6408 = vmatpush3.msra.mxu0 %v7641_v10 }
 0x9b8   : > { %6409 = vmatprep.subr.mxu0 %v7639_v26 }
 0x9b9   : > { %6410 = vmatpush3.msra.mxu0 %v7639_v26 }
 0x9ba   : > { %6411 = vmatprep.subr.mxu0 %v7644_v27 }
 0x9bb   : > { %6412 = vmatpush3.msra.mxu0 %v7644_v27 }
 0x9bc   : > { %6413 = vmatprep.subr.mxu0 %v7647_v19 }
 0x9bd   : > { %6414 = vmatpush3.msra.mxu0 %v7647_v19 }
 0x9be   : > { %6415 = vmatprep.subr.mxu0 %v7651_v28 }
 0x9bf   : > { %6416 = vmatpush3.msra.mxu0 %v7651_v28 }
 0x9c0   : > { %6417 = vmatprep.subr.mxu0 %v7655_v29 }
 0x9c1   : > { %6418 = vmatpush3.msra.mxu0 %v7655_v29 }
 0x9c2   : > { %6419 = vmatprep.subr.mxu0 %v7659_v22 }
 0x9c3   : > { %6420 = vmatpush3.msra.mxu0 %v7659_v22 }
 0x9c4   : > { %6421 = vmatprep.subr.mxu0 %v7663_v30 }
 0x9c5   : > { %6422 = vmatpush3.msra.mxu0 %v7663_v30 }
 0xa68   : > { %v6406_v31 = vpop.f32.mrf.mxu1 }
 0xa69   : > { %v1809_v32 = vsel %vm1805_vm7, %v6406_v31, -inf }
 0xa6a   : > { %1810 = vmax.xlane.f32.xlu0 %v1809_v32  ;;  %v1796_v33 = vpop.f32.mrf.mxu1 }
 0xa6b   : > { %v1806_v34 = vsel %vm1805_vm7, %v1796_v33, -inf }
 0xa6c   : > { %1807 = vmax.xlane.f32.xlu1 %v1806_v34 }
 0xa7d   : > { %1927 = vrot.lane.b32.xlu1 %v7556_v39, %s8716_s18 }
 0xa80   : > { %1929 = vrot.lane.b32.xlu0 %v7558_v6, %s8716_s18 }
 0xa81   : > { %1925 = vrot.lane.b32.xlu1 %v7566_v7, %s8716_s18 }
 0xa84   : > { %1923 = vrot.lane.b32.xlu0 %v7570_v41, %s8716_s18 }
 0xa85   : > { %1921 = vrot.lane.b32.xlu1 %v7576_v42, %s8716_s18 }
 0xa88   : > { %1919 = vrot.lane.b32.xlu0 %v7582_v43, %s8716_s18 }
 0xa89   : > { %1917 = vrot.lane.b32.xlu1 %v7588_v45, %s8716_s18 }
 0xa8c   : > { %1915 = vrot.lane.b32.xlu0 %v7594_v46, %s8716_s18 }
 0xa8d   : > { %1911 = vrot.lane.b32.xlu1 %v7628_v1, %s8716_s18 }
 0xa90   : > { %1913 = vrot.lane.b32.xlu0 %v7632_v12, %s8716_s18 }
 0xa91   : > { %2066 = vrot.lane.b32.xlu1 %v7639_v26, %s8716_s18 }
 0xa94   : > { %2068 = vrot.lane.b32.xlu0 %v7641_v10, %s8716_s18 }
 0xa95   : > { %2064 = vrot.lane.b32.xlu1 %v7644_v27, %s8716_s18 }
 0xa98   : > { %2062 = vrot.lane.b32.xlu0 %v7647_v19, %s8716_s18 }
 0xa99   : > { %2060 = vrot.lane.b32.xlu1 %v7651_v28, %s8716_s18 }
 0xa9c   : > { %2058 = vrot.lane.b32.xlu0 %v7655_v29, %s8716_s18 }
 0xa9d   : > { %2056 = vrot.lane.b32.xlu1 %v7659_v22, %s8716_s18 }
 0xaf3   : > { %v1811_v35 = vpop.xlane.xlu0 %1810 }
 0xaf4   : > { %v1813_v36 = vsub.f32 %v6406_v31, %v1811_v35 }
 0xaf5   : > { %v1808_v37 = vpop.xlane.xlu1 %1807 }
 0xaf6   : > { %v1812_v38 = vsub.f32 %v1796_v33, %v1808_v37  ;;  %v1816_v40 = vmul.f32 1.442695, %v1813_v36 }
 0xaf7   : > { %v1930_v47 = vpop.permute.xlu0 %1929 }
 0xaf8   : > { %v1814_v44 = vmul.f32 1.442695, %v1812_v38  ;;  %6426 = vmatprep.subr.msk.mxu0 %vm504_vm2, %v1930_v47 }
 0xaf9   : > { %v1928_v48 = vpop.permute.xlu1 %1927 }
 0xafa   : > { %6978 = vpow2.f32 %v1814_v44 }
 0xafb   : > { %6980 = vpow2.f32 %v1816_v40  ;;  %v1924_v4 = vpop.permute.xlu0 %1923 }
 0xafd   : > { %v1926_v5 = vpop.permute.xlu1 %1925 }
 0xaff   : > { %v1920_v51 = vpop.permute.xlu0 %1919 }
 0xb01   : > { %v1922_v52 = vpop.permute.xlu1 %1921 }
 0xb03   : > { %v1916_v53 = vpop.permute.xlu0 %1915 }
 0xb05   : > { %v1918_v56 = vpop.permute.xlu1 %1917 }
 0xb07   : > { %v7708_v57 = vpop.eup %6978  ;;  %v1914_v59 = vpop.permute.xlu0 %1913 }
 0xb08   : > { %v7710_v60 = vpop.eup %6980  ;;  %6423 = vmatprep.mubr.msk.f32.mxu0 %vm1805_vm7, %v7708_v57 }
 0xb09   : > { %6424 = vmatmul.mubr.msk.f32.vlgmr.msra.gmra.mxu0 %vm1805_vm7, %v7710_v60  ;;  %v1912_v63 = vpop.permute.xlu1 %1911 }
 0xb0a   : > { %6427 = vmatpush3.xpose.msk.msra.mxu0 %vm504_vm2, %v1930_v47  ;;  %6442 = vmatprep.mubr.msk.f32.mxu0 %vm504_vm2, %v1912_v63 }
 0xb0b   : > { %6428 = vmatprep.subr.msk.mxu0 %vm504_vm2, %v1928_v48  ;;  %v2069_v62 = vpop.permute.xlu0 %2068 }
 0xb0c   : > { %6445 = vmatprep.subr.mxu1 %v2069_v62 }
 0xb0d   : > { %v2067_v2 = vpop.permute.xlu1 %2066  ;;  %6446 = vmatpush3.msra.mxu1 %v2069_v62 }
 0xb0e   : > { %6429 = vmatpush3.xpose.msk.msra.mxu0 %vm504_vm2, %v1928_v48  ;;  %6447 = vmatprep.subr.mxu1 %v2067_v2 }
 0xb0f   : > { %6430 = vmatprep.subr.msk.mxu0 %vm504_vm2, %v1926_v5  ;;  %6448 = vmatpush3.msra.mxu1 %v2067_v2  ;;  %v2063_v61 = vpop.permute.xlu0 %2062 }
 0xb11   : > { %v2065_v9 = vpop.permute.xlu1 %2064 }
 0xb12   : > { %6431 = vmatpush3.xpose.msk.msra.mxu0 %vm504_vm2, %v1926_v5  ;;  %6449 = vmatprep.subr.mxu1 %v2065_v9 }
 0xb13   : > { %6432 = vmatprep.subr.msk.mxu0 %vm504_vm2, %v1924_v4  ;;  %6450 = vmatpush3.msra.mxu1 %v2065_v9  ;;  %v2059_v18 = vpop.permute.xlu0 %2058 }
 0xb14   : > { %6451 = vmatprep.subr.mxu1 %v2063_v61 }
 0xb15   : > { %6452 = vmatpush3.msra.mxu1 %v2063_v61  ;;  %v2061_v16 = vpop.permute.xlu1 %2060 }
 0xb16   : > { %6433 = vmatpush3.xpose.msk.msra.mxu0 %vm504_vm2, %v1924_v4  ;;  %6453 = vmatprep.subr.mxu1 %v2061_v16 }
 0xb17   : > { %6434 = vmatprep.subr.msk.mxu0 %vm504_vm2, %v1922_v52  ;;  %6454 = vmatpush3.msra.mxu1 %v2061_v16 }
 0xb18   : > { %6455 = vmatprep.subr.mxu1 %v2059_v18 }
 0xb19   : > { %6456 = vmatpush3.msra.mxu1 %v2059_v18  ;;  %v2057_v13 = vpop.permute.xlu1 %2056 }
 0xb1a   : > { %6435 = vmatpush3.xpose.msk.msra.mxu0 %vm504_vm2, %v1922_v52  ;;  %6457 = vmatprep.subr.mxu1 %v2057_v13 }
 0xb1b   : > { %6436 = vmatprep.subr.msk.mxu0 %vm504_vm2, %v1920_v51  ;;  %6458 = vmatpush3.msra.mxu1 %v2057_v13 }
 0xb1e   : > { %6437 = vmatpush3.xpose.msk.msra.mxu0 %vm504_vm2, %v1920_v51 }
 0xb1f   : > { %6438 = vmatprep.subr.msk.mxu0 %vm504_vm2, %v1918_v56 }
 0xb22   : > { %6439 = vmatpush3.xpose.msk.msra.mxu0 %vm504_vm2, %v1918_v56 }
 0xb23   : > { %6440 = vmatprep.subr.msk.mxu0 %vm504_vm2, %v1916_v53 }
 0xb26   : > { %6441 = vmatpush3.xpose.msk.msra.mxu0 %vm504_vm2, %v1916_v53 }
 0xb29   : > { %6443 = vmatmul.mubr.msk.f32.vlgmr.msra.gmra.mxu0 %vm504_vm2, %v1914_v59 }
 0xbc9   : > { %v7733_v20 = vpop.f32.mrf.mxu0 }
 0xbcb   : > { %v7735_v21 = vpop.f32.mrf.mxu0 }
 0xbe9   : > { %v6444_v23 = vpop.f32.mrf.mxu0 }
 0xbea   : > { %v2029_v24 = vsel %vm1805_vm7, %v6444_v23, -inf }
 0xbeb   : > { %2030 = vmax.xlane.f32.xlu0 %v2029_v24  ;;  %v2017_v25 = vpop.f32.mrf.mxu0 }
 0xbec   : > { %v2026_v11 = vsel %vm1805_vm7, %v2017_v25, -inf }
 0xbed   : > { %2027 = vmax.xlane.f32.xlu1 %v2026_v11 }
 0xbfe   : > { %2189 = vrot.lane.b32.xlu1 %v7558_v6, %s8712_s8 }
 0xc01   : > { %2054 = vrot.lane.b32.xlu0 %v7663_v30, %s8716_s18 }
 0xc02   : > { %2185 = vrot.lane.b32.xlu1 %v7566_v7, %s8712_s8 }
 0xc05   : > { %2187 = vrot.lane.b32.xlu0 %v7556_v39, %s8712_s8 }
 0xc06   : > { %2181 = vrot.lane.b32.xlu1 %v7576_v42, %s8712_s8 }
 0xc09   : > { %2183 = vrot.lane.b32.xlu0 %v7570_v41, %s8712_s8 }
 0xc0a   : > { %2177 = vrot.lane.b32.xlu1 %v7588_v45, %s8712_s8 }
 0xc0d   : > { %2179 = vrot.lane.b32.xlu0 %v7582_v43, %s8712_s8 }
 0xc0e   : > { %2171 = vrot.lane.b32.xlu1 %v7628_v1, %s8712_s8 }
 0xc11   : > { %2175 = vrot.lane.b32.xlu0 %v7594_v46, %s8712_s8 }
 0xc12   : > { %2318 = vrot.lane.b32.xlu1 %v7639_v26, %s8712_s8 }
 0xc15   : > { %2173 = vrot.lane.b32.xlu0 %v7632_v12, %s8712_s8 }
 0xc16   : > { %2316 = vrot.lane.b32.xlu1 %v7644_v27, %s8712_s8 }
 0xc19   : > { %2320 = vrot.lane.b32.xlu0 %v7641_v10, %s8712_s8 }
 0xc1a   : > { %2312 = vrot.lane.b32.xlu1 %v7651_v28, %s8712_s8 }
 0xc1d   : > { %2314 = vrot.lane.b32.xlu0 %v7647_v19, %s8712_s8 }
 0xc1e   : > { %2308 = vrot.lane.b32.xlu1 %v7659_v22, %s8712_s8 }
 0xc21   : > { %2310 = vrot.lane.b32.xlu0 %v7655_v29, %s8712_s8 }
 0xc74   : > { %v2031_v31 = vpop.xlane.xlu0 %2030 }
 0xc75   : > { %v2033_v32 = vsub.f32 %v6444_v23, %v2031_v31 }
 0xc76   : > { %v2028_v33 = vpop.xlane.xlu1 %2027 }
 0xc77   : > { %v2032_v34 = vsub.f32 %v2017_v25, %v2028_v33  ;;  %v2036_v35 = vmul.f32 1.442695, %v2033_v32 }
 0xc78   : > { %v2055_v36 = vpop.permute.xlu0 %2054 }
 0xc79   : > { %v2034_v37 = vmul.f32 1.442695, %v2032_v34  ;;  %6459 = vmatprep.subr.mxu1 %v2055_v36 }
 0xc7a   : > { %6460 = vmatpush3.msra.mxu1 %v2055_v36  ;;  %v2190_v38 = vpop.permute.xlu1 %2189 }
 0xc7b   : > { %6982 = vpow2.f32 %v2034_v37  ;;  %6464 = vmatprep.subr.msk.mxu1 %vm504_vm2, %v2190_v38 }
 0xc7c   : > { %6984 = vpow2.f32 %v2036_v35  ;;  %v2188_v40 = vpop.permute.xlu0 %2187 }
 0xc7e   : > { %v2186_v47 = vpop.permute.xlu1 %2185 }
 0xc80   : > { %v2184_v44 = vpop.permute.xlu0 %2183 }
 0xc82   : > { %v2182_v48 = vpop.permute.xlu1 %2181 }
 0xc84   : > { %v2180_v4 = vpop.permute.xlu0 %2179 }
 0xc86   : > { %v2178_v5 = vpop.permute.xlu1 %2177 }
 0xc88   : > { %v7776_v51 = vpop.eup %6982  ;;  %v2176_v52 = vpop.permute.xlu0 %2175 }
 0xc89   : > { %v7778_v53 = vpop.eup %6984  ;;  %6461 = vmatprep.mubr.msk.f32.mxu1 %vm1805_vm7, %v7776_v51 }
 0xc8a   : > { %6462 = vmatmul.mubr.msk.f32.vlgmr.msra.gmra.mxu1 %vm1805_vm7, %v7778_v53  ;;  %v2172_v56 = vpop.permute.xlu1 %2171 }
 0xc8b   : > { %6465 = vmatpush3.xpose.msk.msra.mxu1 %vm504_vm2, %v2190_v38  ;;  %6480 = vmatprep.mubr.msk.f32.mxu1 %vm504_vm2, %v2172_v56 }
 0xc8c   : > { %6466 = vmatprep.subr.msk.mxu1 %vm504_vm2, %v2188_v40  ;;  %v2174_v59 = vpop.permute.xlu0 %2173 }
 0xc8e   : > { %v2319_v63 = vpop.permute.xlu1 %2318 }
 0xc8f   : > { %6467 = vmatpush3.xpose.msk.msra.mxu1 %vm504_vm2, %v2188_v40 }
 0xc90   : > { %6468 = vmatprep.subr.msk.mxu1 %vm504_vm2, %v2186_v47  ;;  %v2321_v62 = vpop.permute.xlu0 %2320 }
 0xc91   : > { %6483 = vmatprep.subr.mxu0 %v2321_v62 }
 0xc92   : > { %6484 = vmatpush3.msra.mxu0 %v2321_v62  ;;  %v2317_v2 = vpop.permute.xlu1 %2316 }
 0xc93   : > { %6469 = vmatpush3.xpose.msk.msra.mxu1 %vm504_vm2, %v2186_v47  ;;  %6485 = vmatprep.subr.mxu0 %v2319_v63 }
 0xc94   : > { %6470 = vmatprep.subr.msk.mxu1 %vm504_vm2, %v2184_v44  ;;  %v2315_v61 = vpop.permute.xlu0 %2314  ;;  %6486 = vmatpush3.msra.mxu0 %v2319_v63  ;;  %v2038_v63 = vsel %vm1805_vm7, %v7776_v51, 0.0 }
 0xc95   : > { %6487 = vmatprep.subr.mxu0 %v2317_v2 }
 0xc96   : > { %6488 = vmatpush3.msra.mxu0 %v2317_v2  ;;  %v2313_v9 = vpop.permute.xlu1 %2312 }
 0xc97   : > { %6471 = vmatpush3.xpose.msk.msra.mxu1 %vm504_vm2, %v2184_v44  ;;  %6489 = vmatprep.subr.mxu0 %v2315_v61 }
 0xc98   : > { %6472 = vmatprep.subr.msk.mxu1 %vm504_vm2, %v2182_v48  ;;  %6490 = vmatpush3.msra.mxu0 %v2315_v61  ;;  %v2311_v16 = vpop.permute.xlu0 %2310 }
 0xc99   : > { %6491 = vmatprep.subr.mxu0 %v2313_v9 }
 0xc9a   : > { %6492 = vmatpush3.msra.mxu0 %v2313_v9  ;;  %v2309_v18 = vpop.permute.xlu1 %2308 }
 0xc9b   : > { %6473 = vmatpush3.xpose.msk.msra.mxu1 %vm504_vm2, %v2182_v48  ;;  %6493 = vmatprep.subr.mxu0 %v2311_v16 }
 0xc9c   : > { %6474 = vmatprep.subr.msk.mxu1 %vm504_vm2, %v2180_v4  ;;  %6494 = vmatpush3.msra.mxu0 %v2311_v16 }
 0xc9d   : > { %6495 = vmatprep.subr.mxu0 %v2309_v18 }
 0xc9e   : > { %6496 = vmatpush3.msra.mxu0 %v2309_v18 }
 0xc9f   : > { %6475 = vmatpush3.xpose.msk.msra.mxu1 %vm504_vm2, %v2180_v4 }
 0xca0   : > { %6476 = vmatprep.subr.msk.mxu1 %vm504_vm2, %v2178_v5 }
 0xca3   : > { %6477 = vmatpush3.xpose.msk.msra.mxu1 %vm504_vm2, %v2178_v5 }
 0xca4   : > { %6478 = vmatprep.subr.msk.mxu1 %vm504_vm2, %v2176_v52 }
 0xca7   : > { %6479 = vmatpush3.xpose.msk.msra.mxu1 %vm504_vm2, %v2176_v52 }
 0xcaa   : > { %6481 = vmatmul.mubr.msk.f32.vlgmr.msra.gmra.mxu1 %vm504_vm2, %v2174_v59  ;;  %v2041_v59 = vsel %vm1805_vm7, %v7778_v53, 0.0 }
 0xd4a   : > { %v7801_v13 = vpop.f32.mrf.mxu1 }
 0xd4c   : > { %v7803_v23 = vpop.f32.mrf.mxu1 }
 0xd6a   : > { %v6482_v24 = vpop.f32.mrf.mxu1 }
 0xd6b   : > { %v2289_v25 = vsel %vm1805_vm7, %v6482_v24, -inf }
 0xd6c   : > { %2290 = vmax.xlane.f32.xlu0 %v2289_v25  ;;  %v2277_v11 = vpop.f32.mrf.mxu1 }
 0xd6d   : > { %v2286_v31 = vsel %vm1805_vm7, %v2277_v11, -inf }
 0xd6e   : > { %2287 = vmax.xlane.f32.xlu1 %v2286_v31 }
 0xd7f   : > { %2441 = vrot.lane.b32.xlu1 %v7558_v6, %s8710_s14 }
 0xd82   : > { %2306 = vrot.lane.b32.xlu0 %v7663_v30, %s8712_s8  ;;  %s8727_s8 = smov 72  }
 0xd83   : > { %2437 = vrot.lane.b32.xlu1 %v7566_v7, %s8710_s14 }
 0xd86   : > { %2439 = vrot.lane.b32.xlu0 %v7556_v39, %s8710_s14 }
 0xd87   : > { %2433 = vrot.lane.b32.xlu1 %v7576_v42, %s8710_s14 }
 0xd8a   : > { %2435 = vrot.lane.b32.xlu0 %v7570_v41, %s8710_s14 }
 0xd8b   : > { %2429 = vrot.lane.b32.xlu1 %v7588_v45, %s8710_s14 }
 0xd8e   : > { %2431 = vrot.lane.b32.xlu0 %v7582_v43, %s8710_s14 }
 0xd8f   : > { %2423 = vrot.lane.b32.xlu1 %v7628_v1, %s8710_s14 }
 0xd92   : > { %2427 = vrot.lane.b32.xlu0 %v7594_v46, %s8710_s14 }
 0xd93   : > { %2570 = vrot.lane.b32.xlu1 %v7639_v26, %s8710_s14 }
 0xd96   : > { %2425 = vrot.lane.b32.xlu0 %v7632_v12, %s8710_s14 }
 0xd97   : > { %2568 = vrot.lane.b32.xlu1 %v7644_v27, %s8710_s14 }
 0xd9a   : > { %2572 = vrot.lane.b32.xlu0 %v7641_v10, %s8710_s14 }
 0xd9b   : > { %2564 = vrot.lane.b32.xlu1 %v7651_v28, %s8710_s14 }
 0xd9e   : > { %2566 = vrot.lane.b32.xlu0 %v7647_v19, %s8710_s14 }
 0xda2   : > { %2562 = vrot.lane.b32.xlu0 %v7655_v29, %s8710_s14 }
 0xdf5   : > { %v2291_v39 = vpop.xlane.xlu0 %2290 }
 0xdf6   : > { %v2293_v6 = vsub.f32 %v6482_v24, %v2291_v39  ;;  %v1821_v39 = vsel %vm1805_vm7, %v7710_v60, 0.0 }
 0xdf7   : > { %v2288_v7 = vpop.xlane.xlu1 %2287 }
 0xdf8   : > { %v2292_v41 = vsub.f32 %v2277_v11, %v2288_v7  ;;  %v2296_v42 = vmul.f32 1.442695, %v2293_v6  ;;  %v1818_v6 = vsel %vm1805_vm7, %v7708_v57, 0.0 }
 0xdf9   : > { %v2307_v43 = vpop.permute.xlu0 %2306 }
 0xdfa   : > { %v2294_v45 = vmul.f32 1.442695, %v2292_v41  ;;  %6497 = vmatprep.subr.mxu0 %v2307_v43 }
 0xdfb   : > { %6498 = vmatpush3.msra.mxu0 %v2307_v43  ;;  %v2442_v46 = vpop.permute.xlu1 %2441 }
 0xdfc   : > { %6986 = vpow2.f32 %v2294_v45  ;;  %6502 = vmatprep.subr.msk.mxu0 %vm504_vm2, %v2442_v46 }
 0xdfd   : > { %6988 = vpow2.f32 %v2296_v42  ;;  %v2440_v1 = vpop.permute.xlu0 %2439 }
 0xdff   : > { %v2438_v12 = vpop.permute.xlu1 %2437 }
 0xe01   : > { %v2436_v26 = vpop.permute.xlu0 %2435 }
 0xe03   : > { %v2434_v10 = vpop.permute.xlu1 %2433 }
 0xe05   : > { %v2432_v27 = vpop.permute.xlu0 %2431 }
 0xe07   : > { %v2430_v19 = vpop.permute.xlu1 %2429 }
 0xe09   : > { %v6987_v28 = vpop.eup %6986  ;;  %v2428_v29 = vpop.permute.xlu0 %2427 }
 0xe0a   : > { %v6989_v32 = vpop.eup %6988  ;;  %6499 = vmatprep.mubr.msk.f32.mxu0 %vm1805_vm7, %v6987_v28  ;;  %v2298_v62 = vsel %vm1805_vm7, %v6987_v28, 0.0 }
 0xe0b   : > { %6500 = vmatmul.mubr.msk.f32.vlgmr.msra.gmra.mxu0 %vm1805_vm7, %v6989_v32  ;;  %v2424_v33 = vpop.permute.xlu1 %2423  ;;  %v2301_v2 = vsel %vm1805_vm7, %v6989_v32, 0.0 }
 0xe0c   : > { %6503 = vmatpush3.xpose.msk.msra.mxu0 %vm504_vm2, %v2442_v46  ;;  %6518 = vmatprep.mubr.msk.f32.mxu0 %vm504_vm2, %v2424_v33 }
 0xe0d   : > { %6504 = vmatprep.subr.msk.mxu0 %vm504_vm2, %v2440_v1  ;;  %v2426_v34 = vpop.permute.xlu0 %2425 }
 0xe0f   : > { %v2571_v35 = vpop.permute.xlu1 %2570 }
 0xe10   : > { %6505 = vmatpush3.xpose.msk.msra.mxu0 %vm504_vm2, %v2440_v1 }
 0xe11   : > { %6506 = vmatprep.subr.msk.mxu0 %vm504_vm2, %v2438_v12  ;;  %v2573_v36 = vpop.permute.xlu0 %2572 }
 0xe12   : > { %6521 = vmatprep.subr.mxu1 %v2573_v36 }
 0xe13   : > { %6522 = vmatpush3.msra.mxu1 %v2573_v36  ;;  %v2569_v37 = vpop.permute.xlu1 %2568 }
 0xe14   : > { %6507 = vmatpush3.xpose.msk.msra.mxu0 %vm504_vm2, %v2438_v12  ;;  %6523 = vmatprep.subr.mxu1 %v2571_v35 }
 0xe15   : > { %6508 = vmatprep.subr.msk.mxu0 %vm504_vm2, %v2436_v26  ;;  %v2567_v38 = vpop.permute.xlu0 %2566  ;;  %6524 = vmatpush3.msra.mxu1 %v2571_v35 }
 0xe16   : > { %6525 = vmatprep.subr.mxu1 %v2569_v37 }
 0xe17   : > { %6526 = vmatpush3.msra.mxu1 %v2569_v37  ;;  %v2565_v40 = vpop.permute.xlu1 %2564 }
 0xe18   : > { %6509 = vmatpush3.xpose.msk.msra.mxu0 %vm504_vm2, %v2436_v26  ;;  %6527 = vmatprep.subr.mxu1 %v2567_v38 }
 0xe19   : > { %6510 = vmatprep.subr.msk.mxu0 %vm504_vm2, %v2434_v10  ;;  %6528 = vmatpush3.msra.mxu1 %v2567_v38  ;;  %v2563_v47 = vpop.permute.xlu0 %2562 }
 0xe1a   : > { %6529 = vmatprep.subr.mxu1 %v2565_v40 }
 0xe1b   : > { %6530 = vmatpush3.msra.mxu1 %v2565_v40 }
 0xe1c   : > { %6511 = vmatpush3.xpose.msk.msra.mxu0 %vm504_vm2, %v2434_v10  ;;  %6531 = vmatprep.subr.mxu1 %v2563_v47 }
 0xe1d   : > { %6512 = vmatprep.subr.msk.mxu0 %vm504_vm2, %v2432_v27  ;;  %6532 = vmatpush3.msra.mxu1 %v2563_v47 }
 0xe20   : > { %6513 = vmatpush3.xpose.msk.msra.mxu0 %vm504_vm2, %v2432_v27 }
 0xe21   : > { %6514 = vmatprep.subr.msk.mxu0 %vm504_vm2, %v2430_v19 }
 0xe24   : > { %6515 = vmatpush3.xpose.msk.msra.mxu0 %vm504_vm2, %v2430_v19 }
 0xe25   : > { %6516 = vmatprep.subr.msk.mxu0 %vm504_vm2, %v2428_v29 }
 0xe28   : > { %6517 = vmatpush3.xpose.msk.msra.mxu0 %vm504_vm2, %v2428_v29 }
 0xe29   : > { %6548 = vmatprep.subr.bf16.mxu0 %v7158_v0 }
 0xe2b   : > { %6519 = vmatmul.mubr.msk.f32.vlgmr.msra.gmra.mxu0 %vm504_vm2, %v2426_v34 }
 0xe2c   : > { %6552 = vmatprep.mubr.msk.bf16.mxu0 %vm7159_vm0, %v7158_v0 }
 0xecb   : > { %v7864_v44 = vpop.f32.mrf.mxu0 }
 0xecd   : > { %v2402_v48 = vpop.f32.mrf.mxu0 }
 0xeeb   : > { %v6520_v4 = vpop.f32.mrf.mxu0 }
 0xeec   : > { %v2541_v5 = vsel %vm1805_vm7, %v6520_v4, -inf }
 0xeed   : > { %2542 = vmax.xlane.f32.xlu0 %v2541_v5  ;;  %v2529_v52 = vpop.f32.mrf.mxu0 }
 0xeee   : > { %v2538_v56 = vsel %vm1805_vm7, %v2529_v52, -inf }
 0xeef   : > { %2539 = vmax.xlane.f32.xlu1 %v2538_v56 }
 0xf00   : > { %2560 = vrot.lane.b32.xlu1 %v7659_v22, %s8710_s14 }
 0xf03   : > { %2558 = vrot.lane.b32.xlu0 %v7663_v30, %s8710_s14  ;;  %s8724_s14 = smov 64  }
 0xf22   : > { %2042 = vadd.xlane.f32.xlu0 %v2041_v59 }
 0xf24   : > { %2039 = vadd.xlane.f32.xlu1 %v2038_v63 }
 0xf26   : > { %2299 = vadd.xlane.f32.xlu0 %v2298_v62 }
 0xf28   : > { %2302 = vadd.xlane.f32.xlu1 %v2301_v2 }
 0xf76   : > { %v2543_v61 = vpop.xlane.xlu0 %2542 }
 0xf77   : > { %v2545_v9 = vsub.f32 %v6520_v4, %v2543_v61  ;;  %v6920_v4 = vld [vmem:[%s8692_s4 + $0x1c] ss:$12 sps:$4 sm:$0xff]   ;;  %v5793_v61 = vld [vmem:[%s8694_s6 + $0x7] ss:$0 sm:$0xff] }
 0xf78   : > { %v2540_v22 = vpop.xlane.xlu1 %2539 }
 0xf79   : > { %v2548_v16 = vmul.f32 1.442695, %v2545_v9  ;;  %v2544_v18 = vsub.f32 %v2529_v52, %v2540_v22 }
 0xf7a   : > { %v2559_v53 = vpop.permute.xlu0 %2558 }
 0xf7b   : > { %6990 = vpow2.f32 %v2548_v16  ;;  %v2546_v30 = vmul.f32 1.442695, %v2544_v18 }
 0xf7c   : > { %v2561_v24 = vpop.permute.xlu1 %2560 }
 0xf7d   : > { %6992 = vpow2.f32 %v2546_v30  ;;  %6533 = vmatprep.subr.mxu1 %v2561_v24 }
 0xf7e   : > { %6534 = vmatpush3.msra.mxu1 %v2561_v24 }
 0xf7f   : > { %6535 = vmatprep.subr.mxu1 %v2559_v53 }
 0xf80   : > { %6536 = vmatpush3.msra.mxu1 %v2559_v53 }
 0xf81   : > { %6540 = vmatprep.subr.bf16.mxu1 %v7158_v0 }
 0xf88   : > { %v6991_v51 = vpop.eup %6990 }
 0xf89   : > { %v2553_v25 = vsel %vm1805_vm7, %v6991_v51, 0.0 }
 0xf8a   : > { %v6993_v11 = vpop.eup %6992  ;;  %2554 = vadd.xlane.f32.xlu1 %v2553_v25 }
 0xf8b   : > { %6537 = vmatprep.mubr.msk.f32.mxu1 %vm1805_vm7, %v6993_v11  ;;  %v2550_v31 = vsel %vm1805_vm7, %v6993_v11, 0.0 }
 0xf8c   : > { %2551 = vadd.xlane.f32.xlu0 %v2550_v31  ;;  %6538 = vmatmul.mubr.msk.f32.vlgmr.msra.gmra.mxu1 %vm1805_vm7, %v6991_v51 }
 0xf8d   : > { %6544 = vmatprep.mubr.msk.bf16.mxu1 %vm7159_vm0, %v7158_v0 }
 0xf8e   : > { %1822 = vadd.xlane.f32.xlu1 %v1821_v39 }
 0xf90   : > { %1819 = vadd.xlane.f32.xlu0 %v1818_v6 }
 0xfab   : > { %v2043_v7 = vpop.xlane.xlu0 %2042 }
 0xfac   : > { %6994 = vrcp.f32 %v2043_v7 }
 0xfad   : > { %v2040_v41 = vpop.xlane.xlu1 %2039 }
 0xfae   : > { %6996 = vrcp.f32 %v2040_v41 }
 0xfaf   : > { %v2300_v42 = vpop.xlane.xlu0 %2299 }
 0xfb0   : > { %6998 = vrcp.f32 %v2300_v42 }
 0xfb1   : > { %v2303_v43 = vpop.xlane.xlu1 %2302 }
 0xfb2   : > { %7000 = vrcp.f32 %v2303_v43 }
 0xfb9   : > { %v6995_v45 = vpop.eup %6994 }
 0xfba   : > { %v2160_v46 = vmul.f32 %v6995_v45, %v7801_v13 }
 0xfbb   : > { %v6997_v60 = vpop.eup %6996 }
 0xfbc   : > { %2165 = vrot.lane.b32.xlu1 %v2160_v46, %s8708_s15  ;;  %v2159_v1 = vmul.f32 %v6997_v60, %v7803_v23  ;;  %v6923_v60 = vld [vmem:[%s8692_s4 + $0x8] ss:$12 sps:$4 sm:$0xff]  }
 0xfbd   : > { %v6999_v12 = vpop.eup %6998 }
 0xfbe   : > { %2163 = vrot.lane.b32.xlu0 %v2159_v1, %s8708_s15  ;;  %v2411_v57 = vmul.f32 %v6999_v12, %v2402_v48  ;;  %v6921_v48 = vld [vmem:[%s8692_s4 + $0x4] ss:$12 sps:$4 sm:$0xff]   ;;  %v6924_v1 = vld [vmem:[%s8693_s5 + $0x18] sm:$0xff]  }
 0xfbf   : > { %v7001_v26 = vpop.eup %7000 }
 0xfc0   : > { %2415 = vrot.lane.b32.xlu1 %v2411_v57, %s8720_s22  ;;  %v2412_v10 = vmul.f32 %v7001_v26, %v7864_v44 }
 0xfc2   : > { %2417 = vrot.lane.b32.xlu0 %v2412_v10, %s8720_s22 }
0x1013   : > { %v2555_v27 = vpop.xlane.xlu1 %2554 }
0x1015   : > { %v2552_v19 = vpop.xlane.xlu0 %2551 }
0x1017   : > { %v1823_v28 = vpop.xlane.xlu1 %1822 }
0x1018   : > { %7002 = vrcp.f32 %v1823_v28 }
0x1019   : > { %v1820_v13 = vpop.xlane.xlu0 %1819 }
0x101a   : > { %7004 = vrcp.f32 %v1820_v13 }
0x101b   : > { %7006 = vrcp.f32 %v2555_v27 }
0x101c   : > { %7008 = vrcp.f32 %v2552_v19 }
0x1025   : > { %v7003_v29 = vpop.eup %7002 }
0x1026   : > { %v1908_v23 = vmul.f32 %v7003_v29, %v7733_v20  ;;  %v5797_v29 = vld [vmem:[%s8694_s6 + $0xb] ss:$0 sm:$0xff] }
0x1027   : > { %v7005_v32 = vpop.eup %7004 }
0x1028   : > { %1910 = vst.msk [vmem:[#allocation2 + $0x8] sm:$0xff] %vm504_vm2, %v1908_v23  ;;  %v1907_v33 = vmul.f32 %v7005_v32, %v7735_v21  ;;  %v7007_v20 = vpop.eup %7006 }
0x1029   : > { %v7009_v21 = vpop.eup %7008 }
0x102a   : > { %1909 = vst.msk [vmem:[#allocation2] sm:$0xff] %vm504_vm2, %v1907_v33 }
0x102e   : > { %v2166_v34 = vpop.permute.xlu1 %2165 }
0x102f   : > { %2170 = vst.msk [vmem:[#allocation2 + $0x8] sm:$0xff] %vm906_vm4, %v2166_v34  ;;  %v5798_v34 = vld [vmem:[%s8694_s6 + $0xe] ss:$0 sm:$0xff] }
0x1030   : > { %v2164_v35 = vpop.permute.xlu0 %2163 }
0x1031   : > { %2169 = vst.msk [vmem:[#allocation2] sm:$0xff] %vm906_vm4, %v2164_v35 }
0x1032   : > { %v2416_v36 = vpop.permute.xlu1 %2415 }
0x1033   : > { %2421 = vst.msk [vmem:[#allocation2] sm:$0xff] %vm1117_vm5, %v2416_v36 }
0x1034   : > { %v2418_v37 = vpop.permute.xlu0 %2417 }
0x1035   : > { %2422 = vst.msk [vmem:[#allocation2 + $0x8] sm:$0xff] %vm1117_vm5, %v2418_v37 }
0x104c   : > { %v6539_v38 = vpop.f32.mrf.mxu1 }
0x104d   : > { %v2664_v40 = vmul.f32 %v7007_v20, %v6539_v38  ;;  %v6925_v38 = vld [vmem:[%s8693_s5 + $0x10] sm:$0xff]  }
0x104e   : > { %v2654_v47 = vpop.f32.mrf.mxu1 }
0x104f   : > { %v2663_v44 = vmul.f32 %v7009_v21, %v2654_v47  ;;  %2669 = vrot.lane.b32.xlu0 %v2664_v40, %s8721_s20  ;;  %v6926_v40 = vld [vmem:[%s8693_s5 + $0x8] sm:$0xff]   ;;  %v6927_v21 = vld [vmem:[%s8693_s5] sm:$0xff]  }
0x1050   : > { %v5799_v47 = vld [vmem:[%s8694_s6 + $0x8] ss:$0 sm:$0xff] }
0x1051   : > { %2667 = vrot.lane.b32.xlu1 %v2663_v44, %s8721_s20 }
0x1053   : > { %2697 = vrot.lane.b32.xlu0 %v6921_v48, %s8722_s9 }
0x1055   : > { %2699 = vrot.lane.b32.xlu1 %v6920_v4, %s8722_s9 }
0x10c1   : > { %v2670_v5 = vpop.permute.xlu0 %2669 }
0x10c2   : > { %2674 = vst.msk [vmem:[#allocation2 + $0x8] sm:$0xff] %vm1328_vm6, %v2670_v5 }
0x10c3   : > { %v2668_v52 = vpop.permute.xlu1 %2667 }
0x10c4   : > { %2673 = vst.msk [vmem:[#allocation2] sm:$0xff] %vm1328_vm6, %v2668_v52 }
0x10c5   : > { %v2698_v59 = vpop.permute.xlu0 %2697 }
0x10c7   : > { %v2700_v56 = vpop.permute.xlu1 %2699 }
0x10c8   : > { %6541 = vmatpush3.bf16.msra.mxu1 %v2700_v56 }
0x10c9   : > { %6542 = vmatprep.subr.bf16.mxu1 %v7158_v0  ;;  %v2676_v62 = vld [vmem:[#allocation2 + $0x8] sm:$0xff] }
0x10cb   : > { %v2675_v63 = vld [vmem:[#allocation2] sm:$0xff] }
0x10cc   : > { %6543 = vmatpush3.bf16.msra.mxu1 %v2698_v59  ;;  %v2681_v2 = vpack.c.bf16 %v2676_v62, %v2675_v63 }
0x10cd   : > { %6556 = vmatprep.subr.bf16.mxu1 %v7158_v0 }
0x10cf   : > { %6545 = vmatmul.mubr.msk.bf16.vlgmr.msra.gmra.mxu1 %vm377_vm1, %v2681_v2  ;;  %v5803_v2 = vld [vmem:[%s8694_s6 + $0x9] ss:$0 sm:$0xff] }
0x10d0   : > { %6564 = vmatprep.mubr.msk.bf16.mxu1 %vm7159_vm0, %v7158_v0  ;;  %6557 = vmatpush3.bf16.msra.mxu1 %v6924_v1 }
0x10d1   : > { %6558 = vmatprep.subr.bf16.mxu1 %v7158_v0 }
0x10d4   : > { %6559 = vmatpush3.bf16.msra.mxu1 %v6925_v38  ;;  %v8001_v38 = vld [vmem:[%s7287_s13 + $0x8] sm:$0xff] }
0x10d5   : > { %6560 = vmatprep.subr.bf16.mxu1 %v7158_v0 }
0x10d8   : > { %6561 = vmatpush3.bf16.msra.mxu1 %v6926_v40 }
0x10d9   : > { %6562 = vmatprep.subr.bf16.mxu1 %v7158_v0 }
0x10dc   : > { %6563 = vmatpush3.bf16.msra.mxu1 %v6927_v21 }
0x118f   : > { %v2740_v9 = vpop.f32.mrf.mxu1 }
0x1190   : > { %v2741_v22 = vadd.f32 %v5793_v61, %v2740_v9 }
0x1191   : > { %v6546_v16 = vpop.f32.mrf.mxu1 }
0x1192   : > { %v2749_v18 = vadd.f32 %v2741_v22, %v7544_v17 }
0x1193   : > { %v2743_v30 = vpop.f32.mrf.mxu1 }
0x1194   : > { %v2744_v24 = vadd.f32 %v5793_v61, %v2743_v30  ;;  %v2751_v53 = vsel %vm377_vm1, %v2749_v18, 0.0 }
0x1195   : > { %2752 = vadd.xlane.f32.xlu1 %v2751_v53  ;;  %v6547_v51 = vpop.f32.mrf.mxu1 }
0x1196   : > { %v2750_v25 = vadd.f32 %v2744_v24, %v7546_v15  ;;  %v6922_v15 = vld [vmem:[%s8692_s4 + $0x20] ss:$12 sps:$4 sm:$0xff]  }
0x1197   : > { %6549 = vmatpush3.bf16.msra.mxu0 %v6922_v15  ;;  %v6929_v15 = vld [vmem:[%s8692_s4 + $0x30] ss:$12 sps:$4 sm:$0xff]  }
0x1198   : > { %v2754_v11 = vsel %vm377_vm1, %v2750_v25, 0.0  ;;  %6550 = vmatprep.subr.bf16.mxu0 %v7158_v0 }
0x1199   : > { %2755 = vadd.xlane.f32.xlu0 %v2754_v11 }
0x119b   : > { %6551 = vmatpush3.bf16.msra.mxu0 %v6923_v60  ;;  %v5821_v60 = vld [vmem:[%s8694_s6 + $0x11] ss:$0 sm:$0xff] }
0x119c   : > { %6568 = vmatprep.subr.bf16.mxu0 %v7158_v0 }
0x121e   : > { %v2753_v31 = vpop.xlane.xlu1 %2752 }
0x121f   : > { %v2757_v39 = vmul.f32 0.03125, %v2753_v31 }
0x1221   : > { %v2759_v6 = vsub.f32 %v2749_v18, %v2757_v39 }
0x1222   : > { %v2756_v7 = vpop.xlane.xlu0 %2755 }
0x1223   : > { %v2758_v41 = vmul.f32 0.03125, %v2756_v7  ;;  %v2761_v42 = vmul.f32 %v2759_v6, %v2759_v6 }
0x1225   : > { %v2760_v43 = vsub.f32 %v2750_v25, %v2758_v41  ;;  %v2763_v17 = vsel %vm377_vm1, %v2761_v42, 0.0 }
0x1226   : > { %2764 = vadd.xlane.f32.xlu0 %v2763_v17 }
0x1227   : > { %v2762_v45 = vmul.f32 %v2760_v43, %v2760_v43 }
0x1229   : > { %v2766_v46 = vsel %vm377_vm1, %v2762_v45, 0.0 }
0x122a   : > { %2767 = vadd.xlane.f32.xlu1 %v2766_v46  ;;  %v6928_v46 = vld [vmem:[%s8692_s4 + $0x48] ss:$12 sps:$4 sm:$0xff]  }
0x12af   : > { %v2765_v12 = vpop.xlane.xlu0 %2764 }
0x12b0   : > { %v2769_v57 = vmul.f32 0.03125, %v2765_v12 }
0x12b2   : > { %v2771_v26 = vadd.f32 1e-05, %v2769_v57 }
0x12b3   : > { %v2768_v10 = vpop.xlane.xlu1 %2767 }
0x12b4   : > { %7010 = vrsqrt.f32 %v2771_v26  ;;  %v2770_v27 = vmul.f32 0.03125, %v2768_v10 }
0x12b6   : > { %v2772_v19 = vadd.f32 1e-05, %v2770_v27 }
0x12b8   : > { %7012 = vrsqrt.f32 %v2772_v19 }
0x12c1   : > { %v7011_v28 = vpop.eup %7010 }
0x12c2   : > { %v2775_v13 = vmul.f32 %v7011_v28, %v2759_v6  ;;  %v5809_v28 = vld [vmem:[%s8694_s6 + $0xc] ss:$0 sm:$0xff] }
0x12c4   : > { %v2781_v33 = vmul.f32 %v5797_v29, %v2775_v13 }
0x12c5   : > { %v7013_v23 = vpop.eup %7012 }
0x12c6   : > { %v2776_v32 = vmul.f32 %v7013_v23, %v2760_v43  ;;  %v2787_v36 = vadd.f32 %v5798_v34, %v2781_v33 }
0x12c8   : > { %v2782_v35 = vmul.f32 %v5797_v29, %v2776_v32  ;;  %v5810_v32 = vld [vmem:[%s8694_s6 + $0xf] ss:$0 sm:$0xff] }
0x12ca   : > { %v2788_v37 = vadd.f32 %v5798_v34, %v2782_v35 }
0x12cc   : > { %v2793_v20 = vpack.c.bf16 %v2788_v37, %v2787_v36 }
0x12ce   : > { %6553 = vmatmul.mubr.msk.bf16.vlgmr.msra.gmra.mxu0 %vm377_vm1, %v2793_v20 }
0x12cf   : > { %6572 = vmatprep.mubr.msk.bf16.mxu0 %vm7159_vm0, %v7158_v0  ;;  %6569 = vmatpush3.bf16.msra.mxu0 %v6928_v46 }
0x12d0   : > { %6570 = vmatprep.subr.bf16.mxu0 %v7158_v0 }
0x12d3   : > { %6571 = vmatpush3.bf16.msra.mxu0 %v6929_v15 }
0x12d4   : > { %6576 = vmatprep.subr.bf16.mxu0 %v7158_v0 }
0x138e   : > { %v2848_v44 = vpop.f32.mrf.mxu0 }
0x138f   : > { %v2849_v4 = vadd.f32 %v5799_v47, %v2848_v44 }
0x1390   : > { %v6554_v48 = vpop.f32.mrf.mxu0 }
0x1391   : > { %v2855_v59 = vmax.f32 %v2849_v4, 0.0 }
0x1392   : > { %v2851_v5 = vpop.f32.mrf.mxu0 }
0x1393   : > { %v2852_v52 = vadd.f32 %v5799_v47, %v2851_v5  ;;  %v5819_v47 = vld [vmem:[%s8694_s6 + $0x10] ss:$0 sm:$0xff] }
0x1394   : > { %v6555_v56 = vpop.f32.mrf.mxu0 }
0x1395   : > { %v2856_v63 = vmax.f32 %v2852_v52, 0.0 }
0x1397   : > { %v2865_v62 = vpack.c.bf16 %v2856_v63, %v2855_v59 }
0x1399   : > { %6565 = vmatmul.mubr.msk.bf16.vlgmr.msra.gmra.mxu1 %vm1805_vm7, %v2865_v62 }
0x1459   : > { %v2932_v61 = vpop.f32.mrf.mxu1 }
0x145a   : > { %v2933_v9 = vadd.f32 %v5803_v2, %v2932_v61 }
0x145b   : > { %v6566_v22 = vpop.f32.mrf.mxu1 }
0x145c   : > { %v2941_v16 = vadd.f32 %v2933_v9, %v2787_v36 }
0x145d   : > { %v2935_v18 = vpop.f32.mrf.mxu1 }
0x145e   : > { %v2936_v30 = vadd.f32 %v5803_v2, %v2935_v18  ;;  %v2943_v24 = vsel %vm377_vm1, %v2941_v16, 0.0 }
0x145f   : > { %2944 = vadd.xlane.f32.xlu0 %v2943_v24  ;;  %v6567_v53 = vpop.f32.mrf.mxu1 }
0x1460   : > { %v2942_v51 = vadd.f32 %v2936_v30, %v2788_v37  ;;  %v7996_v37 = vld [vmem:[%s7287_s13] sm:$0xff]  ;;  %s8723_s13 = smov 88  }
0x1462   : > { %v2946_v25 = vsel %vm377_vm1, %v2942_v51, 0.0 }
0x1463   : > { %2947 = vadd.xlane.f32.xlu1 %v2946_v25 }
0x14e8   : > { %v2945_v11 = vpop.xlane.xlu0 %2944 }
0x14e9   : > { %v2949_v31 = vmul.f32 0.03125, %v2945_v11 }
0x14eb   : > { %v2951_v39 = vsub.f32 %v2941_v16, %v2949_v31 }
0x14ec   : > { %v2948_v6 = vpop.xlane.xlu1 %2947 }
0x14ed   : > { %v2950_v7 = vmul.f32 0.03125, %v2948_v6  ;;  %v2953_v41 = vmul.f32 %v2951_v39, %v2951_v39 }
0x14ef   : > { %v2952_v42 = vsub.f32 %v2942_v51, %v2950_v7  ;;  %v2955_v43 = vsel %vm377_vm1, %v2953_v41, 0.0 }
0x14f0   : > { %2956 = vadd.xlane.f32.xlu0 %v2955_v43 }
0x14f1   : > { %v2954_v17 = vmul.f32 %v2952_v42, %v2952_v42 }
0x14f3   : > { %v2958_v45 = vsel %vm377_vm1, %v2954_v17, 0.0 }
0x14f4   : > { %2959 = vadd.xlane.f32.xlu1 %v2958_v45  ;;  %v5823_v45 = vld [vmem:[%s8694_s6 + $0x12] ss:$0 sm:$0xff] }
0x1506   : > { %3061 = vrot.lane.b32.xlu0 %v5821_v60, %s8722_s9 }
0x1579   : > { %v2957_v1 = vpop.xlane.xlu0 %2956 }
0x157a   : > { %v2961_v12 = vmul.f32 0.03125, %v2957_v1 }
0x157c   : > { %v2963_v57 = vadd.f32 1e-05, %v2961_v12 }
0x157d   : > { %v2960_v26 = vpop.xlane.xlu1 %2959  ;;  %v3062_v52 = vpop.permute.xlu0 %3061 }
0x157e   : > { %7014 = vrsqrt.f32 %v2963_v57  ;;  %v2962_v10 = vmul.f32 0.03125, %v2960_v26 }
0x1580   : > { %v2964_v27 = vadd.f32 1e-05, %v2962_v10 }
0x1582   : > { %7016 = vrsqrt.f32 %v2964_v27 }
0x158b   : > { %v7015_v19 = vpop.eup %7014 }
0x158c   : > { %v2967_v13 = vmul.f32 %v7015_v19, %v2951_v39 }
0x158e   : > { %v2973_v29 = vmul.f32 %v5809_v28, %v2967_v13 }
0x158f   : > { %v7017_v23 = vpop.eup %7016 }
0x1590   : > { %v2968_v33 = vmul.f32 %v7017_v23, %v2952_v42  ;;  %v7991_v35 = vadd.f32 %v5810_v32, %v2973_v29 }
0x1592   : > { %v2974_v34 = vmul.f32 %v5809_v28, %v2968_v33  ;;  %v2981_v20 = vadd.f32 %v7996_v37, %v7991_v35 }
0x1594   : > { %v7993_v36 = vadd.f32 %v5810_v32, %v2974_v34 }
0x1596   : > { %v2982_v40 = vadd.f32 %v8001_v38, %v7993_v36  ;;  %v3066_v25 = vpack.c.bf16 %v7993_v36, %v7991_v35 }
0x1598   : > { %v2988_v21 = vpack.c.bf16 %v2982_v40, %v2981_v20 }
0x159a   : > { %6573 = vmatmul.mubr.msk.bf16.vlgmr.msra.gmra.mxu0 %vm377_vm1, %v2988_v21 }
0x159b   : > { %6580 = vmatprep.mubr.msk.bf16.mxu0 %vm7159_vm0, %v7158_v0 }
0x165a   : > { %v3038_v44 = vpop.f32.mrf.mxu0 }
0x165b   : > { %v3051_v48 = vadd.f32 %v5819_v47, %v3038_v44  ;;  %v8021_v62 = vadd.f32 %v3062_v52, %v3038_v44 }
0x165c   : > { %v6574_v4 = vpop.f32.mrf.mxu0 }
0x165d   : > { %v8011_v5 = vmul.f32 0.35355338, %v3051_v48 }
0x165e   : > { %v3041_v56 = vpop.f32.mrf.mxu0 }
0x165f   : > { %v8013_v59 = vadd.f32 %v3062_v52, %v3041_v56  ;;  %6588 = vmatprep.mubr.msk.f32.mxu1 %vm504_vm2, %v8011_v5  ;;  %v3052_v2 = vadd.f32 %v5819_v47, %v3041_v56 }
0x1660   : > { %v6575_v63 = vpop.f32.mrf.mxu0 }
0x1661   : > { %3324 = vrot.lane.b32.xlu0 %v8013_v59, %s8723_s13  ;;  %3126 = vrot.lane.b32.xlu1 %v8013_v59, %s7161_s16  ;;  %v8030_v61 = vmul.f32 0.35355338, %v3052_v2 }
0x1665   : > { %3318 = vrot.lane.b32.xlu0 %v8011_v5, %s8716_s18  ;;  %3124 = vrot.lane.b32.xlu1 %v8021_v62, %s7161_s16 }
0x1669   : > { %3322 = vrot.lane.b32.xlu1 %v8021_v62, %s8723_s13  ;;  %3074 = vrot.lane.b32.xlu0 %v6928_v46, %s8724_s14 }
0x166d   : > { %3320 = vrot.lane.b32.xlu1 %v8030_v61, %s8716_s18 }
0x1671   : > { %3072 = vrot.lane.b32.xlu1 %v6929_v15, %s8724_s14 }
0x16d3   : > { %v3325_v9 = vpop.permute.xlu0 %3324  ;;  %v3127_v22 = vpop.permute.xlu1 %3126 }
0x16d4   : > { %6584 = vmatprep.subr.msk.mxu1 %vm504_vm2, %v3127_v22 }
0x16d5   : > { %6585 = vmatpush3.xpose.msk.msra.mxu1 %vm504_vm2, %v3127_v22 }
0x16d7   : > { %v3319_v16 = vpop.permute.xlu0 %3318  ;;  %v3125_v18 = vpop.permute.xlu1 %3124 }
0x16d8   : > { %6586 = vmatprep.subr.msk.mxu1 %vm504_vm2, %v3125_v18 }
0x16d9   : > { %6587 = vmatpush3.xpose.msk.msra.mxu1 %vm504_vm2, %v3125_v18 }
0x16da   : > { %6598 = vmatprep.subr.msk.mxu1 %vm504_vm2, %v3325_v9 }
0x16db   : > { %v3323_v30 = vpop.permute.xlu1 %3322  ;;  %v3075_v24 = vpop.permute.xlu0 %3074 }
0x16dc   : > { %6589 = vmatmul.mubr.msk.f32.vlgmr.msra.gmra.mxu1 %vm504_vm2, %v8030_v61  ;;  %6577 = vmatpush3.bf16.msra.mxu0 %v3075_v24 }
0x16dd   : > { %6599 = vmatpush3.xpose.msk.msra.mxu1 %vm504_vm2, %v3325_v9  ;;  %6602 = vmatprep.mubr.msk.f32.mxu1 %vm504_vm2, %v3319_v16 }
0x16de   : > { %6600 = vmatprep.subr.msk.mxu1 %vm504_vm2, %v3323_v30  ;;  %6578 = vmatprep.subr.bf16.mxu0 %v7158_v0 }
0x16df   : > { %v3321_v53 = vpop.permute.xlu1 %3320 }
0x16e1   : > { %6601 = vmatpush3.xpose.msk.msra.mxu1 %vm504_vm2, %v3323_v30 }
0x16e3   : > { %v3073_v51 = vpop.permute.xlu1 %3072 }
0x16e4   : > { %6579 = vmatpush3.bf16.msra.mxu0 %v3073_v51  ;;  %6603 = vmatmul.mubr.msk.f32.vlgmr.msra.gmra.mxu1 %vm504_vm2, %v3321_v53 }
0x16e7   : > { %6581 = vmatmul.mubr.msk.bf16.vlgmr.msra.gmra.mxu0 %vm377_vm1, %v3066_v25 }
0x179c   : > { %v6590_v11 = vpop.f32.mrf.mxu1 }
0x179d   : > { %v3216_v12 = vsel %vm590_vm3, %v6590_v11, -inf }
0x179e   : > { %v3204_v31 = vpop.f32.mrf.mxu1 }
0x179f   : > { %v3213_v39 = vsel %vm590_vm3, %v3204_v31, -inf }
0x17a0   : > { %3214 = vmax.xlane.f32.xlu0 %v3213_v39 }
0x17a4   : > { %v6604_v6 = vpop.f32.mrf.mxu1 }
0x17a5   : > { %v3412_v7 = vsel %vm590_vm3, %v6604_v6, -inf }
0x17a6   : > { %v3400_v41 = vpop.f32.mrf.mxu1  ;;  %3413 = vmax.xlane.f32.xlu0 %v3412_v7 }
0x17a7   : > { %v3115_v42 = vpop.f32.mrf.mxu0  ;;  %v3409_v17 = vsel %vm590_vm3, %v3400_v41, -inf }
0x17a8   : > { %v8059_v1 = vadd.f32 %v5823_v45, %v3115_v42 }
0x17a9   : > { %v6582_v43 = vpop.f32.mrf.mxu0 }
0x17aa   : > { %3410 = vmax.xlane.f32.xlu0 %v3409_v17 }
0x17ab   : > { %v3118_v46 = vpop.f32.mrf.mxu0 }
0x17ac   : > { %v8057_v15 = vadd.f32 %v5823_v45, %v3118_v46 }
0x17ad   : > { %v6583_v60 = vpop.f32.mrf.mxu0 }
0x17ae   : > { %3433 = vrot.lane.b32.xlu1 %v8057_v15, %s8716_s18  ;;  %6591 = vmatprep.subr.mxu0 %v8057_v15 }
0x17af   : > { %6592 = vmatpush3.msra.mxu0 %v8057_v15 }
0x17b0   : > { %6593 = vmatprep.subr.mxu0 %v8059_v1 }
0x17b1   : > { %6594 = vmatpush3.msra.mxu0 %v8059_v1 }
0x17c0   : > { %3431 = vrot.lane.b32.xlu0 %v8059_v1, %s8716_s18 }
0x17c4   : > { %3530 = vrot.lane.b32.xlu0 %v8011_v5, %s8725_s19 }
0x17c8   : > { %3643 = vrot.lane.b32.xlu0 %v8057_v15, %s8725_s19 }
0x17d2   : > { %3217 = vmax.xlane.f32.xlu1 %v3216_v12 }
0x17e3   : > { %3536 = vrot.lane.b32.xlu1 %v8013_v59, %s8726_s21 }
0x17e7   : > { %3534 = vrot.lane.b32.xlu1 %v8021_v62, %s8726_s21 }
0x17eb   : > { %3532 = vrot.lane.b32.xlu1 %v8030_v61, %s8725_s19 }
0x17ef   : > { %3641 = vrot.lane.b32.xlu1 %v8059_v1, %s8725_s19 }
0x1820   : > { %v3434_v57 = vpop.permute.xlu1 %3433 }
0x1821   : > { %6605 = vmatprep.subr.mxu0 %v3434_v57 }
0x1829   : > { %v3215_v26 = vpop.xlane.xlu0 %3214 }
0x182a   : > { %v3219_v10 = vsub.f32 %v3204_v31, %v3215_v26 }
0x182c   : > { %v3221_v27 = vmul.f32 1.442695, %v3219_v10 }
0x182e   : > { %7018 = vpow2.f32 %v3221_v27 }
0x182f   : > { %v3414_v19 = vpop.xlane.xlu0 %3413 }
0x1830   : > { %v3416_v20 = vsub.f32 %v6604_v6, %v3414_v19 }
0x1832   : > { %v3419_v48 = vmul.f32 1.442695, %v3416_v20 }
0x1833   : > { %v3411_v28 = vpop.xlane.xlu0 %3410 }
0x1834   : > { %v3415_v33 = vsub.f32 %v3400_v41, %v3411_v28 }
0x1836   : > { %v3417_v21 = vmul.f32 1.442695, %v3415_v33 }
0x1837   : > { %v3432_v13 = vpop.permute.xlu0 %3431 }
0x183b   : > { %v8082_v29 = vpop.eup %7018  ;;  %v3531_v23 = vpop.permute.xlu0 %3530 }
0x183c   : > { %6595 = vmatprep.mubr.msk.f32.mxu0 %vm590_vm3, %v8082_v29 }
0x183f   : > { %v3644_v32 = vpop.permute.xlu0 %3643 }
0x1840   : > { %6619 = vmatprep.subr.mxu1 %v3644_v32 }
0x1841   : > { %6620 = vmatpush3.msra.mxu1 %v3644_v32 }
0x185b   : > { %v3218_v34 = vpop.xlane.xlu1 %3217 }
0x185c   : > { %v3220_v40 = vsub.f32 %v6590_v11, %v3218_v34 }
0x185e   : > { %v3223_v47 = vmul.f32 1.442695, %v3220_v40 }
0x185f   : > { %v3537_v44 = vpop.permute.xlu1 %3536 }
0x1860   : > { %7020 = vpow2.f32 %v3223_v47 }
0x1861   : > { %7022 = vpow2.f32 %v3417_v21 }
0x1862   : > { %7024 = vpow2.f32 %v3419_v48  ;;  %v3225_v48 = vsel %vm590_vm3, %v8082_v29, 0.0 }
0x1863   : > { %v3535_v4 = vpop.permute.xlu1 %3534 }
0x1867   : > { %v3533_v52 = vpop.permute.xlu1 %3532 }
0x186b   : > { %v3642_v56 = vpop.permute.xlu1 %3641 }
0x186c   : > { %6621 = vmatprep.subr.mxu1 %v3642_v56 }
0x186d   : > { %v8086_v63 = vpop.eup %7020  ;;  %6622 = vmatpush3.msra.mxu1 %v3642_v56 }
0x186e   : > { %v8088_v2 = vpop.eup %7022  ;;  %6596 = vmatmul.mubr.msk.f32.vlgmr.msra.gmra.mxu0 %vm590_vm3, %v8086_v63 }
0x186f   : > { %6606 = vmatpush3.msra.mxu0 %v3434_v57  ;;  %6609 = vmatprep.mubr.msk.f32.mxu0 %vm590_vm3, %v8088_v2  ;;  %v7025_v9 = vpop.eup %7024  ;;  %v3421_v10 = vsel %vm590_vm3, %v8088_v2, 0.0 }
0x1870   : > { %6607 = vmatprep.subr.mxu0 %v3432_v13  ;;  %v3424_v26 = vsel %vm590_vm3, %v7025_v9, 0.0 }
0x1871   : > { %6608 = vmatpush3.msra.mxu0 %v3432_v13 }
0x1872   : > { %6612 = vmatprep.subr.msk.mxu0 %vm504_vm2, %v3537_v44  ;;  %6610 = vmatmul.mubr.msk.f32.vlgmr.msra.gmra.mxu0 %vm590_vm3, %v7025_v9 }
0x1873   : > { %6613 = vmatpush3.xpose.msk.msra.mxu0 %vm504_vm2, %v3537_v44  ;;  %6616 = vmatprep.mubr.msk.f32.mxu0 %vm504_vm2, %v3531_v23  ;;  %v3228_v44 = vsel %vm590_vm3, %v8086_v63, 0.0 }
0x1874   : > { %6614 = vmatprep.subr.msk.mxu0 %vm504_vm2, %v3535_v4 }
0x1877   : > { %6615 = vmatpush3.xpose.msk.msra.mxu0 %vm504_vm2, %v3535_v4 }
0x187a   : > { %6617 = vmatmul.mubr.msk.f32.vlgmr.msra.gmra.mxu0 %vm504_vm2, %v3533_v52 }
0x192e   : > { %v8101_v22 = vpop.f32.mrf.mxu0 }
0x1930   : > { %v8103_v16 = vpop.f32.mrf.mxu0 }
0x1932   : > { %v8105_v18 = vpop.f32.mrf.mxu0 }
0x1934   : > { %v8107_v30 = vpop.f32.mrf.mxu0 }
0x193a   : > { %v6618_v24 = vpop.f32.mrf.mxu0 }
0x193b   : > { %v3624_v53 = vsel %vm590_vm3, %v6618_v24, -inf }
0x193c   : > { %3625 = vmax.xlane.f32.xlu1 %v3624_v53  ;;  %v3612_v51 = vpop.f32.mrf.mxu0 }
0x193d   : > { %v3621_v25 = vsel %vm590_vm3, %v3612_v51, -inf }
0x193e   : > { %3622 = vmax.xlane.f32.xlu0 %v3621_v25 }
0x194d   : > { %3744 = vrot.lane.b32.xlu1 %v8021_v62, %s8727_s8 }
0x1951   : > { %3742 = vrot.lane.b32.xlu1 %v8030_v61, %s8728_s17 }
0x1954   : > { %3746 = vrot.lane.b32.xlu0 %v8013_v59, %s8727_s8  ;;  %s8730_s8 = smov 120  }
0x1958   : > { %3740 = vrot.lane.b32.xlu0 %v8011_v5, %s8728_s17 }
0x19c5   : > { %v3626_v11 = vpop.xlane.xlu1 %3625 }
0x19c6   : > { %v3628_v31 = vsub.f32 %v6618_v24, %v3626_v11 }
0x19c7   : > { %v3623_v39 = vpop.xlane.xlu0 %3622 }
0x19c8   : > { %v3627_v6 = vsub.f32 %v3612_v51, %v3623_v39  ;;  %v3631_v7 = vmul.f32 1.442695, %v3628_v31 }
0x19c9   : > { %v3745_v59 = vpop.permute.xlu1 %3744 }
0x19ca   : > { %v3629_v41 = vmul.f32 1.442695, %v3627_v6 }
0x19cb   : > { %v3747_v42 = vpop.permute.xlu0 %3746 }
0x19cc   : > { %7026 = vpow2.f32 %v3629_v41  ;;  %6626 = vmatprep.subr.msk.mxu1 %vm504_vm2, %v3747_v42 }
0x19cd   : > { %7028 = vpow2.f32 %v3631_v7  ;;  %v3743_v5 = vpop.permute.xlu1 %3742 }
0x19cf   : > { %v3741_v61 = vpop.permute.xlu0 %3740 }
0x19d9   : > { %v7027_v62 = vpop.eup %7026 }
0x19da   : > { %v7029_v43 = vpop.eup %7028  ;;  %6623 = vmatprep.mubr.msk.f32.mxu1 %vm590_vm3, %v7027_v62  ;;  %v3633_v27 = vsel %vm590_vm3, %v7027_v62, 0.0 }
0x19db   : > { %6624 = vmatmul.mubr.msk.f32.vlgmr.msra.gmra.mxu1 %vm590_vm3, %v7029_v43  ;;  %v3636_v19 = vsel %vm590_vm3, %v7029_v43, 0.0 }
0x19dc   : > { %6627 = vmatpush3.xpose.msk.msra.mxu1 %vm504_vm2, %v3747_v42  ;;  %6630 = vmatprep.mubr.msk.f32.mxu1 %vm504_vm2, %v3741_v61 }
0x19dd   : > { %6628 = vmatprep.subr.msk.mxu1 %vm504_vm2, %v3745_v59 }
0x19e0   : > { %6629 = vmatpush3.xpose.msk.msra.mxu1 %vm504_vm2, %v3745_v59 }
0x19e1   : > { %6648 = vmatprep.subr.bf16.mxu1 %v7158_v0 }
0x19e3   : > { %6631 = vmatmul.mubr.msk.f32.vlgmr.msra.gmra.mxu1 %vm504_vm2, %v3743_v5 }
0x19e4   : > { %6652 = vmatprep.mubr.msk.bf16.mxu1 %vm7159_vm0, %v7158_v0 }
0x1a9b   : > { %v8130_v17 = vpop.f32.mrf.mxu1 }
0x1a9d   : > { %v3719_v45 = vpop.f32.mrf.mxu1 }
0x1aa3   : > { %v6632_v46 = vpop.f32.mrf.mxu1 }
0x1aa4   : > { %v3834_v60 = vsel %vm590_vm3, %v6632_v46, -inf }
0x1aa5   : > { %3835 = vmax.xlane.f32.xlu1 %v3834_v60  ;;  %v3822_v12 = vpop.f32.mrf.mxu1  ;;  %v6931_v60 = vld [vmem:[%s8692_s4 + $0x30] ss:$12 sps:$4 sm:$0xff]  }
0x1aa6   : > { %v3831_v57 = vsel %vm590_vm3, %v3822_v12, -inf }
0x1aa7   : > { %3832 = vmax.xlane.f32.xlu0 %v3831_v57 }
0x1ab6   : > { %3851 = vrot.lane.b32.xlu1 %v8059_v1, %s8728_s17 }
0x1abd   : > { %3853 = vrot.lane.b32.xlu0 %v8057_v15, %s8728_s17 }
0x1ada   : > { %3425 = vadd.xlane.f32.xlu1 %v3424_v26 }
0x1adc   : > { %3422 = vadd.xlane.f32.xlu0 %v3421_v10 }
0x1ae0   : > { %3634 = vadd.xlane.f32.xlu0 %v3633_v27 }
0x1ae4   : > { %3637 = vadd.xlane.f32.xlu0 %v3636_v19 }
0x1b2e   : > { %v3836_v28 = vpop.xlane.xlu1 %3835 }
0x1b2f   : > { %v3838_v13 = vsub.f32 %v6632_v46, %v3836_v28 }
0x1b30   : > { %v3833_v23 = vpop.xlane.xlu0 %3832 }
0x1b31   : > { %v3841_v1 = vmul.f32 1.442695, %v3838_v13  ;;  %v3837_v32 = vsub.f32 %v3822_v12, %v3833_v23  ;;  %v6930_v12 = vld [vmem:[%s8692_s4 + $0x48] ss:$12 sps:$4 sm:$0xff]   ;;  %v6932_v23 = vld [vmem:[%s8692_s4 + $0x4c] ss:$12 sps:$4 sm:$0xff]  }
0x1b32   : > { %v3852_v34 = vpop.permute.xlu1 %3851  ;;  %6649 = vmatpush3.bf16.msra.mxu1 %v6932_v23 }
0x1b33   : > { %7030 = vpow2.f32 %v3841_v1  ;;  %v3839_v15 = vmul.f32 1.442695, %v3837_v32  ;;  %6650 = vmatprep.subr.bf16.mxu1 %v7158_v0  ;;  %v6933_v1 = vld [vmem:[%s8692_s4 + $0x34] ss:$12 sps:$4 sm:$0xff]   ;;  %v5854_v32 = vld [vmem:[%s8694_s6 + $0x13] ss:$0 sm:$0xff] }
0x1b34   : > { %v3854_v33 = vpop.permute.xlu0 %3853 }
0x1b35   : > { %7032 = vpow2.f32 %v3839_v15  ;;  %6633 = vmatprep.subr.mxu0 %v3854_v33 }
0x1b36   : > { %6634 = vmatpush3.msra.mxu0 %v3854_v33  ;;  %6651 = vmatpush3.bf16.msra.mxu1 %v6933_v1 }
0x1b37   : > { %6635 = vmatprep.subr.mxu0 %v3852_v34 }
0x1b38   : > { %6636 = vmatpush3.msra.mxu0 %v3852_v34 }
0x1b39   : > { %6640 = vmatprep.subr.bf16.mxu0 %v7158_v0 }
0x1b40   : > { %v7031_v20 = vpop.eup %7030 }
0x1b41   : > { %v3846_v40 = vsel %vm590_vm3, %v7031_v20, 0.0 }
0x1b42   : > { %v7033_v21 = vpop.eup %7032  ;;  %3847 = vadd.xlane.f32.xlu0 %v3846_v40 }
0x1b43   : > { %6637 = vmatprep.mubr.msk.f32.mxu0 %vm590_vm3, %v7033_v21  ;;  %v3843_v47 = vsel %vm590_vm3, %v7033_v21, 0.0 }
0x1b44   : > { %3844 = vadd.xlane.f32.xlu1 %v3843_v47  ;;  %6638 = vmatmul.mubr.msk.f32.vlgmr.msra.gmra.mxu0 %vm590_vm3, %v7031_v20 }
0x1b45   : > { %6644 = vmatprep.mubr.msk.bf16.mxu0 %vm7159_vm0, %v7158_v0 }
0x1b46   : > { %3229 = vadd.xlane.f32.xlu0 %v3228_v44 }
0x1b48   : > { %3226 = vadd.xlane.f32.xlu1 %v3225_v48 }
0x1b63   : > { %v3426_v4 = vpop.xlane.xlu1 %3425 }
0x1b64   : > { %7034 = vrcp.f32 %v3426_v4 }
0x1b65   : > { %v3423_v52 = vpop.xlane.xlu0 %3422 }
0x1b66   : > { %7036 = vrcp.f32 %v3423_v52 }
0x1b69   : > { %v3635_v56 = vpop.xlane.xlu0 %3634 }
0x1b6a   : > { %7038 = vrcp.f32 %v3635_v56 }
0x1b6d   : > { %v3638_v2 = vpop.xlane.xlu0 %3637 }
0x1b6e   : > { %7040 = vrcp.f32 %v3638_v2 }
0x1b71   : > { %v7035_v9 = vpop.eup %7034 }
0x1b72   : > { %v3519_v24 = vmul.f32 %v7035_v9, %v8105_v18 }
0x1b73   : > { %v7037_v63 = vpop.eup %7036 }
0x1b74   : > { %3524 = vrot.lane.b32.xlu0 %v3519_v24, %s8729_s29  ;;  %v3518_v53 = vmul.f32 %v7037_v63, %v8107_v30 }
0x1b76   : > { %3522 = vrot.lane.b32.xlu1 %v3518_v53, %s8729_s29 }
0x1b77   : > { %v7039_v29 = vpop.eup %7038 }
0x1b78   : > { %v3728_v51 = vmul.f32 %v7039_v29, %v3719_v45 }
0x1b7a   : > { %3732 = vrot.lane.b32.xlu1 %v3728_v51, %s8720_s22 }
0x1b7b   : > { %v7041_v25 = vpop.eup %7040 }
0x1b7c   : > { %v3729_v11 = vmul.f32 %v7041_v25, %v8130_v17 }
0x1b7e   : > { %3734 = vrot.lane.b32.xlu1 %v3729_v11, %s8720_s22 }
0x1bcb   : > { %v3848_v31 = vpop.xlane.xlu0 %3847 }
0x1bcd   : > { %v3845_v39 = vpop.xlane.xlu1 %3844 }
0x1bcf   : > { %v3230_v6 = vpop.xlane.xlu0 %3229 }
0x1bd0   : > { %7042 = vrcp.f32 %v3230_v6 }
0x1bd1   : > { %v3227_v18 = vpop.xlane.xlu1 %3226 }
0x1bd2   : > { %7044 = vrcp.f32 %v3227_v18 }
0x1bd3   : > { %7046 = vrcp.f32 %v3848_v31 }
0x1bd4   : > { %7048 = vrcp.f32 %v3845_v39 }
0x1bdd   : > { %v7043_v7 = vpop.eup %7042 }
0x1bde   : > { %v3315_v30 = vmul.f32 %v7043_v7, %v8101_v22 }
0x1bdf   : > { %v7045_v41 = vpop.eup %7044 }
0x1be0   : > { %3317 = vst.msk [vmem:[#allocation2 + $0x8] sm:$0xff] %vm504_vm2, %v3315_v30  ;;  %v3314_v42 = vmul.f32 %v7045_v41, %v8103_v16  ;;  %v7047_v22 = vpop.eup %7046  ;;  %v5861_v41 = vld [vmem:[%s8694_s6 + $0x1d] ss:$0 sm:$0xff] }
0x1be1   : > { %v7049_v16 = vpop.eup %7048 }
0x1be2   : > { %3316 = vst.msk [vmem:[#allocation2] sm:$0xff] %vm504_vm2, %v3314_v42 }
0x1be6   : > { %v3525_v62 = vpop.permute.xlu0 %3524 }
0x1be7   : > { %3529 = vst.msk [vmem:[#allocation2 + $0x8] sm:$0xff] %vm906_vm4, %v3525_v62 }
0x1be8   : > { %v3523_v43 = vpop.permute.xlu1 %3522 }
0x1be9   : > { %3528 = vst.msk [vmem:[#allocation2] sm:$0xff] %vm906_vm4, %v3523_v43 }
0x1bec   : > { %v3733_v61 = vpop.permute.xlu1 %3732 }
0x1bed   : > { %3738 = vst.msk [vmem:[#allocation2] sm:$0xff] %vm1117_vm5, %v3733_v61 }
0x1bf0   : > { %v3735_v59 = vpop.permute.xlu1 %3734 }
0x1bf1   : > { %3739 = vst.msk [vmem:[#allocation2 + $0x8] sm:$0xff] %vm1117_vm5, %v3735_v59 }
0x1c04   : > { %v6639_v5 = vpop.f32.mrf.mxu0 }
0x1c05   : > { %v3939_v17 = vmul.f32 %v7047_v22, %v6639_v5 }
0x1c06   : > { %v3929_v45 = vpop.f32.mrf.mxu0 }
0x1c07   : > { %v3938_v46 = vmul.f32 %v7049_v16, %v3929_v45  ;;  %3944 = vrot.lane.b32.xlu1 %v3939_v17, %s8721_s20 }
0x1c09   : > { %3942 = vrot.lane.b32.xlu0 %v3938_v46, %s8721_s20 }
0x1c0b   : > { %3972 = vrot.lane.b32.xlu1 %v6931_v60, %s8722_s9 }
0x1c0d   : > { %3974 = vrot.lane.b32.xlu0 %v6930_v12, %s8722_s9  ;;  %v5872_v12 = vld [vmem:[%s8694_s6 + $0x15] ss:$0 sm:$0xff] }
0x1c79   : > { %v3945_v57 = vpop.permute.xlu1 %3944 }
0x1c7a   : > { %3949 = vst.msk [vmem:[#allocation2 + $0x8] sm:$0xff] %vm1328_vm6, %v3945_v57 }
0x1c7b   : > { %v3943_v26 = vpop.permute.xlu0 %3942 }
0x1c7c   : > { %3948 = vst.msk [vmem:[#allocation2] sm:$0xff] %vm1328_vm6, %v3943_v26 }
0x1c7d   : > { %v3973_v27 = vpop.permute.xlu1 %3972 }
0x1c7f   : > { %v3975_v10 = vpop.permute.xlu0 %3974 }
0x1c80   : > { %6641 = vmatpush3.bf16.msra.mxu0 %v3975_v10 }
0x1c81   : > { %6642 = vmatprep.subr.bf16.mxu0 %v7158_v0  ;;  %v3951_v28 = vld [vmem:[#allocation2 + $0x8] sm:$0xff] }
0x1c83   : > { %v3950_v19 = vld [vmem:[#allocation2] sm:$0xff] }
0x1c84   : > { %6643 = vmatpush3.bf16.msra.mxu0 %v3973_v27  ;;  %v3956_v13 = vpack.c.bf16 %v3951_v28, %v3950_v19 }
0x1c87   : > { %6645 = vmatmul.mubr.msk.bf16.vlgmr.msra.gmra.mxu0 %vm377_vm1, %v3956_v13 }
0x1c88   : > { %6660 = vmatprep.mubr.msk.bf16.mxu0 %vm377_vm1, %v7511_v50 }
0x1d47   : > { %v4015_v15 = vpop.f32.mrf.mxu0 }
0x1d48   : > { %v4016_v33 = vadd.f32 %v5854_v32, %v4015_v15  ;;  %v5867_v15 = vld [vmem:[%s8694_s6 + $0x14] ss:$0 sm:$0xff] }
0x1d49   : > { %v6646_v34 = vpop.f32.mrf.mxu0 }
0x1d4a   : > { %v4024_v50 = vadd.f32 %v4016_v33, %v7991_v35 }
0x1d4b   : > { %v4018_v20 = vpop.f32.mrf.mxu0 }
0x1d4c   : > { %v4019_v40 = vadd.f32 %v5854_v32, %v4018_v20  ;;  %v4026_v21 = vsel %vm377_vm1, %v4024_v50, 0.0 }
0x1d4d   : > { %4027 = vadd.xlane.f32.xlu0 %v4026_v21  ;;  %v6647_v47 = vpop.f32.mrf.mxu0 }
0x1d4e   : > { %v4025_v44 = vadd.f32 %v4019_v40, %v7993_v36 }
0x1d50   : > { %v4029_v48 = vsel %vm377_vm1, %v4025_v44, 0.0 }
0x1d51   : > { %4030 = vadd.xlane.f32.xlu1 %v4029_v48 }
0x1d62   : > { %4139 = vrot.lane.b32.xlu1 %v6933_v1, %s7161_s16 }
0x1d63   : > { %4141 = vrot.lane.b32.xlu0 %v6932_v23, %s7161_s16 }
0x1dd6   : > { %v4028_v4 = vpop.xlane.xlu0 %4027 }
0x1dd7   : > { %v4032_v52 = vmul.f32 0.03125, %v4028_v4 }
0x1dd9   : > { %v4034_v56 = vsub.f32 %v4024_v50, %v4032_v52  ;;  %v5878_v52 = vld [vmem:[%s8694_s6 + $0x16] ss:$0 sm:$0xff] }
0x1dda   : > { %v4031_v2 = vpop.xlane.xlu1 %4030  ;;  %v4142_v35 = vpop.permute.xlu0 %4141 }
0x1ddb   : > { %v4033_v9 = vmul.f32 0.03125, %v4031_v2  ;;  %v4036_v24 = vmul.f32 %v4034_v56, %v4034_v56  ;;  %6656 = vmatprep.subr.bf16.mxu0 %v4142_v35 }
0x1ddc   : > { %6657 = vmatpush3.bf16.msra.mxu0 %v4142_v35 }
0x1ddd   : > { %v4035_v63 = vsub.f32 %v4025_v44, %v4033_v9  ;;  %v4038_v53 = vsel %vm377_vm1, %v4036_v24, 0.0 }
0x1dde   : > { %4039 = vadd.xlane.f32.xlu0 %v4038_v53  ;;  %v4140_v36 = vpop.permute.xlu1 %4139 }
0x1ddf   : > { %v4037_v29 = vmul.f32 %v4035_v63, %v4035_v63  ;;  %6658 = vmatprep.subr.bf16.mxu0 %v4140_v36 }
0x1de0   : > { %6659 = vmatpush3.bf16.msra.mxu0 %v4140_v36 }
0x1de1   : > { %v4041_v51 = vsel %vm377_vm1, %v4037_v29, 0.0 }
0x1de2   : > { %4042 = vadd.xlane.f32.xlu1 %v4041_v51 }
0x1de3   : > { %6661 = vmatmul.mubr.msk.bf16.vlgmr.msra.gmra.mxu0 %vm377_vm1, %v7522_v3  ;;  %v5860_v3 = vld [vmem:[%s8694_s6 + $0x1a] ss:$0 sm:$0xff] }
0x1de4   : > { %6664 = vmatprep.mubr.msk.bf16.mxu0 %vm377_vm1, %v7524_v8 }
0x1deb   : > { %6665 = vmatmul.mubr.msk.bf16.gmra.mxu0 %vm377_vm1, %v7532_v14 }
0x1df3   : > { %4215 = vrot.lane.b32.xlu1 %v6933_v1, %s8724_s14 }
0x1df4   : > { %4217 = vrot.lane.b32.xlu0 %v6932_v23, %s8724_s14  ;;  %s5981_s14 = sshll.u32 %s7235_s28, 8 }
0x1df5   : > { %s8642_s18 = scalar_lea.hbm %s8695_s7, %s5981_s14 }
0x1e67   : > { %v4040_v25 = vpop.xlane.xlu0 %4039 }
0x1e68   : > { %v4044_v11 = vmul.f32 0.03125, %v4040_v25 }
0x1e6a   : > { %v4046_v31 = vadd.f32 1e-05, %v4044_v11 }
0x1e6b   : > { %v4043_v39 = vpop.xlane.xlu1 %4042  ;;  %v4218_v1 = vpop.permute.xlu0 %4217 }
0x1e6c   : > { %7050 = vrsqrt.f32 %v4046_v31  ;;  %v4045_v6 = vmul.f32 0.03125, %v4043_v39  ;;  %6668 = vmatprep.subr.bf16.mxu1 %v4218_v1 }
0x1e6e   : > { %v4047_v18 = vadd.f32 1e-05, %v4045_v6 }
0x1e6f   : > { %v4216_v32 = vpop.permute.xlu1 %4215 }
0x1e70   : > { %7052 = vrsqrt.f32 %v4047_v18 }
0x1e79   : > { %v7051_v7 = vpop.eup %7050 }
0x1e7a   : > { %v4050_v8 = vmul.f32 %v7051_v7, %v4034_v56 }
0x1e7c   : > { %v4056_v30 = vmul.f32 %v5860_v3, %v4050_v8 }
0x1e7d   : > { %v7053_v14 = vpop.eup %7052 }
0x1e7e   : > { %v4051_v42 = vmul.f32 %v7053_v14, %v4035_v63  ;;  %v8217_v43 = vadd.f32 %v5861_v41, %v4056_v30 }
0x1e80   : > { %v4057_v62 = vmul.f32 %v5860_v3, %v4051_v42  ;;  %v4064_v59 = vadd.f32 %v7996_v37, %v8217_v43 }
0x1e82   : > { %v8219_v61 = vadd.f32 %v5861_v41, %v4057_v62 }
0x1e84   : > { %v4065_v22 = vadd.f32 %v8001_v38, %v8219_v61 }
0x1e86   : > { %v4070_v5 = vpack.c.bf16 %v4065_v22, %v4064_v59 }
0x1e88   : > { %6653 = vmatmul.mubr.msk.bf16.vlgmr.msra.gmra.mxu1 %vm377_vm1, %v4070_v5 }
0x1e89   : > { %6672 = vmatprep.mubr.msk.bf16.mxu1 %vm377_vm1, %v7607_v49  ;;  %6669 = vmatpush3.bf16.msra.mxu1 %v4218_v1 }
0x1e8a   : > { %6670 = vmatprep.subr.bf16.mxu1 %v4216_v32 }
0x1e8d   : > { %6671 = vmatpush3.bf16.msra.mxu1 %v4216_v32 }
0x1e90   : > { %6673 = vmatmul.mubr.msk.bf16.vlgmr.msra.gmra.mxu1 %vm377_vm1, %v7613_v54 }
0x1e91   : > { %6676 = vmatprep.mubr.msk.bf16.mxu1 %vm377_vm1, %v7615_v55 }
0x1e98   : > { %6677 = vmatmul.mubr.msk.bf16.gmra.mxu1 %vm377_vm1, %v7621_v58 }
0x1ea3   : > { %v6662_v17 = vpop.f32.mrf.mxu0 }
0x1ea4   : > { %v8257_v28 = vadd.f32 %v6662_v17, %v5872_v12 }
0x1ea5   : > { %v4179_v16 = vpop.f32.mrf.mxu0 }
0x1ea6   : > { %v8269_v23 = vadd.f32 %v5872_v12, %v4179_v16 }
0x1ea7   : > { %v6663_v45 = vpop.f32.mrf.mxu0 }
0x1ea8   : > { %v8251_v19 = vadd.f32 %v6663_v45, %v5872_v12 }
0x1ea9   : > { %v4182_v46 = vpop.f32.mrf.mxu0 }
0x1eaa   : > { %v8263_v13 = vadd.f32 %v5872_v12, %v4182_v46 }
0x1eab   : > { %v6666_v60 = vpop.f32.mrf.mxu0 }
0x1eac   : > { %v8231_v26 = vadd.f32 %v6666_v60, %v5872_v12 }
0x1ead   : > { %v4195_v57 = vpop.f32.mrf.mxu0 }
0x1eae   : > { %v8245_v27 = vadd.f32 %v5872_v12, %v4195_v57 }
0x1eaf   : > { %v6667_v37 = vpop.f32.mrf.mxu0 }
0x1eb0   : > { %v8233_v38 = vadd.f32 %v6667_v37, %v5872_v12 }
0x1eb1   : > { %v4198_v10 = vpop.f32.mrf.mxu0 }
0x1eb2   : > { %6680 = vmatprep.subr.msk.mxu0 %vm504_vm2, %v8233_v38  ;;  %v8241_v49 = vadd.f32 %v5872_v12, %v4198_v10 }
0x1eb3   : > { %6681 = vmatpush3.xpose.msk.msra.mxu0 %vm504_vm2, %v8233_v38 }
0x1eb4   : > { %6682 = vmatprep.subr.msk.mxu0 %vm504_vm2, %v8231_v26 }
0x1eb7   : > { %6683 = vmatpush3.xpose.msk.msra.mxu0 %vm504_vm2, %v8231_v26 }
0x1eb8   : > { %6684 = vmatprep.subr.msk.mxu0 %vm504_vm2, %v8241_v49 }
0x1ebb   : > { %6685 = vmatpush3.xpose.msk.msra.mxu0 %vm504_vm2, %v8241_v49 }
0x1ebc   : > { %6686 = vmatprep.subr.msk.mxu0 %vm504_vm2, %v8245_v27 }
0x1ebf   : > { %6687 = vmatpush3.xpose.msk.msra.mxu0 %vm504_vm2, %v8245_v27 }
0x1ec0   : > { %6688 = vmatprep.subr.msk.mxu0 %vm504_vm2, %v8251_v19 }
0x1ec3   : > { %6689 = vmatpush3.xpose.msk.msra.mxu0 %vm504_vm2, %v8251_v19 }
0x1ec4   : > { %6690 = vmatprep.subr.msk.mxu0 %vm504_vm2, %v8257_v28 }
0x1ec7   : > { %6691 = vmatpush3.xpose.msk.msra.mxu0 %vm504_vm2, %v8257_v28 }
0x1ec8   : > { %6692 = vmatprep.subr.msk.mxu0 %vm504_vm2, %v8263_v13 }
0x1ecb   : > { %6693 = vmatpush3.xpose.msk.msra.mxu0 %vm504_vm2, %v8263_v13 }
0x1ecc   : > { %6694 = vmatprep.subr.msk.mxu0 %vm504_vm2, %v8269_v23 }
0x1ecf   : > { %6695 = vmatpush3.xpose.msk.msra.mxu0 %vm504_vm2, %v8269_v23 }
0x1f48   : > { %v4125_v33 = vpop.f32.mrf.mxu1 }
0x1f49   : > { %v4126_v34 = vadd.f32 %v5867_v15, %v4125_v33 }
0x1f4a   : > { %v6654_v50 = vpop.f32.mrf.mxu1 }
0x1f4b   : > { %v8288_v20 = vmul.f32 0.35355338, %v4126_v34 }
0x1f4c   : > { %v4128_v40 = vpop.f32.mrf.mxu1 }
0x1f4d   : > { %v4129_v21 = vadd.f32 %v5867_v15, %v4128_v40  ;;  %6696 = vmatprep.mubr.msk.f32.mxu0 %vm504_vm2, %v8288_v20 }
0x1f4e   : > { %v6655_v54 = vpop.f32.mrf.mxu1 }
0x1f4f   : > { %v8292_v47 = vmul.f32 0.35355338, %v4129_v21 }
0x1f50   : > { %v6674_v55 = vpop.f32.mrf.mxu1 }
0x1f51   : > { %6697 = vmatmul.mubr.msk.f32.vlgmr.msra.gmra.mxu0 %vm504_vm2, %v8292_v47  ;;  %v8315_v29 = vadd.f32 %v6674_v55, %v5878_v52 }
0x1f52   : > { %v4255_v58 = vpop.f32.mrf.mxu1 }
0x1f53   : > { %v8323_v25 = vadd.f32 %v5878_v52, %v4255_v58 }
0x1f54   : > { %v6675_v44 = vpop.f32.mrf.mxu1 }
0x1f55   : > { %v8311_v36 = vadd.f32 %v6675_v44, %v5878_v52 }
0x1f56   : > { %v4258_v48 = vpop.f32.mrf.mxu1 }
0x1f57   : > { %v8319_v51 = vadd.f32 %v5878_v52, %v4258_v48 }
0x1f58   : > { %v6678_v4 = vpop.f32.mrf.mxu1 }
0x1f59   : > { %v8299_v35 = vadd.f32 %v6678_v4, %v5878_v52 }
0x1f5a   : > { %v4271_v56 = vpop.f32.mrf.mxu1 }
0x1f5b   : > { %v8307_v53 = vadd.f32 %v5878_v52, %v4271_v56 }
0x1f5c   : > { %v6679_v2 = vpop.f32.mrf.mxu1 }
0x1f5d   : > { %v8301_v9 = vadd.f32 %v6679_v2, %v5878_v52 }
0x1f5e   : > { %v4274_v24 = vpop.f32.mrf.mxu1 }
0x1f5f   : > { %6699 = vmatprep.subr.mxu1 %v8301_v9  ;;  %v8304_v63 = vadd.f32 %v5878_v52, %v4274_v24 }
0x1f60   : > { %6700 = vmatpush3.msra.mxu1 %v8301_v9 }
0x1f61   : > { %6701 = vmatprep.subr.mxu1 %v8299_v35 }
0x1f62   : > { %6702 = vmatpush3.msra.mxu1 %v8299_v35 }
0x1f63   : > { %6703 = vmatprep.subr.mxu1 %v8304_v63 }
0x1f64   : > { %6704 = vmatpush3.msra.mxu1 %v8304_v63 }
0x1f65   : > { %6705 = vmatprep.subr.mxu1 %v8307_v53 }
0x1f66   : > { %6706 = vmatpush3.msra.mxu1 %v8307_v53 }
0x1f67   : > { %6707 = vmatprep.subr.mxu1 %v8311_v36 }
0x1f68   : > { %6708 = vmatpush3.msra.mxu1 %v8311_v36 }
0x1f69   : > { %6709 = vmatprep.subr.mxu1 %v8315_v29 }
0x1f6a   : > { %6710 = vmatpush3.msra.mxu1 %v8315_v29 }
0x1f6b   : > { %6711 = vmatprep.subr.mxu1 %v8319_v51 }
0x1f6c   : > { %6712 = vmatpush3.msra.mxu1 %v8319_v51 }
0x1f6d   : > { %6713 = vmatprep.subr.mxu1 %v8323_v25 }
0x1f6e   : > { %6714 = vmatpush3.msra.mxu1 %v8323_v25 }
0x2011   : > { %v6698_v11 = vpop.f32.mrf.mxu0 }
0x2012   : > { %v4394_v31 = vsel %vm1805_vm7, %v6698_v11, -inf }
0x2013   : > { %4395 = vmax.xlane.f32.xlu1 %v4394_v31  ;;  %v4382_v39 = vpop.f32.mrf.mxu0 }
0x2014   : > { %v4391_v6 = vsel %vm1805_vm7, %v4382_v39, -inf }
0x2015   : > { %4392 = vmax.xlane.f32.xlu0 %v4391_v6 }
0x2024   : > { %4512 = vrot.lane.b32.xlu1 %v8231_v26, %s8730_s8 }
0x2028   : > { %4508 = vrot.lane.b32.xlu1 %v8245_v27, %s8730_s8 }
0x202b   : > { %4514 = vrot.lane.b32.xlu0 %v8233_v38, %s8730_s8 }
0x202c   : > { %4504 = vrot.lane.b32.xlu1 %v8257_v28, %s8730_s8 }
0x202f   : > { %4510 = vrot.lane.b32.xlu0 %v8241_v49, %s8730_s8 }
0x2030   : > { %4500 = vrot.lane.b32.xlu1 %v8269_v23, %s8730_s8 }
0x2033   : > { %4506 = vrot.lane.b32.xlu0 %v8251_v19, %s8730_s8 }
0x2034   : > { %4498 = vrot.lane.b32.xlu1 %v8292_v47, %s8730_s8 }
0x2037   : > { %4502 = vrot.lane.b32.xlu0 %v8263_v13, %s8730_s8 }
0x2038   : > { %4651 = vrot.lane.b32.xlu1 %v8299_v35, %s8730_s8 }
0x203b   : > { %4496 = vrot.lane.b32.xlu0 %v8288_v20, %s8730_s8 }
0x203c   : > { %4647 = vrot.lane.b32.xlu1 %v8307_v53, %s8730_s8 }
0x203f   : > { %4653 = vrot.lane.b32.xlu0 %v8301_v9, %s8730_s8 }
0x2040   : > { %4643 = vrot.lane.b32.xlu1 %v8315_v29, %s8730_s8 }
0x2043   : > { %4649 = vrot.lane.b32.xlu0 %v8304_v63, %s8730_s8 }
0x2044   : > { %4639 = vrot.lane.b32.xlu1 %v8323_v25, %s8730_s8 }
0x2047   : > { %4645 = vrot.lane.b32.xlu0 %v8311_v36, %s8730_s8 }
0x204b   : > { %4641 = vrot.lane.b32.xlu0 %v8319_v51, %s8730_s8 }
0x209c   : > { %v4396_v18 = vpop.xlane.xlu1 %4395 }
0x209d   : > { %v4398_v7 = vsub.f32 %v6698_v11, %v4396_v18 }
0x209e   : > { %v4393_v3 = vpop.xlane.xlu0 %4392 }
0x209f   : > { %v4397_v8 = vsub.f32 %v4382_v39, %v4393_v3  ;;  %v4401_v30 = vmul.f32 1.442695, %v4398_v7 }
0x20a0   : > { %v4513_v14 = vpop.permute.xlu1 %4512 }
0x20a1   : > { %v4399_v41 = vmul.f32 1.442695, %v4397_v8 }
0x20a2   : > { %v4515_v42 = vpop.permute.xlu0 %4514 }
0x20a3   : > { %7054 = vpow2.f32 %v4399_v41  ;;  %6718 = vmatprep.subr.msk.mxu1 %vm504_vm2, %v4515_v42 }
0x20a4   : > { %7056 = vpow2.f32 %v4401_v30  ;;  %v4509_v62 = vpop.permute.xlu1 %4508 }
0x20a6   : > { %v4511_v59 = vpop.permute.xlu0 %4510 }
0x20a8   : > { %v4505_v22 = vpop.permute.xlu1 %4504 }
0x20aa   : > { %v4507_v5 = vpop.permute.xlu0 %4506 }
0x20ac   : > { %v4501_v17 = vpop.permute.xlu1 %4500 }
0x20ae   : > { %v4503_v16 = vpop.permute.xlu0 %4502 }
0x20b0   : > { %v8370_v45 = vpop.eup %7054  ;;  %v4499_v46 = vpop.permute.xlu1 %4498 }
0x20b1   : > { %v8372_v60 = vpop.eup %7056  ;;  %6715 = vmatprep.mubr.msk.f32.mxu1 %vm1805_vm7, %v8370_v45 }
0x20b2   : > { %6716 = vmatmul.mubr.msk.f32.vlgmr.msra.gmra.mxu1 %vm1805_vm7, %v8372_v60  ;;  %v4497_v12 = vpop.permute.xlu0 %4496 }
0x20b3   : > { %6719 = vmatpush3.xpose.msk.msra.mxu1 %vm504_vm2, %v4515_v42  ;;  %6734 = vmatprep.mubr.msk.f32.mxu1 %vm504_vm2, %v4497_v12 }
0x20b4   : > { %6720 = vmatprep.subr.msk.mxu1 %vm504_vm2, %v4513_v14  ;;  %v4652_v57 = vpop.permute.xlu1 %4651 }
0x20b6   : > { %v4654_v37 = vpop.permute.xlu0 %4653 }
0x20b7   : > { %6721 = vmatpush3.xpose.msk.msra.mxu1 %vm504_vm2, %v4513_v14  ;;  %6737 = vmatprep.subr.mxu0 %v4654_v37 }
0x20b8   : > { %6722 = vmatprep.subr.msk.mxu1 %vm504_vm2, %v4511_v59  ;;  %6738 = vmatpush3.msra.mxu0 %v4654_v37  ;;  %v4648_v10 = vpop.permute.xlu1 %4647 }
0x20b9   : > { %6739 = vmatprep.subr.mxu0 %v4652_v57 }
0x20ba   : > { %6740 = vmatpush3.msra.mxu0 %v4652_v57  ;;  %v4650_v1 = vpop.permute.xlu0 %4649 }
0x20bb   : > { %6723 = vmatpush3.xpose.msk.msra.mxu1 %vm504_vm2, %v4511_v59  ;;  %6741 = vmatprep.subr.mxu0 %v4650_v1 }
0x20bc   : > { %6724 = vmatprep.subr.msk.mxu1 %vm504_vm2, %v4509_v62  ;;  %6742 = vmatpush3.msra.mxu0 %v4650_v1  ;;  %v4644_v32 = vpop.permute.xlu1 %4643 }
0x20bd   : > { %6743 = vmatprep.subr.mxu0 %v4648_v10 }
0x20be   : > { %6744 = vmatpush3.msra.mxu0 %v4648_v10  ;;  %v4646_v15 = vpop.permute.xlu0 %4645 }
0x20bf   : > { %6725 = vmatpush3.xpose.msk.msra.mxu1 %vm504_vm2, %v4509_v62  ;;  %6745 = vmatprep.subr.mxu0 %v4646_v15 }
0x20c0   : > { %6726 = vmatprep.subr.msk.mxu1 %vm504_vm2, %v4507_v5  ;;  %6746 = vmatpush3.msra.mxu0 %v4646_v15  ;;  %v4640_v34 = vpop.permute.xlu1 %4639 }
0x20c1   : > { %6747 = vmatprep.subr.mxu0 %v4644_v32 }
0x20c2   : > { %6748 = vmatpush3.msra.mxu0 %v4644_v32  ;;  %v4642_v33 = vpop.permute.xlu0 %4641 }
0x20c3   : > { %6727 = vmatpush3.xpose.msk.msra.mxu1 %vm504_vm2, %v4507_v5  ;;  %6749 = vmatprep.subr.mxu0 %v4642_v33 }
0x20c4   : > { %6728 = vmatprep.subr.msk.mxu1 %vm504_vm2, %v4505_v22  ;;  %6750 = vmatpush3.msra.mxu0 %v4642_v33 }
0x20c5   : > { %6751 = vmatprep.subr.mxu0 %v4640_v34 }
0x20c6   : > { %6752 = vmatpush3.msra.mxu0 %v4640_v34 }
0x20c7   : > { %6729 = vmatpush3.xpose.msk.msra.mxu1 %vm504_vm2, %v4505_v22 }
0x20c8   : > { %6730 = vmatprep.subr.msk.mxu1 %vm504_vm2, %v4503_v16 }
0x20cb   : > { %6731 = vmatpush3.xpose.msk.msra.mxu1 %vm504_vm2, %v4503_v16 }
0x20cc   : > { %6732 = vmatprep.subr.msk.mxu1 %vm504_vm2, %v4501_v17 }
0x20cf   : > { %6733 = vmatpush3.xpose.msk.msra.mxu1 %vm504_vm2, %v4501_v17 }
0x20d2   : > { %6735 = vmatmul.mubr.msk.f32.vlgmr.msra.gmra.mxu1 %vm504_vm2, %v4499_v46 }
0x2172   : > { %v8395_v50 = vpop.f32.mrf.mxu1 }
0x2174   : > { %v8397_v40 = vpop.f32.mrf.mxu1 }
0x2192   : > { %v6736_v21 = vpop.f32.mrf.mxu1 }
0x2193   : > { %v4614_v54 = vsel %vm1805_vm7, %v6736_v21, -inf }
0x2194   : > { %4615 = vmax.xlane.f32.xlu1 %v4614_v54  ;;  %v4602_v55 = vpop.f32.mrf.mxu1 }
0x2195   : > { %v4611_v58 = vsel %vm1805_vm7, %v4602_v55, -inf }
0x2196   : > { %4612 = vmax.xlane.f32.xlu0 %v4611_v58 }
0x21a5   : > { %4772 = vrot.lane.b32.xlu1 %v8231_v26, %s8725_s19 }
0x21a9   : > { %4768 = vrot.lane.b32.xlu1 %v8245_v27, %s8725_s19 }
0x21ac   : > { %4774 = vrot.lane.b32.xlu0 %v8233_v38, %s8725_s19 }
0x21ad   : > { %4764 = vrot.lane.b32.xlu1 %v8257_v28, %s8725_s19 }
0x21b0   : > { %4770 = vrot.lane.b32.xlu0 %v8241_v49, %s8725_s19 }
0x21b1   : > { %4760 = vrot.lane.b32.xlu1 %v8269_v23, %s8725_s19 }
0x21b4   : > { %4766 = vrot.lane.b32.xlu0 %v8251_v19, %s8725_s19 }
0x21b5   : > { %4758 = vrot.lane.b32.xlu1 %v8292_v47, %s8725_s19 }
0x21b8   : > { %4762 = vrot.lane.b32.xlu0 %v8263_v13, %s8725_s19 }
0x21b9   : > { %4903 = vrot.lane.b32.xlu1 %v8299_v35, %s8725_s19 }
0x21bc   : > { %4756 = vrot.lane.b32.xlu0 %v8288_v20, %s8725_s19 }
0x21bd   : > { %4899 = vrot.lane.b32.xlu1 %v8307_v53, %s8725_s19 }
0x21c0   : > { %4905 = vrot.lane.b32.xlu0 %v8301_v9, %s8725_s19 }
0x21c1   : > { %4895 = vrot.lane.b32.xlu1 %v8315_v29, %s8725_s19 }
0x21c4   : > { %4901 = vrot.lane.b32.xlu0 %v8304_v63, %s8725_s19 }
0x21c5   : > { %4891 = vrot.lane.b32.xlu1 %v8323_v25, %s8725_s19 }
0x21c8   : > { %4897 = vrot.lane.b32.xlu0 %v8311_v36, %s8725_s19 }
0x21cc   : > { %4893 = vrot.lane.b32.xlu0 %v8319_v51, %s8725_s19  ;;  %s7172_s19 = smov [#allocation3]  }
0x221d   : > { %v4616_v44 = vpop.xlane.xlu1 %4615 }
0x221e   : > { %v4618_v48 = vsub.f32 %v6736_v21, %v4616_v44 }
0x221f   : > { %v4613_v4 = vpop.xlane.xlu0 %4612 }
0x2220   : > { %v4617_v52 = vsub.f32 %v4602_v55, %v4613_v4  ;;  %v4621_v56 = vmul.f32 1.442695, %v4618_v48 }
0x2221   : > { %v4773_v2 = vpop.permute.xlu1 %4772 }
0x2222   : > { %v4619_v24 = vmul.f32 1.442695, %v4617_v52 }
0x2223   : > { %v4775_v11 = vpop.permute.xlu0 %4774 }
0x2224   : > { %7058 = vpow2.f32 %v4619_v24  ;;  %6756 = vmatprep.subr.msk.mxu0 %vm504_vm2, %v4775_v11 }
0x2225   : > { %7060 = vpow2.f32 %v4621_v56  ;;  %v4769_v31 = vpop.permute.xlu1 %4768 }
0x2227   : > { %v4771_v39 = vpop.permute.xlu0 %4770 }
0x2229   : > { %v4765_v6 = vpop.permute.xlu1 %4764 }
0x222b   : > { %v4767_v18 = vpop.permute.xlu0 %4766 }
0x222d   : > { %v4761_v7 = vpop.permute.xlu1 %4760 }
0x222f   : > { %v4763_v3 = vpop.permute.xlu0 %4762 }
0x2231   : > { %v8438_v8 = vpop.eup %7058  ;;  %v4759_v30 = vpop.permute.xlu1 %4758 }
0x2232   : > { %v8440_v14 = vpop.eup %7060  ;;  %6753 = vmatprep.mubr.msk.f32.mxu0 %vm1805_vm7, %v8438_v8 }
0x2233   : > { %6754 = vmatmul.mubr.msk.f32.vlgmr.msra.gmra.mxu0 %vm1805_vm7, %v8440_v14  ;;  %v4757_v41 = vpop.permute.xlu0 %4756 }
0x2234   : > { %6757 = vmatpush3.xpose.msk.msra.mxu0 %vm504_vm2, %v4775_v11  ;;  %6772 = vmatprep.mubr.msk.f32.mxu0 %vm504_vm2, %v4757_v41  ;;  %v4626_v11 = vsel %vm1805_vm7, %v8440_v14, 0.0 }
0x2235   : > { %6758 = vmatprep.subr.msk.mxu0 %vm504_vm2, %v4773_v2  ;;  %v4904_v42 = vpop.permute.xlu1 %4903 }
0x2237   : > { %v4906_v62 = vpop.permute.xlu0 %4905 }
0x2238   : > { %6759 = vmatpush3.xpose.msk.msra.mxu0 %vm504_vm2, %v4773_v2  ;;  %6775 = vmatprep.subr.mxu1 %v4906_v62 }
0x2239   : > { %6760 = vmatprep.subr.msk.mxu0 %vm504_vm2, %v4771_v39  ;;  %v4900_v59 = vpop.permute.xlu1 %4899  ;;  %6776 = vmatpush3.msra.mxu1 %v4906_v62 }
0x223a   : > { %6777 = vmatprep.subr.mxu1 %v4904_v42 }
0x223b   : > { %6778 = vmatpush3.msra.mxu1 %v4904_v42  ;;  %v4902_v22 = vpop.permute.xlu0 %4901 }
0x223c   : > { %6761 = vmatpush3.xpose.msk.msra.mxu0 %vm504_vm2, %v4771_v39  ;;  %6779 = vmatprep.subr.mxu1 %v4902_v22 }
0x223d   : > { %6762 = vmatprep.subr.msk.mxu0 %vm504_vm2, %v4769_v31  ;;  %6780 = vmatpush3.msra.mxu1 %v4902_v22  ;;  %v4896_v5 = vpop.permute.xlu1 %4895  ;;  %v4406_v22 = vsel %vm1805_vm7, %v8372_v60, 0.0 }
0x223e   : > { %6781 = vmatprep.subr.mxu1 %v4900_v59 }
0x223f   : > { %6782 = vmatpush3.msra.mxu1 %v4900_v59  ;;  %v4898_v17 = vpop.permute.xlu0 %4897 }
0x2240   : > { %6763 = vmatpush3.xpose.msk.msra.mxu0 %vm504_vm2, %v4769_v31  ;;  %6783 = vmatprep.subr.mxu1 %v4898_v17  ;;  %v4623_v31 = vsel %vm1805_vm7, %v8438_v8, 0.0 }
0x2241   : > { %6764 = vmatprep.subr.msk.mxu0 %vm504_vm2, %v4767_v18  ;;  %6784 = vmatpush3.msra.mxu1 %v4898_v17  ;;  %v4892_v46 = vpop.permute.xlu1 %4891 }
0x2242   : > { %6785 = vmatprep.subr.mxu1 %v4896_v5 }
0x2243   : > { %6786 = vmatpush3.msra.mxu1 %v4896_v5  ;;  %v4894_v16 = vpop.permute.xlu0 %4893  ;;  %v4403_v5 = vsel %vm1805_vm7, %v8370_v45, 0.0 }
0x2244   : > { %6765 = vmatpush3.xpose.msk.msra.mxu0 %vm504_vm2, %v4767_v18  ;;  %6787 = vmatprep.subr.mxu1 %v4894_v16 }
0x2245   : > { %6766 = vmatprep.subr.msk.mxu0 %vm504_vm2, %v4765_v6  ;;  %6788 = vmatpush3.msra.mxu1 %v4894_v16 }
0x2246   : > { %6789 = vmatprep.subr.mxu1 %v4892_v46 }
0x2247   : > { %6790 = vmatpush3.msra.mxu1 %v4892_v46 }
0x2248   : > { %6767 = vmatpush3.xpose.msk.msra.mxu0 %vm504_vm2, %v4765_v6 }
0x2249   : > { %6768 = vmatprep.subr.msk.mxu0 %vm504_vm2, %v4763_v3 }
0x224c   : > { %6769 = vmatpush3.xpose.msk.msra.mxu0 %vm504_vm2, %v4763_v3 }
0x224d   : > { %6770 = vmatprep.subr.msk.mxu0 %vm504_vm2, %v4761_v7 }
0x2250   : > { %6771 = vmatpush3.xpose.msk.msra.mxu0 %vm504_vm2, %v4761_v7 }
0x2253   : > { %6773 = vmatmul.mubr.msk.f32.vlgmr.msra.gmra.mxu0 %vm504_vm2, %v4759_v30 }
0x22f3   : > { %v8463_v12 = vpop.f32.mrf.mxu0 }
0x22f5   : > { %v8465_v57 = vpop.f32.mrf.mxu0 }
0x2313   : > { %v6774_v37 = vpop.f32.mrf.mxu0 }
0x2314   : > { %v4874_v10 = vsel %vm1805_vm7, %v6774_v37, -inf }
0x2315   : > { %4875 = vmax.xlane.f32.xlu1 %v4874_v10  ;;  %v4862_v1 = vpop.f32.mrf.mxu0 }
0x2316   : > { %v4871_v32 = vsel %vm1805_vm7, %v4862_v1, -inf }
0x2317   : > { %4872 = vmax.xlane.f32.xlu0 %v4871_v32 }
0x2326   : > { %5024 = vrot.lane.b32.xlu1 %v8231_v26, %s8728_s17 }
0x232a   : > { %5020 = vrot.lane.b32.xlu1 %v8245_v27, %s8728_s17 }
0x232d   : > { %5026 = vrot.lane.b32.xlu0 %v8233_v38, %s8728_s17 }
0x232e   : > { %5016 = vrot.lane.b32.xlu1 %v8257_v28, %s8728_s17 }
0x2331   : > { %5022 = vrot.lane.b32.xlu0 %v8241_v49, %s8728_s17 }
0x2332   : > { %5012 = vrot.lane.b32.xlu1 %v8269_v23, %s8728_s17 }
0x2335   : > { %5018 = vrot.lane.b32.xlu0 %v8251_v19, %s8728_s17 }
0x2336   : > { %5010 = vrot.lane.b32.xlu1 %v8292_v47, %s8728_s17 }
0x2339   : > { %5014 = vrot.lane.b32.xlu0 %v8263_v13, %s8728_s17 }
0x233a   : > { %5155 = vrot.lane.b32.xlu1 %v8299_v35, %s8728_s17 }
0x233d   : > { %5008 = vrot.lane.b32.xlu0 %v8288_v20, %s8728_s17 }
0x233e   : > { %5151 = vrot.lane.b32.xlu1 %v8307_v53, %s8728_s17 }
0x2341   : > { %5157 = vrot.lane.b32.xlu0 %v8301_v9, %s8728_s17 }
0x2342   : > { %5147 = vrot.lane.b32.xlu1 %v8315_v29, %s8728_s17 }
0x2345   : > { %5153 = vrot.lane.b32.xlu0 %v8304_v63, %s8728_s17 }
0x2349   : > { %5149 = vrot.lane.b32.xlu0 %v8311_v36, %s8728_s17 }
0x239e   : > { %v4876_v26 = vpop.xlane.xlu1 %4875 }
0x239f   : > { %v4878_v38 = vsub.f32 %v6774_v37, %v4876_v26 }
0x23a0   : > { %v4873_v49 = vpop.xlane.xlu0 %4872 }
0x23a1   : > { %v4877_v27 = vsub.f32 %v4862_v1, %v4873_v49  ;;  %v4881_v19 = vmul.f32 1.442695, %v4878_v38 }
0x23a2   : > { %v5025_v28 = vpop.permute.xlu1 %5024 }
0x23a3   : > { %v4879_v13 = vmul.f32 1.442695, %v4877_v27 }
0x23a4   : > { %v5027_v23 = vpop.permute.xlu0 %5026 }
0x23a5   : > { %7062 = vpow2.f32 %v4879_v13  ;;  %6794 = vmatprep.subr.msk.mxu1 %vm504_vm2, %v5027_v23 }
0x23a6   : > { %7064 = vpow2.f32 %v4881_v19  ;;  %v5021_v20 = vpop.permute.xlu1 %5020 }
0x23a8   : > { %v5023_v47 = vpop.permute.xlu0 %5022 }
0x23aa   : > { %v5017_v35 = vpop.permute.xlu1 %5016 }
0x23ac   : > { %v5019_v9 = vpop.permute.xlu0 %5018 }
0x23ae   : > { %v5013_v63 = vpop.permute.xlu1 %5012 }
0x23b0   : > { %v5015_v53 = vpop.permute.xlu0 %5014 }
0x23b2   : > { %v7063_v29 = vpop.eup %7062  ;;  %v5011_v36 = vpop.permute.xlu1 %5010 }
0x23b3   : > { %v7065_v15 = vpop.eup %7064  ;;  %6791 = vmatprep.mubr.msk.f32.mxu1 %vm1805_vm7, %v7063_v29  ;;  %v4883_v39 = vsel %vm1805_vm7, %v7063_v29, 0.0 }
0x23b4   : > { %6792 = vmatmul.mubr.msk.f32.vlgmr.msra.gmra.mxu1 %vm1805_vm7, %v7065_v15  ;;  %v5009_v33 = vpop.permute.xlu0 %5008  ;;  %v4886_v6 = vsel %vm1805_vm7, %v7065_v15, 0.0 }
0x23b5   : > { %6795 = vmatpush3.xpose.msk.msra.mxu1 %vm504_vm2, %v5027_v23  ;;  %6810 = vmatprep.mubr.msk.f32.mxu1 %vm504_vm2, %v5009_v33  ;;  %v6935_v33 = vld [vmem:[%s8692_s4 + $0x34] ss:$12 sps:$4 sm:$0xff]  }
0x23b6   : > { %6796 = vmatprep.subr.msk.mxu1 %vm504_vm2, %v5025_v28  ;;  %v5156_v34 = vpop.permute.xlu1 %5155 }
0x23b8   : > { %v5158_v21 = vpop.permute.xlu0 %5157 }
0x23b9   : > { %6797 = vmatpush3.xpose.msk.msra.mxu1 %vm504_vm2, %v5025_v28  ;;  %6813 = vmatprep.subr.mxu0 %v5158_v21 }
0x23ba   : > { %6798 = vmatprep.subr.msk.mxu1 %vm504_vm2, %v5023_v47  ;;  %6814 = vmatpush3.msra.mxu0 %v5158_v21  ;;  %v5152_v54 = vpop.permute.xlu1 %5151 }
0x23bb   : > { %6815 = vmatprep.subr.mxu0 %v5156_v34 }
0x23bc   : > { %6816 = vmatpush3.msra.mxu0 %v5156_v34  ;;  %v5154_v55 = vpop.permute.xlu0 %5153  ;;  %v6934_v34 = vld [vmem:[%s8692_s4 + $0x4c] ss:$12 sps:$4 sm:$0xff]  }
0x23bd   : > { %6799 = vmatpush3.xpose.msk.msra.mxu1 %vm504_vm2, %v5023_v47  ;;  %6817 = vmatprep.subr.mxu0 %v5154_v55 }
0x23be   : > { %6800 = vmatprep.subr.msk.mxu1 %vm504_vm2, %v5021_v20  ;;  %6818 = vmatpush3.msra.mxu0 %v5154_v55  ;;  %v5148_v44 = vpop.permute.xlu1 %5147 }
0x23bf   : > { %6819 = vmatprep.subr.mxu0 %v5152_v54 }
0x23c0   : > { %6820 = vmatpush3.msra.mxu0 %v5152_v54  ;;  %v5150_v58 = vpop.permute.xlu0 %5149 }
0x23c1   : > { %6801 = vmatpush3.xpose.msk.msra.mxu1 %vm504_vm2, %v5021_v20  ;;  %6821 = vmatprep.subr.mxu0 %v5150_v58 }
0x23c2   : > { %6802 = vmatprep.subr.msk.mxu1 %vm504_vm2, %v5019_v9  ;;  %6822 = vmatpush3.msra.mxu0 %v5150_v58 }
0x23c3   : > { %6823 = vmatprep.subr.mxu0 %v5148_v44 }
0x23c4   : > { %6824 = vmatpush3.msra.mxu0 %v5148_v44 }
0x23c5   : > { %6803 = vmatpush3.xpose.msk.msra.mxu1 %vm504_vm2, %v5019_v9 }
0x23c6   : > { %6804 = vmatprep.subr.msk.mxu1 %vm504_vm2, %v5017_v35 }
0x23c9   : > { %6805 = vmatpush3.xpose.msk.msra.mxu1 %vm504_vm2, %v5017_v35 }
0x23ca   : > { %6806 = vmatprep.subr.msk.mxu1 %vm504_vm2, %v5015_v53 }
0x23cd   : > { %6807 = vmatpush3.xpose.msk.msra.mxu1 %vm504_vm2, %v5015_v53 }
0x23ce   : > { %6808 = vmatprep.subr.msk.mxu1 %vm504_vm2, %v5013_v63 }
0x23d1   : > { %6809 = vmatpush3.xpose.msk.msra.mxu1 %vm504_vm2, %v5013_v63 }
0x23d2   : > { %6840 = vmatprep.subr.bf16.mxu1 %v7158_v0 }
0x23d4   : > { %6811 = vmatmul.mubr.msk.f32.vlgmr.msra.gmra.mxu1 %vm504_vm2, %v5011_v36 }
0x23d5   : > { %6844 = vmatprep.mubr.msk.bf16.mxu1 %vm7159_vm0, %v7158_v0 }
0x2474   : > { %v8524_v48 = vpop.f32.mrf.mxu1 }
0x2476   : > { %v4987_v4 = vpop.f32.mrf.mxu1 }
0x2494   : > { %v6812_v52 = vpop.f32.mrf.mxu1 }
0x2495   : > { %v5126_v56 = vsel %vm1805_vm7, %v6812_v52, -inf }
0x2496   : > { %5127 = vmax.xlane.f32.xlu1 %v5126_v56  ;;  %v5114_v2 = vpop.f32.mrf.mxu1 }
0x2497   : > { %v5123_v24 = vsel %vm1805_vm7, %v5114_v2, -inf }
0x2498   : > { %5124 = vmax.xlane.f32.xlu0 %v5123_v24 }
0x24a7   : > { %5143 = vrot.lane.b32.xlu1 %v8323_v25, %s8728_s17 }
0x24ae   : > { %5145 = vrot.lane.b32.xlu0 %v8319_v51, %s8728_s17  ;;  %s7100_s17 = sshll.u32 %s7172_s19, 4  ;;  %s7101_s17 = int_to_ptr.vmem [resolvable:$false] %s7100_s17 }
0x24cb   : > { %4627 = vadd.xlane.f32.xlu1 %v4626_v11 }
0x24cd   : > { %4624 = vadd.xlane.f32.xlu0 %v4623_v31 }
0x24d1   : > { %4884 = vadd.xlane.f32.xlu0 %v4883_v39 }
0x24d5   : > { %4887 = vadd.xlane.f32.xlu0 %v4886_v6 }
0x251f   : > { %v5128_v18 = vpop.xlane.xlu1 %5127 }
0x2520   : > { %v5130_v7 = vsub.f32 %v6812_v52, %v5128_v18  ;;  %v5936_v52 = vld [vmem:[%s8694_s6 + $0x17] ss:$0 sm:$0xff] }
0x2521   : > { %v5125_v25 = vpop.xlane.xlu0 %5124 }
0x2522   : > { %v5133_v3 = vmul.f32 1.442695, %v5130_v7  ;;  %v5129_v30 = vsub.f32 %v5114_v2, %v5125_v25 }
0x2523   : > { %v5144_v14 = vpop.permute.xlu1 %5143 }
0x2524   : > { %7066 = vpow2.f32 %v5133_v3  ;;  %v5131_v51 = vmul.f32 1.442695, %v5129_v30 }
0x2525   : > { %v5146_v41 = vpop.permute.xlu0 %5145 }
0x2526   : > { %7068 = vpow2.f32 %v5131_v51  ;;  %6825 = vmatprep.subr.mxu0 %v5146_v41 }
0x2527   : > { %6826 = vmatpush3.msra.mxu0 %v5146_v41 }
0x2528   : > { %6827 = vmatprep.subr.mxu0 %v5144_v14 }
0x2529   : > { %6828 = vmatpush3.msra.mxu0 %v5144_v14 }
0x252a   : > { %6832 = vmatprep.subr.bf16.mxu0 %v7158_v0 }
0x2531   : > { %v7067_v8 = vpop.eup %7066 }
0x2532   : > { %v5138_v42 = vsel %vm1805_vm7, %v7067_v8, 0.0 }
0x2533   : > { %v7069_v62 = vpop.eup %7068  ;;  %5139 = vadd.xlane.f32.xlu0 %v5138_v42 }
0x2534   : > { %6829 = vmatprep.mubr.msk.f32.mxu0 %vm1805_vm7, %v7069_v62  ;;  %v5135_v59 = vsel %vm1805_vm7, %v7069_v62, 0.0 }
0x2535   : > { %5136 = vadd.xlane.f32.xlu1 %v5135_v59  ;;  %6830 = vmatmul.mubr.msk.f32.vlgmr.msra.gmra.mxu0 %vm1805_vm7, %v7067_v8 }
0x2536   : > { %6836 = vmatprep.mubr.msk.bf16.mxu0 %vm7159_vm0, %v7158_v0 }
0x2537   : > { %4407 = vadd.xlane.f32.xlu0 %v4406_v22  ;;  %v6937_v22 = vld [vmem:[%s8692_s4 + $0x38] ss:$12 sps:$4 sm:$0xff]  }
0x2539   : > { %4404 = vadd.xlane.f32.xlu1 %v4403_v5  ;;  %v6938_v5 = vld [vmem:[%s8693_s5 + $0x38] sm:$0xff]  }
0x2554   : > { %v4628_v17 = vpop.xlane.xlu1 %4627 }
0x2555   : > { %7070 = vrcp.f32 %v4628_v17 }
0x2556   : > { %v4625_v16 = vpop.xlane.xlu0 %4624 }
0x2557   : > { %7072 = vrcp.f32 %v4625_v16 }
0x255a   : > { %v4885_v46 = vpop.xlane.xlu0 %4884 }
0x255b   : > { %7074 = vrcp.f32 %v4885_v46 }
0x255e   : > { %v4888_v37 = vpop.xlane.xlu0 %4887 }
0x255f   : > { %7076 = vrcp.f32 %v4888_v37 }
0x2562   : > { %v7071_v10 = vpop.eup %7070 }
0x2563   : > { %v4745_v1 = vmul.f32 %v7071_v10, %v8463_v12 }
0x2564   : > { %v7073_v60 = vpop.eup %7072 }
0x2565   : > { %4750 = vrot.lane.b32.xlu0 %v4745_v1, %s8729_s29  ;;  %v4744_v32 = vmul.f32 %v7073_v60, %v8465_v57 }
0x2567   : > { %4748 = vrot.lane.b32.xlu1 %v4744_v32, %s8729_s29 }
0x2568   : > { %v7075_v45 = vpop.eup %7074 }
0x2569   : > { %v4996_v26 = vmul.f32 %v7075_v45, %v4987_v4  ;;  %v5942_v45 = vld [vmem:[%s8694_s6 + $0x1b] ss:$0 sm:$0xff] }
0x256b   : > { %5000 = vrot.lane.b32.xlu1 %v4996_v26, %s8720_s22 }
0x256c   : > { %v7077_v38 = vpop.eup %7076 }
0x256d   : > { %v4997_v49 = vmul.f32 %v7077_v38, %v8524_v48 }
0x256f   : > { %5002 = vrot.lane.b32.xlu1 %v4997_v49, %s8720_s22  ;;  %s314_s22 = sand.u32 1, %s7148_s25  }
0x2570   : > { %s5685_s13 = sshll.u32 %s314_s22, 4  ;;  %s8647_s8 = scalar_lea.sflag [#allocation4], %s314_s22 }
0x2571   : > { %s316_s15 = scalar_lea.vmem [#allocation3], %s5685_s13  ;;  %s7102_s13 = scalar_lea.vmem %s7101_s17, 512 }
0x2572   : > { %s5583_s23 = sshll.u32 %s316_s15, 4  ;;  %s8644_s23 = int_to_ptr.vmem [resolvable:$true] %s5583_s23 }
0x2573   : > { %s7096_s28 = scalar_lea.vmem %s8644_s23, 256  ;;  %p7103_p0 = scmp.lt.s32.totalorder %s8644_s23, %s7101_s17 }
0x2574   : > { %p7097_p11 = scmp.ne.s32.totalorder %s8644_s23, %s7096_s28  ;;  %p7104_p1 = scmp.lt.s32.totalorder %s7102_s13, %s7096_s28 }
0x2576   : > { %p7098_p12 = pnand %p7097_p11, %p7252_p5  ;;  %p7105_p2 = por %p7104_p1, %p7103_p0 }
0x2578   : > { %p7099_p13 = pneg %p7098_p12 }
0x257a   : > { %p7106_p3 = pnand %p7105_p2, %p7099_p13 }
0x25bc   : > { %v5140_v27 = vpop.xlane.xlu0 %5139 }
0x25be   : > { %v5137_v19 = vpop.xlane.xlu1 %5136 }
0x25c0   : > { %v4408_v28 = vpop.xlane.xlu0 %4407 }
0x25c1   : > { %7078 = vrcp.f32 %v4408_v28 }
0x25c2   : > { %v4405_v12 = vpop.xlane.xlu1 %4404 }
0x25c3   : > { %7080 = vrcp.f32 %v4405_v12 }
0x25c4   : > { %7082 = vrcp.f32 %v5140_v27  ;;  %v5943_v27 = vld [vmem:[%s8694_s6 + $0x1e] ss:$0 sm:$0xff] }
0x25c5   : > { %7084 = vrcp.f32 %v5137_v19 }
0x25ce   : > { %v7079_v13 = vpop.eup %7078 }
0x25cf   : > { %v4493_v57 = vmul.f32 %v7079_v13, %v8395_v50 }
0x25d0   : > { %v7081_v23 = vpop.eup %7080 }
0x25d1   : > { %4495 = vst.msk [vmem:[#allocation2 + $0x8] sm:$0xff] %vm504_vm2, %v4493_v57  ;;  %v4492_v20 = vmul.f32 %v7081_v23, %v8397_v40  ;;  %v7083_v50 = vpop.eup %7082  ;;  %v6939_v57 = vld [vmem:[%s8693_s5 + $0x30] sm:$0xff]   ;;  %v6940_v23 = vld [vmem:[%s8693_s5 + $0x28] sm:$0xff]  }
0x25d2   : > { %v7085_v40 = vpop.eup %7084 }
0x25d3   : > { %4494 = vst.msk [vmem:[#allocation2] sm:$0xff] %vm504_vm2, %v4492_v20  ;;  %v6941_v20 = vld [vmem:[%s8693_s5 + $0x20] sm:$0xff]  }
0x25d7   : > { %v4751_v47 = vpop.permute.xlu0 %4750 }
0x25d8   : > { %4755 = vst.msk [vmem:[#allocation2 + $0x8] sm:$0xff] %vm906_vm4, %v4751_v47  ;;  %v5949_v47 = vld [vmem:[%s8694_s6 + $0x18] ss:$0 sm:$0xff] }
0x25d9   : > { %v4749_v35 = vpop.permute.xlu1 %4748 }
0x25da   : > { %4754 = vst.msk [vmem:[#allocation2] sm:$0xff] %vm906_vm4, %v4749_v35 }
0x25dd   : > { %v5001_v9 = vpop.permute.xlu1 %5000 }
0x25de   : > { %5006 = vst.msk [vmem:[#allocation2] sm:$0xff] %vm1117_vm5, %v5001_v9 }
0x25e1   : > { %v5003_v63 = vpop.permute.xlu1 %5002 }
0x25e2   : > { %5007 = vst.msk [vmem:[#allocation2 + $0x8] sm:$0xff] %vm1117_vm5, %v5003_v63 }
0x25f5   : > { %v6831_v53 = vpop.f32.mrf.mxu0 }
0x25f6   : > { %v5249_v29 = vmul.f32 %v7083_v50, %v6831_v53 }
0x25f7   : > { %v5239_v36 = vpop.f32.mrf.mxu0 }
0x25f8   : > { %v5248_v15 = vmul.f32 %v7085_v40, %v5239_v36  ;;  %5254 = vrot.lane.b32.xlu1 %v5249_v29, %s8721_s20 }
0x25fa   : > { %5252 = vrot.lane.b32.xlu0 %v5248_v15, %s8721_s20 }
0x25fc   : > { %5282 = vrot.lane.b32.xlu1 %v6935_v33, %s8722_s9 }
0x25fe   : > { %5284 = vrot.lane.b32.xlu0 %v6934_v34, %s8722_s9 }
0x266a   : > { %v5255_v21 = vpop.permute.xlu1 %5254 }
0x266b   : > { %5259 = vst.msk [vmem:[#allocation2 + $0x8] sm:$0xff] %vm1328_vm6, %v5255_v21 }
0x266c   : > { %v5253_v54 = vpop.permute.xlu0 %5252 }
0x266d   : > { %5258 = vst.msk [vmem:[#allocation2] sm:$0xff] %vm1328_vm6, %v5253_v54 }
0x266e   : > { %v5283_v58 = vpop.permute.xlu1 %5282 }
0x2670   : > { %v5285_v55 = vpop.permute.xlu0 %5284 }
0x2671   : > { %6833 = vmatpush3.bf16.msra.mxu0 %v5285_v55 }
0x2672   : > { %6834 = vmatprep.subr.bf16.mxu0 %v7158_v0  ;;  %v5261_v48 = vld [vmem:[#allocation2 + $0x8] sm:$0xff] }
0x2674   : > { %v5260_v44 = vld [vmem:[#allocation2] sm:$0xff] }
0x2675   : > { %6835 = vmatpush3.bf16.msra.mxu0 %v5283_v58  ;;  %v5266_v4 = vpack.c.bf16 %v5261_v48, %v5260_v44 }
0x2676   : > { %6848 = vmatprep.subr.bf16.mxu0 %v7158_v0 }
0x2678   : > { %6837 = vmatmul.mubr.msk.bf16.vlgmr.msra.gmra.mxu0 %vm377_vm1, %v5266_v4 }
0x2679   : > { %6856 = vmatprep.mubr.msk.bf16.mxu0 %vm7159_vm0, %v7158_v0  ;;  %6849 = vmatpush3.bf16.msra.mxu0 %v6938_v5 }
0x267a   : > { %6850 = vmatprep.subr.bf16.mxu0 %v7158_v0 }
0x267d   : > { %6851 = vmatpush3.bf16.msra.mxu0 %v6939_v57 }
0x267e   : > { %6852 = vmatprep.subr.bf16.mxu0 %v7158_v0 }
0x2681   : > { %6853 = vmatpush3.bf16.msra.mxu0 %v6940_v23 }
0x2682   : > { %6854 = vmatprep.subr.bf16.mxu0 %v7158_v0 }
0x2685   : > { %6855 = vmatpush3.bf16.msra.mxu0 %v6941_v20 }
0x2738   : > { %v5325_v56 = vpop.f32.mrf.mxu0 }
0x2739   : > { %v5326_v2 = vadd.f32 %v5936_v52, %v5325_v56 }
0x273a   : > { %v6838_v24 = vpop.f32.mrf.mxu0 }
0x273b   : > { %v5334_v11 = vadd.f32 %v5326_v2, %v8217_v43 }
0x273c   : > { %v5328_v31 = vpop.f32.mrf.mxu0 }
0x273d   : > { %v5329_v39 = vadd.f32 %v5936_v52, %v5328_v31  ;;  %v5336_v6 = vsel %vm377_vm1, %v5334_v11, 0.0 }
0x273e   : > { %5337 = vadd.xlane.f32.xlu0 %v5336_v6  ;;  %v6839_v18 = vpop.f32.mrf.mxu0 }
0x273f   : > { %v5335_v7 = vadd.f32 %v5329_v39, %v8219_v61  ;;  %v6936_v61 = vld [vmem:[%s8692_s4 + $0x50] ss:$12 sps:$4 sm:$0xff]  }
0x2740   : > { %6841 = vmatpush3.bf16.msra.mxu1 %v6936_v61 }
0x2741   : > { %v5339_v25 = vsel %vm377_vm1, %v5335_v7, 0.0  ;;  %6842 = vmatprep.subr.bf16.mxu1 %v7158_v0  ;;  %v5962_v0 = vld [vmem:[%s8694_s6 + $0x19] ss:$0 sm:$0xff] }
0x2742   : > { %5340 = vadd.xlane.f32.xlu1 %v5339_v25 }
0x2744   : > { %6843 = vmatpush3.bf16.msra.mxu1 %v6937_v22 }
0x27c7   : > { %v5338_v3 = vpop.xlane.xlu0 %5337 }
0x27c8   : > { %v5342_v30 = vmul.f32 0.03125, %v5338_v3 }
0x27ca   : > { %v5344_v51 = vsub.f32 %v5334_v11, %v5342_v30 }
0x27cb   : > { %v5341_v41 = vpop.xlane.xlu1 %5340 }
0x27cc   : > { %v5343_v14 = vmul.f32 0.03125, %v5341_v41  ;;  %v5346_v8 = vmul.f32 %v5344_v51, %v5344_v51 }
0x27ce   : > { %v5345_v42 = vsub.f32 %v5335_v7, %v5343_v14  ;;  %v5348_v43 = vsel %vm377_vm1, %v5346_v8, 0.0 }
0x27cf   : > { %5349 = vadd.xlane.f32.xlu0 %v5348_v43  ;;  %v5970_v43 = vld [vmem:[%s8694_s6 + $0x1c] ss:$0 sm:$0xff] }
0x27d0   : > { %v5347_v62 = vmul.f32 %v5345_v42, %v5345_v42 }
0x27d2   : > { %v5351_v59 = vsel %vm377_vm1, %v5347_v62, 0.0 }
0x27d3   : > { %5352 = vadd.xlane.f32.xlu0 %v5351_v59  ;;  %v5971_v59 = vld [vmem:[%s8694_s6 + $0x1f] ss:$0 sm:$0xff] }
0x2858   : > { %v5350_v17 = vpop.xlane.xlu0 %5349 }
0x2859   : > { %v5354_v16 = vmul.f32 0.03125, %v5350_v17 }
0x285b   : > { %v5356_v46 = vadd.f32 1e-05, %v5354_v16 }
0x285c   : > { %v5353_v37 = vpop.xlane.xlu0 %5352 }
0x285d   : > { %7086 = vrsqrt.f32 %v5356_v46  ;;  %v5355_v10 = vmul.f32 0.03125, %v5353_v37 }
0x285f   : > { %v5357_v1 = vadd.f32 1e-05, %v5355_v10 }
0x2861   : > { %7088 = vrsqrt.f32 %v5357_v1 }
0x286a   : > { %v7087_v60 = vpop.eup %7086 }
0x286b   : > { %v5360_v32 = vmul.f32 %v7087_v60, %v5344_v51 }
0x286d   : > { %v5366_v49 = vmul.f32 %v5942_v45, %v5360_v32 }
0x286e   : > { %v7089_v26 = vpop.eup %7088 }
0x286f   : > { %v5361_v38 = vmul.f32 %v7089_v26, %v5345_v42  ;;  %v5372_v28 = vadd.f32 %v5943_v27, %v5366_v49 }
0x2871   : > { %v5367_v19 = vmul.f32 %v5942_v45, %v5361_v38 }
0x2873   : > { %v5373_v12 = vadd.f32 %v5943_v27, %v5367_v19 }
0x2875   : > { %v5378_v13 = vpack.c.bf16 %v5373_v12, %v5372_v28 }
0x2877   : > { %6845 = vmatmul.mubr.msk.bf16.vlgmr.msra.gmra.mxu1 %vm377_vm1, %v5378_v13 }
0x2937   : > { %v5433_v35 = vpop.f32.mrf.mxu1 }
0x2938   : > { %v5434_v63 = vadd.f32 %v5949_v47, %v5433_v35 }
0x2939   : > { %v6846_v9 = vpop.f32.mrf.mxu1 }
0x293a   : > { %v5440_v40 = vmax.f32 %v5434_v63, 0.0 }
0x293b   : > { %v5436_v50 = vpop.f32.mrf.mxu1 }
0x293c   : > { %v5437_v53 = vadd.f32 %v5949_v47, %v5436_v50 }
0x293d   : > { %v6847_v29 = vpop.f32.mrf.mxu1 }
0x293e   : > { %v5441_v36 = vmax.f32 %v5437_v53, 0.0 }
0x2940   : > { %v5451_v15 = vpack.c.bf16 %v5441_v36, %v5440_v40 }
0x2942   : > { %6857 = vmatmul.mubr.msk.bf16.vlgmr.msra.gmra.mxu0 %vm1805_vm7, %v5451_v15 }
0x2a02   : > { %v5518_v33 = vpop.f32.mrf.mxu0 }
0x2a03   : > { %v5519_v34 = vadd.f32 %v5962_v0, %v5518_v33 }
0x2a04   : > { %v6858_v21 = vpop.f32.mrf.mxu0 }
0x2a05   : > { %v5527_v54 = vadd.f32 %v5519_v34, %v5372_v28 }
0x2a06   : > { %v5521_v55 = vpop.f32.mrf.mxu0 }
0x2a07   : > { %v5522_v58 = vadd.f32 %v5962_v0, %v5521_v55  ;;  %v5529_v44 = vsel %vm377_vm1, %v5527_v54, 0.0 }
0x2a08   : > { %5530 = vadd.xlane.f32.xlu1 %v5529_v44  ;;  %v6859_v48 = vpop.f32.mrf.mxu0 }
0x2a09   : > { %v5528_v4 = vadd.f32 %v5522_v58, %v5373_v12 }
0x2a0b   : > { %v5532_v52 = vsel %vm377_vm1, %v5528_v4, 0.0 }
0x2a0c   : > { %5533 = vadd.xlane.f32.xlu0 %v5532_v52 }
0x2a91   : > { %v5531_v56 = vpop.xlane.xlu1 %5530 }
0x2a92   : > { %v5535_v2 = vmul.f32 0.03125, %v5531_v56 }
0x2a94   : > { %v5537_v24 = vsub.f32 %v5527_v54, %v5535_v2 }
0x2a95   : > { %v5534_v11 = vpop.xlane.xlu0 %5533 }
0x2a96   : > { %v5536_v31 = vmul.f32 0.03125, %v5534_v11  ;;  %v5539_v39 = vmul.f32 %v5537_v24, %v5537_v24 }
0x2a98   : > { %v5538_v6 = vsub.f32 %v5528_v4, %v5536_v31  ;;  %v5541_v18 = vsel %vm377_vm1, %v5539_v39, 0.0 }
0x2a99   : > { %5542 = vadd.xlane.f32.xlu1 %v5541_v18 }
0x2a9a   : > { %v5540_v7 = vmul.f32 %v5538_v6, %v5538_v6 }
0x2a9c   : > { %v5544_v25 = vsel %vm377_vm1, %v5540_v7, 0.0 }
0x2a9d   : > { %5545 = vadd.xlane.f32.xlu0 %v5544_v25 }
0x2b22   : > { %v5543_v3 = vpop.xlane.xlu1 %5542 }
0x2b23   : > { %v5547_v30 = vmul.f32 0.03125, %v5543_v3 }
0x2b25   : > { %v5549_v51 = vadd.f32 1e-05, %v5547_v30 }
0x2b26   : > { %v5546_v41 = vpop.xlane.xlu0 %5545 }
0x2b27   : > { %7090 = vrsqrt.f32 %v5549_v51  ;;  %v5548_v14 = vmul.f32 0.03125, %v5546_v41 }
0x2b29   : > { %v5550_v8 = vadd.f32 1e-05, %v5548_v14 }
0x2b2b   : > { %7092 = vrsqrt.f32 %v5550_v8 }
0x2b34   : > { %v7091_v42 = vpop.eup %7090 }
0x2b35   : > { %v5553_v62 = vmul.f32 %v7091_v42, %v5537_v24 }
0x2b37   : > { %v5559_v61 = vmul.f32 %v5970_v43, %v5553_v62 }
0x2b38   : > { %v7093_v22 = vpop.eup %7092 }
0x2b39   : > { %v5554_v5 = vmul.f32 %v7093_v22, %v5538_v6  ;;  %v5565_v17 = vadd.f32 %v5971_v59, %v5559_v61 }
0x2b3b   : > { %v5560_v16 = vmul.f32 %v5970_v43, %v5554_v5  ;;  %5567 = vst.msk [vmem:[%s316_s15] sm:$0xff] %vm377_vm1, %v5565_v17 }
0x2b3d   : > { %v5566_v46 = vadd.f32 %v5971_v59, %v5560_v16 }
0x2b3f   : > { %5568 = vst.msk [vmem:[%s316_s15 + $0x8] sm:$0xff] %vm377_vm1, %v5566_v46 }
0x2b40   : > { %7109 = shalt.err (!%p7106_p3)
}
0x2b41   : > { %s7110_s22 = scalar_lea.hbm %s8642_s18, 256  ;;  %s7114_s14 = scalar_lea.hbm %s8695_s7, 512 }
0x2b42   : > { %p7111_p4 = scmp.ne.s32.totalorder %s8642_s18, %s7110_s22  ;;  %p7115_p9 = scmp.lt.s32.totalorder %s8642_s18, %s8695_s7 }
0x2b43   : > { %p7116_p10 = scmp.lt.s32.totalorder %s7114_s14, %s7110_s22 }
0x2b44   : > { %p7112_p7 = pnand %p7111_p4, %p7252_p5 }
0x2b45   : > { %p7117_p11 = por %p7116_p10, %p7115_p9 }
0x2b46   : > { %p7113_p8 = pneg %p7112_p7 }
0x2b48   : > { %p7118_p12 = pnand %p7117_p11, %p7113_p8 }
0x2b4a   : > { %7121 = shalt.err (!%p7118_p12)
}
0x2b4b   : > { %s7173_s16 = smov 128  }
0x2b4c   : > { %6860 = dma.vmem_to_hbm [thread:$0]  (%p7252_p5), %s8644_s23, 256, %s8642_s18, %s8647_s8, %s7173_s16, %s7173_s16, %s8729_s29  }
0x2b4d PF: > { %p6866_p13 = scmp.ge.s32.totalorder %s7156_s27, 2  ;;  %s5598_s28 = sand.u32 1, %s7144_s24  }
0x2b4e   : > { %s5599_s19 = scalar_lea.sflag [#allocation4], %s5598_s28 }
0x2b4f   : > { %p6863_p0 = pnand %p6866_p13, %p7256_p6 }
0x2b51   : > { %p6864_p1 = pneg %p6863_p0 }
0x2b53   : > { %7139 = dma.done.wait (%p6864_p1), %s5599_s19, 256  }
0x2b54   : > { %7141 = vsyncadd (%p6864_p1), %s5599_s19, 4294967040  ;;  %p17_p2 = scmp.ge.s32.totalorder %s7239_s30, 4   ;;  %s8731_s24 = smov %s7148_s25 }
0x2b55   : > { %s8732_s25 = smov %s7152_s26  ;;  %s8733_s26 = smov %s7250_s10 }
0x2b56   : > { %s8734_s27 = smov %s7239_s30  ;;  %19 = sbr.rel (!%p17_p2) target bundleno = 3 (0x3), region = 95 }
0x2b5b   :  { %5604 = vsyncpa [#allocation4], 1 }
0x2b5c   :  { %5606 = vsyncpa [#allocation4 + $0x1], 1 }

</bundles_post_ra>
